<compile_context>
chip_gen: v6e
topology: v6e:2x2x1
jax: 0.10.0
libtpu: 0.0.40
codegen_flags: <defaults>
</compile_context>

<pallas_src>
import functools
import math

import jax
import jax.numpy as jnp
import numpy as np
from jax.experimental import pallas as pl
from jax.experimental.pallas import tpu as pltpu

_HIGHEST = jax.lax.Precision.HIGHEST

# ---------------------------------------------------------------------------
# Cl(3,0) multiplication table (trace-time Python constants, blade ordering:
# 1, e1, e2, e3, e12, e13, e23, e123 — same as CGENN / `clifford` package).
# ---------------------------------------------------------------------------
_BLADES = [(), (1,), (2,), (3,), (1, 2), (1, 3), (2, 3), (1, 2, 3)]
_BLADE_INDEX = {b: i for i, b in enumerate(_BLADES)}


def _blade_mul(a, b):
    """Product of two canonical blades for metric (1,1,1): (blade, sign)."""
    sign = 1
    res = list(a)
    for e in b:
        res.append(e)
        i = len(res) - 1
        while i > 0 and res[i] < res[i - 1]:
            res[i], res[i - 1] = res[i - 1], res[i]
            sign = -sign
            i -= 1
        if i > 0 and res[i] == res[i - 1]:
            del res[i - 1:i + 1]  # e_k * e_k = +1
    return tuple(res), sign


# GP_TERMS[j] = list of (i, k, sign) with e_i * e_k = sign * e_j, i.e.
# result_j = sum sign * left_i * right_k   (== einsum "...i,ijk,...k->...j")
GP_TERMS = [[] for _ in range(8)]
for _i, _bi in enumerate(_BLADES):
    for _k, _bk in enumerate(_BLADES):
        _bj, _sgn = _blade_mul(_bi, _bk)
        GP_TERMS[_BLADE_INDEX[_bj]].append((_i, _k, _sgn))

_EPS = 1e-6
_GELU_C = math.sqrt(2.0 / math.pi)


# ---------------------------------------------------------------------------
# Pallas kernel.
# Kernel layout (per grid step, tb = block_b batch lanes):
#   s_ref    : (si, tb)
#   v_ref    : (vi, 8*tb)    lane = blade*tb + batch  (blade-in-lanes)
#   vout_ref : (vo, 8*tb)    same layout
# All weights are pre-packed / pre-fused in pack_cvp_params().
# ---------------------------------------------------------------------------
def cvp_gp_kernel(s_ref, v_ref,
                  w_lr_ref, b_l_ref, b_r_ref,
                  w_o_ref, b_o_ref, a_ref,
                  w_wv_ref, w_tail_ref, b_tail_ref,
                  vout_ref):
    tb = s_ref.shape[1]
    h = w_lr_ref.shape[0] // 2
    wdt = w_lr_ref.dtype

    # --- fused left/right MVLinear: dense (2h, vi) @ (vi, 8*tb), N = 8*tb ---
    lr = jnp.dot(w_lr_ref[...], v_ref[...].astype(wdt),
                 preferred_element_type=jnp.float32,
                 precision=_HIGHEST)                             # (2h, 8*tb)
    left = [lr[0:h, j * tb:(j + 1) * tb] for j in range(8)]
    right = [lr[h:2 * h, j * tb:(j + 1) * tb] for j in range(8)]
    left[0] = left[0] + b_l_ref[...]        # MVLinear bias lives in blade 0
    right[0] = right[0] + b_r_ref[...]

    # --- geometric product (Cayley contraction), VALU on (h, tb) slabs ------
    gp = []
    for j in range(8):
        acc = None
        for (i, k, sgn) in GP_TERMS[j]:
            t = left[i] * right[k]
            if acc is None:
                acc = t if sgn > 0 else -t
            elif sgn > 0:
                acc = acc + t
            else:
                acc = acc - t
        gp.append(acc)
    g = jnp.concatenate(gp, axis=1)                              # (h, 8*tb)

    # --- linear_out: dense (vo, h) @ (h, 8*tb) ------------------------------
    y = jnp.dot(w_o_ref[...], g.astype(wdt),
                preferred_element_type=jnp.float32,
                precision=_HIGHEST)                              # (vo, 8*tb)
    ys = [y[:, j * tb:(j + 1) * tb] for j in range(8)]
    ys[0] = ys[0] + b_o_ref[...]

    # --- MVLayerNorm (EUP reciprocal + 1 Newton-Raphson refinement) ---------
    sq = ys[0] * ys[0]
    for j in range(1, 8):
        sq = sq + ys[j] * ys[j]
    norm = jnp.sqrt(sq)                                          # (vo, tb)
    d = jnp.mean(norm, axis=0, keepdims=True) + _EPS             # (1, tb)
    r = pl.reciprocal(d, approx=True)
    r = r * (2.0 - d * r)                                        # NR refine
    scale = a_ref[...] * r                                       # (vo, tb)

    # --- residual + MVGELU (residual slabs re-read at point of use) ---------
    vs = [ys[j] * scale + v_ref[:, j * tb:(j + 1) * tb] for j in range(8)]
    x0 = vs[0]
    z = _GELU_C * (2.0 * (x0 + 0.044715 * x0 * x0 * x0))
    den = 1.0 + jnp.exp(-z)
    gr = pl.reciprocal(den, approx=True)
    gate = gr * (2.0 - den * gr)                                 # sigmoid
    vs = [vs[j] * gate for j in range(8)]

    # --- blades 1..7: wv channel mixing (N = 7*tb) --------------------------
    w17 = jnp.dot(w_wv_ref[...],
                  jnp.concatenate(vs[1:], axis=1).astype(wdt),
                  preferred_element_type=jnp.float32,
                  precision=_HIGHEST)                            # (vo, 7*tb)

    # --- blade 0: fused wv(blade0) + s2v tail (single matmul) ---------------
    cat = jnp.concatenate([vs[0], s_ref[...]], axis=0)           # (vo+si, tb)
    scalar = jnp.dot(w_tail_ref[...], cat.astype(wdt),
                     preferred_element_type=jnp.float32,
                     precision=_HIGHEST) + b_tail_ref[...]       # (vo, tb)

    # --- lane-aligned slab stores (no output concat copy) -------------------
    vout_ref[:, :tb] = scalar
    vout_ref[:, tb:] = w17


# ---------------------------------------------------------------------------
# One-time weight packing / fusion (hoisted out of the per-call hot path).
# ---------------------------------------------------------------------------
def pack_cvp_params(params, weight_dtype=jnp.float32):
    f32 = jnp.float32
    wl = params["wl"].astype(f32)
    wr = params["wr"].astype(f32)
    wo = params["wo"].astype(f32)
    wwv = params["wwv"].astype(f32)
    ws2v_v = params["ws2v_v"].astype(f32)
    ws2v_s = params["ws2v_s"].astype(f32)
    h, vi = wl.shape
    vo = wo.shape[0]
    si = ws2v_s.shape[1]
    # forward's residual / wv / s2v widths require vi == vo == h_dim
    assert vi == vo == h, "CVPGeometricProductLayer requires vi == vo == h_dim"
    assert h % 8 == 0 and si % 8 == 0, "keep channel counts sublane (8) aligned"

    # fused tail: scalar = Ws2v_v @ (Wwv @ v3_b0 + bwv) + Ws2v_s @ s + bs2v
    w_tail = jnp.concatenate(
        [jnp.dot(ws2v_v, wwv, precision=_HIGHEST), ws2v_s], axis=1)  # (vo, vo+si)
    b_tail = (jnp.dot(ws2v_v, params["bwv"].reshape(vo, 1), precision=_HIGHEST)
              + params["bs2v"].reshape(vo, 1))                       # (vo, 1)

    return dict(
        w_lr=jnp.concatenate([wl, wr], axis=0).astype(weight_dtype),  # (2h, vi)
        b_l=params["bl"].reshape(h, 1).astype(f32),
        b_r=params["br"].reshape(h, 1).astype(f32),
        w_o=wo.astype(weight_dtype),                                   # (vo, h)
        b_o=params["bo"].reshape(vo, 1).astype(f32),
        a=params["a"].reshape(vo, 1).astype(f32),
        w_wv=wwv.astype(weight_dtype),                                 # (vo, h)
        w_tail=w_tail.astype(weight_dtype),                            # (vo, vo+si)
        b_tail=b_tail.astype(f32),
    )


# ---------------------------------------------------------------------------
# Layout helpers (for a stack of CVP layers these round trips should be paid
# only once at the model boundary; cvp_gp_apply works in kernel layout).
# ---------------------------------------------------------------------------
def to_kernel_layout(s, v, block_b):
    B, vi, nb = v.shape
    nt = B // block_b
    v_t = (v.reshape(nt, block_b, vi, nb)
             .transpose(2, 0, 3, 1)
             .reshape(vi, nt * nb * block_b))        # lane = blade*tb + batch
    s_t = jnp.transpose(s, (1, 0))                   # (si, B)
    return s_t, v_t


def from_kernel_layout(v_t, B, block_b):
    vo = v_t.shape[0]
    nt = B // block_b
    return (v_t.reshape(vo, nt, 8, block_b)
               .transpose(1, 3, 0, 2)
               .reshape(B, vo, 8))


def cvp_gp_apply(s_t, v_t, packed, *, block_b=128):
    """Runs the layer on activations already in the lane-dense kernel layout."""
    si, B = s_t.shape
    vi = v_t.shape[0]
    vo = packed["w_o"].shape[0]
    assert v_t.shape[1] == 8 * B
    nt = B // block_b
    assert nt * block_b == B, "batch must be a multiple of block_b"
    # even number of parallel grid steps -> both v7x TensorCores get equal work
    assert nt % 2 == 0, "use an even number of batch tiles (B / block_b)"

    param_names = ("w_lr", "b_l", "b_r", "w_o", "b_o", "a",
                   "w_wv", "w_tail", "b_tail")
    param_list = [packed[n] for n in param_names]
    param_specs = [pl.BlockSpec(p.shape, lambda i: (0, 0)) for p in param_list]

    return pl.pallas_call(
        cvp_gp_kernel,
        out_shape=jax.ShapeDtypeStruct((vo, 8 * B), jnp.float32),
        grid_spec=pltpu.PrefetchScalarGridSpec(
            num_scalar_prefetch=0,
            grid=(nt,),
            in_specs=[pl.BlockSpec((si, block_b), lambda i: (0, i)),
                      pl.BlockSpec((vi, 8 * block_b), lambda i: (0, i))]
                     + param_specs,
            out_specs=pl.BlockSpec((vo, 8 * block_b), lambda i: (0, i)),
        ),
        compiler_params=pltpu.CompilerParams(
            dimension_semantics=("parallel",)),
    )(s_t, v_t, *param_list)


@functools.partial(jax.jit, static_argnames=("block_b",))
def cvp_geometric_product_layer(s, v, packed, *, block_b=128):
    """s: (B, si) f32, v: (B, vi, 8) f32 (PyTorch layout). Returns (s, v_out)."""
    B = v.shape[0]
    s_t, v_t = to_kernel_layout(s, v, block_b)
    v_out_t = cvp_gp_apply(s_t, v_t, packed, block_b=block_b)
    v_out = from_kernel_layout(v_out_t, B, block_b)
    return s, v_out


# ---------------------------------------------------------------------------
# Pure-JAX reference (same math, PyTorch layout, HIGHEST matmul precision).
# ---------------------------------------------------------------------------
def reference_forward(s, v, params):
    cayley = np.zeros((8, 8, 8), np.float32)
    for j in range(8):
        for (i, k, sgn) in GP_TERMS[j]:
            cayley[i, j, k] = sgn
    cayley = jnp.asarray(cayley)

    def mv_linear(x, w, b):
        y = jnp.einsum("bmi,nm->bni", x, w, precision=_HIGHEST)
        bias = jnp.zeros((1, w.shape[0], 8), jnp.float32).at[:, :, 0].set(b)
        return y + bias

    vr = mv_linear(v, params["wr"], params["br"])
    vl = mv_linear(v, params["wl"], params["bl"])
    vg = jnp.einsum("bni,ijk,bnk->bnj", vl, cayley, vr, precision=_HIGHEST)
    vg = mv_linear(vg, params["wo"], params["bo"])
    norm = jnp.sqrt(jnp.sum(vg * vg, axis=-1, keepdims=True))       # (B, vo, 1)
    norm_mean = jnp.mean(norm, axis=1, keepdims=True) + _EPS        # (B, 1, 1)
    vg = params["a"][:, :, None] * vg / norm_mean

    v2 = vg + v
    x0 = v2[..., 0]
    gate = 1.0 / (1.0 + jnp.exp(-(_GELU_C * (2.0 * (x0 + 0.044715 * x0 ** 3)))))
    v2 = gate[..., None] * v2
    v2 = mv_linear(v2, params["wwv"], params["bwv"])
    w_s2v = jnp.concatenate([params["ws2v_v"], params["ws2v_s"]], axis=1)
    cat = jnp.concatenate([v2[..., 0], s], axis=-1)
    scalar = jnp.einsum("bk,nk->bn", cat, w_s2v, precision=_HIGHEST) \
        + params["bs2v"]
    v2 = v2.at[..., 0].set(scalar)
    return s, v2


# ---------------------------------------------------------------------------
if __name__ == "__main__":
    # Module config: in_dims=(si, vi), out_dims=(so, vo), h_dim=None.
    # B=512 / block_b=128 -> 4 lane-dense "parallel" grid steps (even count so
    # v7x's two TensorCores split evenly; >=4 steps so the pipeline can hide
    # prologue/epilogue).
    B, si, vi = 512, 8, 16
    vo, h = vi, vi
    block_b = 128

    key = jax.random.PRNGKey(0)
    ks = jax.random.split(key, 16)

    def rnd(k, shape, scale=0.3):
        return (scale * jax.random.normal(k, shape)).astype(jnp.float32)

    params = dict(
        wr=rnd(ks[0], (h, vi), 1.0 / math.sqrt(vi)),
        br=rnd(ks[1], (1, h)),
        wl=rnd(ks[2], (h, vi), 1.0 / math.sqrt(vi)),
        bl=rnd(ks[3], (1, h)),
        wo=rnd(ks[4], (vo, h), 1.0 / math.sqrt(h)),
        bo=rnd(ks[5], (1, vo)),
        a=jnp.ones((1, vo), jnp.float32),              # MVLayerNorm scale
        wwv=rnd(ks[6], (vo, h), 1.0 / math.sqrt(h)),
        bwv=rnd(ks[7], (1, vo)),
        ws2v_v=rnd(ks[8], (vo, h), 1.0 / math.sqrt(si + h)),
        ws2v_s=rnd(ks[9], (vo, si), 1.0 / math.sqrt(si + h)),
        bs2v=rnd(ks[10], (1, vo)),
    )

    s_in = rnd(ks[11], (B, si), 1.0)
    v_in = rnd(ks[12], (B, vi, 8), 1.0)

    s_chk, v_chk = reference_forward(s_in, v_in, params)

    # 1) f32 weights: tight correctness check (approx reciprocal + Newton step).
    packed32 = pack_cvp_params(params, weight_dtype=jnp.float32)
    s_out, v_out = cvp_geometric_product_layer(s_in, v_in, packed32,
                                               block_b=block_b)
    jax.block_until_ready(v_out)
    assert v_out.shape == (B, vo, 8) and s_out.shape == (B, si)
    err32 = float(jnp.max(jnp.abs(v_out - v_chk)))
    assert jnp.allclose(v_out, v_chk, atol=2e-3, rtol=2e-3), err32

    # 2) bf16 weights (MXU-rate path): checked against the same math run with
    #    bf16-rounded weights, so only in-kernel bf16 activation/product
    #    rounding remains (~1% relative).
    packed16 = pack_cvp_params(params, weight_dtype=jnp.bfloat16)
    _, v_out16 = cvp_geometric_product_layer(s_in, v_in, packed16,
                                             block_b=block_b)
    jax.block_until_ready(v_out16)
    params_q = dict(params)
    for name in ("wl", "wr", "wo", "wwv", "ws2v_v", "ws2v_s"):
        params_q[name] = params[name].astype(jnp.bfloat16).astype(jnp.float32)
    _, v_chk16 = reference_forward(s_in, v_in, params_q)
    err16 = float(jnp.max(jnp.abs(v_out16 - v_chk16)))
    assert err16 < 1e-1, err16

    print("KERNEL_OK")
</pallas_src>

<mosaic_0001>
module attributes {stable_mosaic.version = 11 : i64} {
  func.func @cvp_gp_kernel(%arg0: i32, %arg1: memref<8x128xf32, #tpu.memory_space<vmem>>, %arg2: memref<16x1024xf32, #tpu.memory_space<vmem>>, %arg3: memref<32x16xf32, #tpu.memory_space<vmem>>, %arg4: memref<16x1xf32, #tpu.memory_space<vmem>>, %arg5: memref<16x1xf32, #tpu.memory_space<vmem>>, %arg6: memref<16x16xf32, #tpu.memory_space<vmem>>, %arg7: memref<16x1xf32, #tpu.memory_space<vmem>>, %arg8: memref<16x1xf32, #tpu.memory_space<vmem>>, %arg9: memref<16x16xf32, #tpu.memory_space<vmem>>, %arg10: memref<16x24xf32, #tpu.memory_space<vmem>>, %arg11: memref<16x1xf32, #tpu.memory_space<vmem>>, %arg12: memref<16x1024xf32, #tpu.memory_space<vmem>>) attributes {dimension_semantics = [#tpu.dimension_semantics<parallel>], iteration_bounds = array<i64: 4>, scalar_prefetch = 0 : i64, scratch_operands = 0 : i64, tpu.core_type = #tpu.core_type<tc>, window_params = [{transform_indices = @transform_0, window_bounds = array<i64: 8, 128>}, {transform_indices = @transform_1, window_bounds = array<i64: 16, 1024>}, {pipeline_mode = #tpu.pipeline_mode<synchronous>, transform_indices = @transform_2, window_bounds = array<i64: 32, 16>}, {pipeline_mode = #tpu.pipeline_mode<synchronous>, transform_indices = @transform_3, window_bounds = array<i64: 16, 1>}, {pipeline_mode = #tpu.pipeline_mode<synchronous>, transform_indices = @transform_4, window_bounds = array<i64: 16, 1>}, {pipeline_mode = #tpu.pipeline_mode<synchronous>, transform_indices = @transform_5, window_bounds = array<i64: 16, 16>}, {pipeline_mode = #tpu.pipeline_mode<synchronous>, transform_indices = @transform_6, window_bounds = array<i64: 16, 1>}, {pipeline_mode = #tpu.pipeline_mode<synchronous>, transform_indices = @transform_7, window_bounds = array<i64: 16, 1>}, {pipeline_mode = #tpu.pipeline_mode<synchronous>, transform_indices = @transform_8, window_bounds = array<i64: 16, 16>}, {pipeline_mode = #tpu.pipeline_mode<synchronous>, transform_indices = @transform_9, window_bounds = array<i64: 16, 24>}, {pipeline_mode = #tpu.pipeline_mode<synchronous>, transform_indices = @transform_10, window_bounds = array<i64: 16, 1>}, {transform_indices = @transform_11, window_bounds = array<i64: 16, 1024>}]} {
    %c0 = arith.constant 0 : index
    %c0_0 = arith.constant 0 : index
    %0 = vector.load %arg3[%c0, %c0_0] : memref<32x16xf32, #tpu.memory_space<vmem>>, vector<32x16xf32>
    %c0_1 = arith.constant 0 : index
    %c0_2 = arith.constant 0 : index
    %1 = vector.load %arg2[%c0_1, %c0_2] : memref<16x1024xf32, #tpu.memory_space<vmem>>, vector<16x1024xf32>
    %cst = arith.constant dense<0.000000e+00> : vector<32x1024xf32>
    %2 = tpu.matmul %0, %1, %cst {dimension_numbers = #tpu.dot_dimension_numbers<[1], [0], [0], [1], [0, 0, 1, 1], [], []>, precision = #tpu.contract_precision<fp32>} : vector<32x16xf32>, vector<16x1024xf32>, vector<32x1024xf32> -> vector<32x1024xf32>
    %3 = vector.extract_strided_slice %2 {offsets = [0, 0], sizes = [16, 128], strides = [1, 1]} : vector<32x1024xf32> to vector<16x128xf32>
    %4 = vector.extract_strided_slice %2 {offsets = [0, 128], sizes = [16, 128], strides = [1, 1]} : vector<32x1024xf32> to vector<16x128xf32>
    %5 = vector.extract_strided_slice %2 {offsets = [0, 256], sizes = [16, 128], strides = [1, 1]} : vector<32x1024xf32> to vector<16x128xf32>
    %6 = vector.extract_strided_slice %2 {offsets = [0, 384], sizes = [16, 128], strides = [1, 1]} : vector<32x1024xf32> to vector<16x128xf32>
    %7 = vector.extract_strided_slice %2 {offsets = [0, 512], sizes = [16, 128], strides = [1, 1]} : vector<32x1024xf32> to vector<16x128xf32>
    %8 = vector.extract_strided_slice %2 {offsets = [0, 640], sizes = [16, 128], strides = [1, 1]} : vector<32x1024xf32> to vector<16x128xf32>
    %9 = vector.extract_strided_slice %2 {offsets = [0, 768], sizes = [16, 128], strides = [1, 1]} : vector<32x1024xf32> to vector<16x128xf32>
    %10 = vector.extract_strided_slice %2 {offsets = [0, 896], sizes = [16, 128], strides = [1, 1]} : vector<32x1024xf32> to vector<16x128xf32>
    %11 = vector.extract_strided_slice %2 {offsets = [16, 0], sizes = [16, 128], strides = [1, 1]} : vector<32x1024xf32> to vector<16x128xf32>
    %12 = vector.extract_strided_slice %2 {offsets = [16, 128], sizes = [16, 128], strides = [1, 1]} : vector<32x1024xf32> to vector<16x128xf32>
    %13 = vector.extract_strided_slice %2 {offsets = [16, 256], sizes = [16, 128], strides = [1, 1]} : vector<32x1024xf32> to vector<16x128xf32>
    %14 = vector.extract_strided_slice %2 {offsets = [16, 384], sizes = [16, 128], strides = [1, 1]} : vector<32x1024xf32> to vector<16x128xf32>
    %15 = vector.extract_strided_slice %2 {offsets = [16, 512], sizes = [16, 128], strides = [1, 1]} : vector<32x1024xf32> to vector<16x128xf32>
    %16 = vector.extract_strided_slice %2 {offsets = [16, 640], sizes = [16, 128], strides = [1, 1]} : vector<32x1024xf32> to vector<16x128xf32>
    %17 = vector.extract_strided_slice %2 {offsets = [16, 768], sizes = [16, 128], strides = [1, 1]} : vector<32x1024xf32> to vector<16x128xf32>
    %18 = vector.extract_strided_slice %2 {offsets = [16, 896], sizes = [16, 128], strides = [1, 1]} : vector<32x1024xf32> to vector<16x128xf32>
    %c0_3 = arith.constant 0 : index
    %c0_4 = arith.constant 0 : index
    %19 = vector.load %arg4[%c0_3, %c0_4] : memref<16x1xf32, #tpu.memory_space<vmem>>, vector<16x1xf32>
    %20 = vector.broadcast %19 : vector<16x1xf32> to vector<16x128xf32>
    %21 = arith.addf %3, %20 : vector<16x128xf32>
    %c0_5 = arith.constant 0 : index
    %c0_6 = arith.constant 0 : index
    %22 = vector.load %arg5[%c0_5, %c0_6] : memref<16x1xf32, #tpu.memory_space<vmem>>, vector<16x1xf32>
    %23 = vector.broadcast %22 : vector<16x1xf32> to vector<16x128xf32>
    %24 = arith.addf %11, %23 : vector<16x128xf32>
    %25 = arith.mulf %21, %24 : vector<16x128xf32>
    %26 = arith.mulf %4, %12 : vector<16x128xf32>
    %27 = arith.addf %25, %26 : vector<16x128xf32>
    %28 = arith.mulf %5, %13 : vector<16x128xf32>
    %29 = arith.addf %27, %28 : vector<16x128xf32>
    %30 = arith.mulf %6, %14 : vector<16x128xf32>
    %31 = arith.addf %29, %30 : vector<16x128xf32>
    %32 = arith.mulf %7, %15 : vector<16x128xf32>
    %33 = arith.subf %31, %32 : vector<16x128xf32>
    %34 = arith.mulf %8, %16 : vector<16x128xf32>
    %35 = arith.subf %33, %34 : vector<16x128xf32>
    %36 = arith.mulf %9, %17 : vector<16x128xf32>
    %37 = arith.subf %35, %36 : vector<16x128xf32>
    %38 = arith.mulf %10, %18 : vector<16x128xf32>
    %39 = arith.subf %37, %38 : vector<16x128xf32>
    %40 = arith.mulf %21, %12 : vector<16x128xf32>
    %41 = arith.mulf %4, %24 : vector<16x128xf32>
    %42 = arith.addf %40, %41 : vector<16x128xf32>
    %43 = arith.mulf %5, %15 : vector<16x128xf32>
    %44 = arith.subf %42, %43 : vector<16x128xf32>
    %45 = arith.mulf %6, %16 : vector<16x128xf32>
    %46 = arith.subf %44, %45 : vector<16x128xf32>
    %47 = arith.mulf %7, %13 : vector<16x128xf32>
    %48 = arith.addf %46, %47 : vector<16x128xf32>
    %49 = arith.mulf %8, %14 : vector<16x128xf32>
    %50 = arith.addf %48, %49 : vector<16x128xf32>
    %51 = arith.mulf %9, %18 : vector<16x128xf32>
    %52 = arith.subf %50, %51 : vector<16x128xf32>
    %53 = arith.mulf %10, %17 : vector<16x128xf32>
    %54 = arith.subf %52, %53 : vector<16x128xf32>
    %55 = arith.mulf %21, %13 : vector<16x128xf32>
    %56 = arith.mulf %4, %15 : vector<16x128xf32>
    %57 = arith.addf %55, %56 : vector<16x128xf32>
    %58 = arith.mulf %5, %24 : vector<16x128xf32>
    %59 = arith.addf %57, %58 : vector<16x128xf32>
    %60 = arith.mulf %6, %17 : vector<16x128xf32>
    %61 = arith.subf %59, %60 : vector<16x128xf32>
    %62 = arith.mulf %7, %12 : vector<16x128xf32>
    %63 = arith.subf %61, %62 : vector<16x128xf32>
    %64 = arith.mulf %8, %18 : vector<16x128xf32>
    %65 = arith.addf %63, %64 : vector<16x128xf32>
    %66 = arith.mulf %9, %14 : vector<16x128xf32>
    %67 = arith.addf %65, %66 : vector<16x128xf32>
    %68 = arith.mulf %10, %16 : vector<16x128xf32>
    %69 = arith.addf %67, %68 : vector<16x128xf32>
    %70 = arith.mulf %21, %14 : vector<16x128xf32>
    %71 = arith.mulf %4, %16 : vector<16x128xf32>
    %72 = arith.addf %70, %71 : vector<16x128xf32>
    %73 = arith.mulf %5, %17 : vector<16x128xf32>
    %74 = arith.addf %72, %73 : vector<16x128xf32>
    %75 = arith.mulf %6, %24 : vector<16x128xf32>
    %76 = arith.addf %74, %75 : vector<16x128xf32>
    %77 = arith.mulf %7, %18 : vector<16x128xf32>
    %78 = arith.subf %76, %77 : vector<16x128xf32>
    %79 = arith.mulf %8, %12 : vector<16x128xf32>
    %80 = arith.subf %78, %79 : vector<16x128xf32>
    %81 = arith.mulf %9, %13 : vector<16x128xf32>
    %82 = arith.subf %80, %81 : vector<16x128xf32>
    %83 = arith.mulf %10, %15 : vector<16x128xf32>
    %84 = arith.subf %82, %83 : vector<16x128xf32>
    %85 = arith.mulf %21, %15 : vector<16x128xf32>
    %86 = arith.mulf %4, %13 : vector<16x128xf32>
    %87 = arith.addf %85, %86 : vector<16x128xf32>
    %88 = arith.mulf %5, %12 : vector<16x128xf32>
    %89 = arith.subf %87, %88 : vector<16x128xf32>
    %90 = arith.mulf %6, %18 : vector<16x128xf32>
    %91 = arith.addf %89, %90 : vector<16x128xf32>
    %92 = arith.mulf %7, %24 : vector<16x128xf32>
    %93 = arith.addf %91, %92 : vector<16x128xf32>
    %94 = arith.mulf %8, %17 : vector<16x128xf32>
    %95 = arith.subf %93, %94 : vector<16x128xf32>
    %96 = arith.mulf %9, %16 : vector<16x128xf32>
    %97 = arith.addf %95, %96 : vector<16x128xf32>
    %98 = arith.mulf %10, %14 : vector<16x128xf32>
    %99 = arith.addf %97, %98 : vector<16x128xf32>
    %100 = arith.mulf %21, %16 : vector<16x128xf32>
    %101 = arith.mulf %4, %14 : vector<16x128xf32>
    %102 = arith.addf %100, %101 : vector<16x128xf32>
    %103 = arith.mulf %5, %18 : vector<16x128xf32>
    %104 = arith.subf %102, %103 : vector<16x128xf32>
    %105 = arith.mulf %6, %12 : vector<16x128xf32>
    %106 = arith.subf %104, %105 : vector<16x128xf32>
    %107 = arith.mulf %7, %17 : vector<16x128xf32>
    %108 = arith.addf %106, %107 : vector<16x128xf32>
    %109 = arith.mulf %8, %24 : vector<16x128xf32>
    %110 = arith.addf %108, %109 : vector<16x128xf32>
    %111 = arith.mulf %9, %15 : vector<16x128xf32>
    %112 = arith.subf %110, %111 : vector<16x128xf32>
    %113 = arith.mulf %10, %13 : vector<16x128xf32>
    %114 = arith.subf %112, %113 : vector<16x128xf32>
    %115 = arith.mulf %21, %17 : vector<16x128xf32>
    %116 = arith.mulf %4, %18 : vector<16x128xf32>
    %117 = arith.addf %115, %116 : vector<16x128xf32>
    %118 = arith.mulf %5, %14 : vector<16x128xf32>
    %119 = arith.addf %117, %118 : vector<16x128xf32>
    %120 = arith.mulf %6, %13 : vector<16x128xf32>
    %121 = arith.subf %119, %120 : vector<16x128xf32>
    %122 = arith.mulf %7, %16 : vector<16x128xf32>
    %123 = arith.subf %121, %122 : vector<16x128xf32>
    %124 = arith.mulf %8, %15 : vector<16x128xf32>
    %125 = arith.addf %123, %124 : vector<16x128xf32>
    %126 = arith.mulf %9, %24 : vector<16x128xf32>
    %127 = arith.addf %125, %126 : vector<16x128xf32>
    %128 = arith.mulf %10, %12 : vector<16x128xf32>
    %129 = arith.addf %127, %128 : vector<16x128xf32>
    %130 = arith.mulf %21, %18 : vector<16x128xf32>
    %131 = arith.mulf %4, %17 : vector<16x128xf32>
    %132 = arith.addf %130, %131 : vector<16x128xf32>
    %133 = arith.mulf %5, %16 : vector<16x128xf32>
    %134 = arith.subf %132, %133 : vector<16x128xf32>
    %135 = arith.mulf %6, %15 : vector<16x128xf32>
    %136 = arith.addf %134, %135 : vector<16x128xf32>
    %137 = arith.mulf %7, %14 : vector<16x128xf32>
    %138 = arith.addf %136, %137 : vector<16x128xf32>
    %139 = arith.mulf %8, %13 : vector<16x128xf32>
    %140 = arith.subf %138, %139 : vector<16x128xf32>
    %141 = arith.mulf %9, %12 : vector<16x128xf32>
    %142 = arith.addf %140, %141 : vector<16x128xf32>
    %143 = arith.mulf %10, %24 : vector<16x128xf32>
    %144 = arith.addf %142, %143 : vector<16x128xf32>
    %145 = tpu.concatenate %39, %54, %69, %84, %99, %114, %129, %144 in 1 : vector<16x128xf32>, vector<16x128xf32>, vector<16x128xf32>, vector<16x128xf32>, vector<16x128xf32>, vector<16x128xf32>, vector<16x128xf32>, vector<16x128xf32> -> vector<16x1024xf32>
    %c0_7 = arith.constant 0 : index
    %c0_8 = arith.constant 0 : index
    %146 = vector.load %arg6[%c0_7, %c0_8] : memref<16x16xf32, #tpu.memory_space<vmem>>, vector<16x16xf32>
    %cst_9 = arith.constant dense<0.000000e+00> : vector<16x1024xf32>
    %147 = tpu.matmul %146, %145, %cst_9 {dimension_numbers = #tpu.dot_dimension_numbers<[1], [0], [0], [1], [0, 0, 1, 1], [], []>, precision = #tpu.contract_precision<fp32>} : vector<16x16xf32>, vector<16x1024xf32>, vector<16x1024xf32> -> vector<16x1024xf32>
    %148 = vector.extract_strided_slice %147 {offsets = [0, 0], sizes = [16, 128], strides = [1, 1]} : vector<16x1024xf32> to vector<16x128xf32>
    %149 = vector.extract_strided_slice %147 {offsets = [0, 128], sizes = [16, 128], strides = [1, 1]} : vector<16x1024xf32> to vector<16x128xf32>
    %150 = vector.extract_strided_slice %147 {offsets = [0, 256], sizes = [16, 128], strides = [1, 1]} : vector<16x1024xf32> to vector<16x128xf32>
    %151 = vector.extract_strided_slice %147 {offsets = [0, 384], sizes = [16, 128], strides = [1, 1]} : vector<16x1024xf32> to vector<16x128xf32>
    %152 = vector.extract_strided_slice %147 {offsets = [0, 512], sizes = [16, 128], strides = [1, 1]} : vector<16x1024xf32> to vector<16x128xf32>
    %153 = vector.extract_strided_slice %147 {offsets = [0, 640], sizes = [16, 128], strides = [1, 1]} : vector<16x1024xf32> to vector<16x128xf32>
    %154 = vector.extract_strided_slice %147 {offsets = [0, 768], sizes = [16, 128], strides = [1, 1]} : vector<16x1024xf32> to vector<16x128xf32>
    %155 = vector.extract_strided_slice %147 {offsets = [0, 896], sizes = [16, 128], strides = [1, 1]} : vector<16x1024xf32> to vector<16x128xf32>
    %c0_10 = arith.constant 0 : index
    %c0_11 = arith.constant 0 : index
    %156 = vector.load %arg7[%c0_10, %c0_11] : memref<16x1xf32, #tpu.memory_space<vmem>>, vector<16x1xf32>
    %157 = vector.broadcast %156 : vector<16x1xf32> to vector<16x128xf32>
    %158 = arith.addf %148, %157 : vector<16x128xf32>
    %159 = arith.mulf %158, %158 : vector<16x128xf32>
    %160 = arith.mulf %149, %149 : vector<16x128xf32>
    %161 = arith.addf %159, %160 : vector<16x128xf32>
    %162 = arith.mulf %150, %150 : vector<16x128xf32>
    %163 = arith.addf %161, %162 : vector<16x128xf32>
    %164 = arith.mulf %151, %151 : vector<16x128xf32>
    %165 = arith.addf %163, %164 : vector<16x128xf32>
    %166 = arith.mulf %152, %152 : vector<16x128xf32>
    %167 = arith.addf %165, %166 : vector<16x128xf32>
    %168 = arith.mulf %153, %153 : vector<16x128xf32>
    %169 = arith.addf %167, %168 : vector<16x128xf32>
    %170 = arith.mulf %154, %154 : vector<16x128xf32>
    %171 = arith.addf %169, %170 : vector<16x128xf32>
    %172 = arith.mulf %155, %155 : vector<16x128xf32>
    %173 = arith.addf %171, %172 : vector<16x128xf32>
    %174 = math.sqrt %173 : vector<16x128xf32>
    %cst_12 = arith.constant dense<0.000000e+00> : vector<128xf32>
    %175 = vector.multi_reduction <add>, %174, %cst_12 [0] : vector<16x128xf32> to vector<128xf32>
    %176 = vector.shape_cast %175 : vector<128xf32> to vector<1x128xf32>
    %cst_13 = arith.constant 1.600000e+01 : f32
    %177 = vector.broadcast %cst_13 : f32 to vector<1x128xf32>
    %178 = arith.divf %176, %177 : vector<1x128xf32>
    %cst_14 = arith.constant 9.99999997E-7 : f32
    %179 = vector.broadcast %cst_14 : f32 to vector<1x128xf32>
    %180 = arith.addf %178, %179 : vector<1x128xf32>
    %181 = tpu.reciprocal %180 {approx = true} : vector<1x128xf32> -> vector<1x128xf32>
    %182 = arith.mulf %180, %181 : vector<1x128xf32>
    %cst_15 = arith.constant 2.000000e+00 : f32
    %183 = vector.broadcast %cst_15 : f32 to vector<1x128xf32>
    %184 = arith.subf %183, %182 : vector<1x128xf32>
    %185 = arith.mulf %181, %184 : vector<1x128xf32>
    %c0_16 = arith.constant 0 : index
    %c0_17 = arith.constant 0 : index
    %186 = vector.load %arg8[%c0_16, %c0_17] : memref<16x1xf32, #tpu.memory_space<vmem>>, vector<16x1xf32>
    %187 = vector.broadcast %186 : vector<16x1xf32> to vector<16x128xf32>
    %188 = vector.broadcast %185 : vector<1x128xf32> to vector<16x128xf32>
    %189 = arith.mulf %187, %188 : vector<16x128xf32>
    %190 = arith.mulf %158, %189 : vector<16x128xf32>
    %c0_18 = arith.constant 0 : index
    %c0_19 = arith.constant 0 : index
    %191 = vector.load %arg2[%c0_18, %c0_19] : memref<16x1024xf32, #tpu.memory_space<vmem>>, vector<16x128xf32>
    %192 = arith.addf %190, %191 : vector<16x128xf32>
    %193 = arith.mulf %149, %189 : vector<16x128xf32>
    %c0_20 = arith.constant 0 : index
    %c128 = arith.constant 128 : index
    %194 = vector.load %arg2[%c0_20, %c128] : memref<16x1024xf32, #tpu.memory_space<vmem>>, vector<16x128xf32>
    %195 = arith.addf %193, %194 : vector<16x128xf32>
    %196 = arith.mulf %150, %189 : vector<16x128xf32>
    %c0_21 = arith.constant 0 : index
    %c256 = arith.constant 256 : index
    %197 = vector.load %arg2[%c0_21, %c256] : memref<16x1024xf32, #tpu.memory_space<vmem>>, vector<16x128xf32>
    %198 = arith.addf %196, %197 : vector<16x128xf32>
    %199 = arith.mulf %151, %189 : vector<16x128xf32>
    %c0_22 = arith.constant 0 : index
    %c384 = arith.constant 384 : index
    %200 = vector.load %arg2[%c0_22, %c384] : memref<16x1024xf32, #tpu.memory_space<vmem>>, vector<16x128xf32>
    %201 = arith.addf %199, %200 : vector<16x128xf32>
    %202 = arith.mulf %152, %189 : vector<16x128xf32>
    %c0_23 = arith.constant 0 : index
    %c512 = arith.constant 512 : index
    %203 = vector.load %arg2[%c0_23, %c512] : memref<16x1024xf32, #tpu.memory_space<vmem>>, vector<16x128xf32>
    %204 = arith.addf %202, %203 : vector<16x128xf32>
    %205 = arith.mulf %153, %189 : vector<16x128xf32>
    %c0_24 = arith.constant 0 : index
    %c640 = arith.constant 640 : index
    %206 = vector.load %arg2[%c0_24, %c640] : memref<16x1024xf32, #tpu.memory_space<vmem>>, vector<16x128xf32>
    %207 = arith.addf %205, %206 : vector<16x128xf32>
    %208 = arith.mulf %154, %189 : vector<16x128xf32>
    %c0_25 = arith.constant 0 : index
    %c768 = arith.constant 768 : index
    %209 = vector.load %arg2[%c0_25, %c768] : memref<16x1024xf32, #tpu.memory_space<vmem>>, vector<16x128xf32>
    %210 = arith.addf %208, %209 : vector<16x128xf32>
    %211 = arith.mulf %155, %189 : vector<16x128xf32>
    %c0_26 = arith.constant 0 : index
    %c896 = arith.constant 896 : index
    %212 = vector.load %arg2[%c0_26, %c896] : memref<16x1024xf32, #tpu.memory_space<vmem>>, vector<16x128xf32>
    %213 = arith.addf %211, %212 : vector<16x128xf32>
    %cst_27 = arith.constant 4.471500e-02 : f32
    %214 = vector.broadcast %cst_27 : f32 to vector<16x128xf32>
    %215 = arith.mulf %214, %192 : vector<16x128xf32>
    %216 = arith.mulf %215, %192 : vector<16x128xf32>
    %217 = arith.mulf %216, %192 : vector<16x128xf32>
    %218 = arith.addf %192, %217 : vector<16x128xf32>
    %cst_28 = arith.constant 2.000000e+00 : f32
    %219 = vector.broadcast %cst_28 : f32 to vector<16x128xf32>
    %220 = arith.mulf %219, %218 : vector<16x128xf32>
    %cst_29 = arith.constant 0.797884583 : f32
    %221 = vector.broadcast %cst_29 : f32 to vector<16x128xf32>
    %222 = arith.mulf %221, %220 : vector<16x128xf32>
    %cst_30 = arith.constant 0.000000e+00 : f32
    %223 = vector.broadcast %cst_30 : f32 to vector<16x128xf32>
    %224 = arith.subf %223, %222 : vector<16x128xf32>
    %225 = math.exp %224 : vector<16x128xf32>
    %cst_31 = arith.constant 1.000000e+00 : f32
    %226 = vector.broadcast %cst_31 : f32 to vector<16x128xf32>
    %227 = arith.addf %226, %225 : vector<16x128xf32>
    %228 = tpu.reciprocal %227 {approx = true} : vector<16x128xf32> -> vector<16x128xf32>
    %229 = arith.mulf %227, %228 : vector<16x128xf32>
    %cst_32 = arith.constant 2.000000e+00 : f32
    %230 = vector.broadcast %cst_32 : f32 to vector<16x128xf32>
    %231 = arith.subf %230, %229 : vector<16x128xf32>
    %232 = arith.mulf %228, %231 : vector<16x128xf32>
    %233 = arith.mulf %192, %232 : vector<16x128xf32>
    %234 = arith.mulf %195, %232 : vector<16x128xf32>
    %235 = arith.mulf %198, %232 : vector<16x128xf32>
    %236 = arith.mulf %201, %232 : vector<16x128xf32>
    %237 = arith.mulf %204, %232 : vector<16x128xf32>
    %238 = arith.mulf %207, %232 : vector<16x128xf32>
    %239 = arith.mulf %210, %232 : vector<16x128xf32>
    %240 = arith.mulf %213, %232 : vector<16x128xf32>
    %c0_33 = arith.constant 0 : index
    %c0_34 = arith.constant 0 : index
    %241 = vector.load %arg9[%c0_33, %c0_34] : memref<16x16xf32, #tpu.memory_space<vmem>>, vector<16x16xf32>
    %242 = tpu.concatenate %234, %235, %236, %237, %238, %239, %240 in 1 : vector<16x128xf32>, vector<16x128xf32>, vector<16x128xf32>, vector<16x128xf32>, vector<16x128xf32>, vector<16x128xf32>, vector<16x128xf32> -> vector<16x896xf32>
    %cst_35 = arith.constant dense<0.000000e+00> : vector<16x896xf32>
    %243 = tpu.matmul %241, %242, %cst_35 {dimension_numbers = #tpu.dot_dimension_numbers<[1], [0], [0], [1], [0, 0, 1, 1], [], []>, precision = #tpu.contract_precision<fp32>} : vector<16x16xf32>, vector<16x896xf32>, vector<16x896xf32> -> vector<16x896xf32>
    %c0_36 = arith.constant 0 : index
    %c0_37 = arith.constant 0 : index
    %244 = vector.load %arg1[%c0_36, %c0_37] : memref<8x128xf32, #tpu.memory_space<vmem>>, vector<8x128xf32>
    %245 = tpu.concatenate %233, %244 in 0 : vector<16x128xf32>, vector<8x128xf32> -> vector<24x128xf32>
    %c0_38 = arith.constant 0 : index
    %c0_39 = arith.constant 0 : index
    %246 = vector.load %arg10[%c0_38, %c0_39] : memref<16x24xf32, #tpu.memory_space<vmem>>, vector<16x24xf32>
    %cst_40 = arith.constant dense<0.000000e+00> : vector<16x128xf32>
    %247 = tpu.matmul %246, %245, %cst_40 {dimension_numbers = #tpu.dot_dimension_numbers<[1], [0], [0], [1], [0, 0, 1, 1], [], []>, precision = #tpu.contract_precision<fp32>} : vector<16x24xf32>, vector<24x128xf32>, vector<16x128xf32> -> vector<16x128xf32>
    %c0_41 = arith.constant 0 : index
    %c0_42 = arith.constant 0 : index
    %248 = vector.load %arg11[%c0_41, %c0_42] : memref<16x1xf32, #tpu.memory_space<vmem>>, vector<16x1xf32>
    %249 = vector.broadcast %248 : vector<16x1xf32> to vector<16x128xf32>
    %250 = arith.addf %247, %249 : vector<16x128xf32>
    %c0_43 = arith.constant 0 : index
    %c0_44 = arith.constant 0 : index
    %251 = vector.load %arg12[%c0_43, %c0_44] : memref<16x1024xf32, #tpu.memory_space<vmem>>, vector<16x128xf32>
    tpu.vector_store %arg12[%c0_43, %c0_44], %250 {strides = array<i32>} : memref<16x1024xf32, #tpu.memory_space<vmem>>, vector<16x128xf32>,
    %c0_45 = arith.constant 0 : index
    %c128_46 = arith.constant 128 : index
    %252 = vector.load %arg12[%c0_45, %c128_46] : memref<16x1024xf32, #tpu.memory_space<vmem>>, vector<16x896xf32>
    tpu.vector_store %arg12[%c0_45, %c128_46], %243 {strides = array<i32>} : memref<16x1024xf32, #tpu.memory_space<vmem>>, vector<16x896xf32>,
    return
  }
  func.func @transform_0(%arg0: i32) -> (i32, i32) {
    %c0_i32 = arith.constant 0 : i32
    %c0_i32_0 = arith.constant 0 : i32
    return %c0_i32, %arg0 : i32, i32
  }
  func.func @transform_1(%arg0: i32) -> (i32, i32) {
    %c0_i32 = arith.constant 0 : i32
    %c0_i32_0 = arith.constant 0 : i32
    return %c0_i32, %arg0 : i32, i32
  }
  func.func @transform_2(%arg0: i32) -> (i32, i32) {
    %c0_i32 = arith.constant 0 : i32
    %c0_i32_0 = arith.constant 0 : i32
    %c0_i32_1 = arith.constant 0 : i32
    return %c0_i32, %c0_i32_0 : i32, i32
  }
  func.func @transform_3(%arg0: i32) -> (i32, i32) {
    %c0_i32 = arith.constant 0 : i32
    %c0_i32_0 = arith.constant 0 : i32
    %c0_i32_1 = arith.constant 0 : i32
    return %c0_i32, %c0_i32_0 : i32, i32
  }
  func.func @transform_4(%arg0: i32) -> (i32, i32) {
    %c0_i32 = arith.constant 0 : i32
    %c0_i32_0 = arith.constant 0 : i32
    %c0_i32_1 = arith.constant 0 : i32
    return %c0_i32, %c0_i32_0 : i32, i32
  }
  func.func @transform_5(%arg0: i32) -> (i32, i32) {
    %c0_i32 = arith.constant 0 : i32
    %c0_i32_0 = arith.constant 0 : i32
    %c0_i32_1 = arith.constant 0 : i32
    return %c0_i32, %c0_i32_0 : i32, i32
  }
  func.func @transform_6(%arg0: i32) -> (i32, i32) {
    %c0_i32 = arith.constant 0 : i32
    %c0_i32_0 = arith.constant 0 : i32
    %c0_i32_1 = arith.constant 0 : i32
    return %c0_i32, %c0_i32_0 : i32, i32
  }
  func.func @transform_7(%arg0: i32) -> (i32, i32) {
    %c0_i32 = arith.constant 0 : i32
    %c0_i32_0 = arith.constant 0 : i32
    %c0_i32_1 = arith.constant 0 : i32
    return %c0_i32, %c0_i32_0 : i32, i32
  }
  func.func @transform_8(%arg0: i32) -> (i32, i32) {
    %c0_i32 = arith.constant 0 : i32
    %c0_i32_0 = arith.constant 0 : i32
    %c0_i32_1 = arith.constant 0 : i32
    return %c0_i32, %c0_i32_0 : i32, i32
  }
  func.func @transform_9(%arg0: i32) -> (i32, i32) {
    %c0_i32 = arith.constant 0 : i32
    %c0_i32_0 = arith.constant 0 : i32
    %c0_i32_1 = arith.constant 0 : i32
    return %c0_i32, %c0_i32_0 : i32, i32
  }
  func.func @transform_10(%arg0: i32) -> (i32, i32) {
    %c0_i32 = arith.constant 0 : i32
    %c0_i32_0 = arith.constant 0 : i32
    %c0_i32_1 = arith.constant 0 : i32
    return %c0_i32, %c0_i32_0 : i32, i32
  }
  func.func @transform_11(%arg0: i32) -> (i32, i32) {
    %c0_i32 = arith.constant 0 : i32
    %c0_i32_0 = arith.constant 0 : i32
    return %c0_i32, %arg0 : i32, i32
  }
}

</mosaic_0001>

<bundles_post_ra>
// kernel: cvp_geometric_product_layer.1
= control target key start
LH: loop header
LB: loop body
LE: loop exit
PB: predicated region body
PF: predicated region fallthrough
CT: control target
= control target key end

     0   :  { %s8753_s17 = smov 0   ;;  %s8755_s18 = smov 0   ;;  %s11045_s0 = inlined_call_operand.vmem [shape: f32[8,512], index: 0, kind: input, shape index: {}]   ;;  %s11046_s1 = inlined_call_operand.vmem [shape: f32[16,4096], index: 1, kind: input, shape index: {}]   ;;  %s11047_s2 = inlined_call_operand.vmem [shape: f32[32,16], index: 2, kind: input, shape index: {}]   ;;  %s11048_s3 = inlined_call_operand.vmem [shape: f32[16,1], index: 3, kind: input, shape index: {}]   ;;  %s11049_s4 = inlined_call_operand.vmem [shape: f32[16,1], index: 4, kind: input, shape index: {}]   ;;  %s11050_s5 = inlined_call_operand.vmem [shape: f32[16,16], index: 5, kind: input, shape index: {}]   ;;  %s11051_s6 = inlined_call_operand.vmem [shape: f32[16,1], index: 6, kind: input, shape index: {}]   ;;  %s11052_s7 = inlined_call_operand.vmem [shape: f32[16,1], index: 7, kind: input, shape index: {}]   ;;  %s11053_s8 = inlined_call_operand.vmem [shape: f32[16,16], index: 8, kind: input, shape index: {}]   ;;  %s11054_s9 = inlined_call_operand.vmem [shape: f32[16,24], index: 9, kind: input, shape index: {}]   ;;  %s11055_s10 = inlined_call_operand.vmem [shape: f32[16,1], index: 10, kind: input, shape index: {}]   ;;  %s11056_s11 = inlined_call_operand.vmem [shape: f32[16,4096], index: 11, kind: output, shape index: {}]  }
   0x1   :  { %s8757_s19 = smov 0  }
   0x2 LB: > { %s8769_s20 = sadd.s32 4294967295, %s8689_s19   ;;  %s8772_s21 = sadd.s32 1, %s8689_s19   ;;  %s8689_s19 = sphi %s8757_s19, %s11319_s19   ;;  %s8685_s18 = sphi %s8755_s18, %s11318_s18   ;;  %s8681_s17 = sphi %s8753_s17, %s11317_s17  }
   0x3   : > { %s51_s22 = ssub.s32 %s8689_s19, %s8772_s21  ;;  %s54_s23 = sadd.s32 1, %s8685_s18 }
   0x4   : > { %p52_p0 = scmp.eq.s32.totalorder %s51_s22, 0  ;;  %p61_p1 = scmp.ne.s32.totalorder %s8685_s18, %s8681_s17 }
   0x5   : > { %p62_p2 = scmp.eq.s32.totalorder %s8689_s19, 0  ;;  %p280_p3 = scmp.eq.s32.totalorder %s8769_s20, 3 }
   0x6   : > { %s8782_s24 = scalar_select %p52_p0, %s8685_s18, %s54_s23  }
   0x7   : > { %p63_p4 = por %p62_p2, %p61_p1  ;;  %p8784_p5 = por %p280_p3, %p61_p1 }
   0x8   : > { %p8458_p6 = scmp.ge.s32.totalorder %s8689_s19, 4 }
   0xa   : > { %329 = sbr.rel (%p8458_p6) target bundleno = 27 (0x1b), region = 52 }
   0xf   : > { %339 = sbr.rel (!%p63_p4) target bundleno = 27 (0x1b), region = 60  ;;  %s341_s26 = sand.u32 (%p63_p4), 1, %s8685_s18  }
  0x10   : > { %s8471_s27 = sshll.u32 (%p63_p4), %s8689_s19, 6  ;;  %s8459_s28 = sshll.u32 (%p63_p4), %s341_s26, 7 }
  0x11   : > { %s8794_s12 = scalar_lea.vmem (%p63_p4), %s11046_s1, %s8471_s27  ;;  %s343_s13 = scalar_lea.vmem (%p63_p4), [#allocation2], %s8459_s28 }
  0x12   : > { %v359_v0 = vld [vmem:[%s8794_s12] sm:$0xff] (%p63_p4)  ;;  %v361_v1 = vld [vmem:[%s8794_s12 + $0x8] sm:$0xff] (%p63_p4)  ;;  %v363_v2 = vld [vmem:[%s8794_s12 + $0x10] sm:$0xff] (%p63_p4) }
  0x13   : > { %360 = vst [vmem:[%s343_s13] sm:$0xff] (%p63_p4), %v359_v0  ;;  %362 = vst [vmem:[%s343_s13 + $0x8] sm:$0xff] (%p63_p4), %v361_v1  ;;  %v365_v3 = vld [vmem:[%s8794_s12 + $0x18] sm:$0xff] (%p63_p4)  ;;  %v367_v4 = vld [vmem:[%s8794_s12 + $0x20] sm:$0xff] (%p63_p4) }
  0x14   : > { %364 = vst [vmem:[%s343_s13 + $0x10] sm:$0xff] %v363_v2  ;;  %v369_v5 = vld [vmem:[%s8794_s12 + $0x28] sm:$0xff]  ;;  %366 = vst [vmem:[%s343_s13 + $0x18] sm:$0xff] %v365_v3  ;;  %v371_v6 = vld [vmem:[%s8794_s12 + $0x30] sm:$0xff] }
  0x15   : > { %368 = vst [vmem:[%s343_s13 + $0x20] sm:$0xff] %v367_v4  ;;  %370 = vst [vmem:[%s343_s13 + $0x28] sm:$0xff] %v369_v5  ;;  %v373_v7 = vld [vmem:[%s8794_s12 + $0x38] sm:$0xff]  ;;  %v375_v8 = vld [vmem:[%s8794_s12 + $0x100] sm:$0xff] }
  0x16   : > { %372 = vst [vmem:[%s343_s13 + $0x30] sm:$0xff] %v371_v6  ;;  %374 = vst [vmem:[%s343_s13 + $0x38] sm:$0xff] %v373_v7  ;;  %v377_v9 = vld [vmem:[%s8794_s12 + $0x108] sm:$0xff]  ;;  %v379_v10 = vld [vmem:[%s8794_s12 + $0x110] sm:$0xff] }
  0x17   : > { %376 = vst [vmem:[%s343_s13 + $0x40] sm:$0xff] %v375_v8  ;;  %v381_v11 = vld [vmem:[%s8794_s12 + $0x118] sm:$0xff]  ;;  %378 = vst [vmem:[%s343_s13 + $0x48] sm:$0xff] %v377_v9  ;;  %v383_v12 = vld [vmem:[%s8794_s12 + $0x120] sm:$0xff] }
  0x18   : > { %380 = vst [vmem:[%s343_s13 + $0x50] sm:$0xff] %v379_v10  ;;  %382 = vst [vmem:[%s343_s13 + $0x58] sm:$0xff] %v381_v11  ;;  %v385_v13 = vld [vmem:[%s8794_s12 + $0x128] sm:$0xff]  ;;  %v387_v14 = vld [vmem:[%s8794_s12 + $0x130] sm:$0xff] }
  0x19   : > { %384 = vst [vmem:[%s343_s13 + $0x60] sm:$0xff] %v383_v12  ;;  %386 = vst [vmem:[%s343_s13 + $0x68] sm:$0xff] %v385_v13  ;;  %v389_v15 = vld [vmem:[%s8794_s12 + $0x138] sm:$0xff] }
  0x1a   : > { %388 = vst [vmem:[%s343_s13 + $0x70] sm:$0xff] %v387_v14  ;;  %390 = vst [vmem:[%s343_s13 + $0x78] sm:$0xff] %v389_v15 }
  0x1b PF: > { %p8462_p7 = scmp.ge.s32.totalorder %s8689_s19, 1  ;;  %p395_p8 = scmp.lt.s32.totalorder %s8689_s19, 5 }
  0x1d   : > { %p396_p9 = pnand %p8462_p7, %p395_p8 }
  0x1f   : > { %399 = sbr.rel (%p396_p9) target bundleno = 1228 (0x4cc), region = 83 }
  0x24   : > { %s402_s14 = sand.u32 1, %s8681_s17   ;;  %v450_v16 = vld [vmem:[%s11047_s2] sm:$0xff]  ;;  %vm470_vm0 = vcmask 130048   ;;  %v451_v17 = vld [vmem:[%s11047_s2 + $0x8] sm:$0xff]  ;;  %v452_v18 = vld [vmem:[%s11047_s2 + $0x10] sm:$0xff]  ;;  %v11057_v19 = vmov 0.0  }
  0x25   : > { %s8824_s28 = sshll.u32 %s402_s14, 7  ;;  %551 = vmatprep.mubr.f32.mxu0 %v11057_v19  ;;  %v472_v20 = vsel %vm470_vm0, %v450_v16, 0  ;;  %v475_v21 = vsel %vm470_vm0, %v451_v17, 0  ;;  %680 = vmatprep.mubr.f32.mxu1 %v11057_v19  ;;  %v478_v22 = vsel %vm470_vm0, %v452_v18, 0  ;;  %v453_v23 = vld [vmem:[%s11047_s2 + $0x18] sm:$0xff]  ;;  %v8692_v28 = vmov 0  }
  0x26   : > { %v8834_v24 = vand.u32 4294901760, %v472_v20  ;;  %v8836_v25 = vand.u32 4294901760, %v475_v21  ;;  %v8838_v26 = vand.u32 4294901760, %v478_v22  ;;  %v481_v27 = vsel %vm470_vm0, %v453_v23, 0  ;;  %8650 = vset.pattern.permute.xlu1 %v8692_v28  ;;  %v3035_v29 = vld [vmem:[%s11048_s3] sm:$0xff]  ;;  %8649 = vset.pattern.permute.xlu0 %v8692_v28  ;;  %s8845_s12 = scalar_lea.vmem [#allocation2], %s8824_s28 }
  0x27   : > { %v463_v30 = vld [vmem:[%s8845_s12 + $0x48] sm:$0xff]  ;;  %v462_v31 = vld [vmem:[%s8845_s12 + $0x40] sm:$0xff]  ;;  %v8850_v33 = vand.u32 4294901760, %v481_v27  ;;  %3039 = vperm.xlu1 %8650, %v3035_v29   ;;  %v465_v7 = vld [vmem:[%s8845_s12 + $0x58] sm:$0xff]  ;;  %p444_p10 = scmp.lt.s32.totalorder %s8769_s20, 3  ;;  %vm7792_vm5 = vcmask 195584  }
  0x28   : > { %v455_v32 = vld [vmem:[%s8845_s12 + $0x8] sm:$0xff]  ;;  %v8852_v34 = vand.u32 4294901760, %v463_v30  ;;  %v8854_v35 = vand.u32 4294901760, %v462_v31  ;;  %v454_v37 = vld [vmem:[%s8845_s12] sm:$0xff]  ;;  %v8860_v38 = vsub.f32 %v472_v20, %v8834_v24  ;;  %v8865_v40 = vsub.f32 %v475_v21, %v8836_v25  ;;  %v464_v14 = vld [vmem:[%s8845_s12 + $0x50] sm:$0xff]  ;;  %s10995_s29 = scalar_lea.vmem [#allocation3], %s8824_s28 }
  0x29   : > { %v8856_v36 = vand.u32 4294901760, %v455_v32  ;;  %v8862_v39 = vand.u32 4294901760, %v454_v37  ;;  %v8868_v41 = vsub.f32 %v478_v22, %v8838_v26  ;;  %v8892_v49 = vsub.f32 %v481_v27, %v8850_v33  ;;  %v3036_v50 = vld [vmem:[%s11048_s3 + $0x8] sm:$0xff]  ;;  %v3049_v51 = vld [vmem:[%s11049_s4] sm:$0xff]  ;;  %v457_v15 = vld [vmem:[%s8845_s12 + $0x18] sm:$0xff]  ;;  %s8472_s28 = sshll.u32 (%p8784_p5), %s8769_s20, 6 }
  0x2a   : > { %512 = vmatprep.subr.mxu0 %v8852_v34  ;;  %v8872_v42 = vand.u32 4294901760, %v8860_v38  ;;  %v625_v43 = vsub.f32 %v463_v30, %v8852_v34  ;;  %v8876_v44 = vsub.f32 %v462_v31, %v8854_v35  ;;  %v8883_v46 = vand.u32 4294901760, %v8865_v40  ;;  %3044 = vperm.xlu0 %8649, %v3036_v50   ;;  %v3050_v58 = vld [vmem:[%s11049_s4 + $0x8] sm:$0xff]  ;;  %v456_v16 = vld [vmem:[%s8845_s12 + $0x10] sm:$0xff]  ;;  %v466_v50 = vld [vmem:[%s8845_s12 + $0x60] sm:$0xff]  ;;  %s8339_s14 = scalar_lea.vmem (%p8784_p5), %s11056_s11, %s8472_s28 }
  0x2b   : > { %v8879_v45 = vsub.f32 %v455_v32, %v8856_v36  ;;  %514 = vmatpush1.msra.mxu0 %v8854_v35  ;;  %v8886_v47 = vsub.f32 %v454_v37, %v8862_v39  ;;  %v8889_v48 = vand.u32 4294901760, %v8868_v41  ;;  %3053 = vperm.xlu1 %8650, %v3049_v51   ;;  %v8920_v1 = vand.u32 4294901760, %v8892_v49  ;;  %v459_v51 = vld [vmem:[%s8845_s12 + $0x28] sm:$0xff] }
  0x2c   : > { %516 = vmatprep.subr.mxu0 %v8856_v36  ;;  %v555_v52 = vsub.f32 %v8860_v38, %v8872_v42  ;;  %v626_v53 = vand.u32 4294901760, %v625_v43  ;;  %v632_v54 = vand.u32 4294901760, %v8876_v44  ;;  %v566_v56 = vsub.f32 %v8865_v40, %v8883_v46 }
  0x2d   : > { %v638_v55 = vand.u32 4294901760, %v8879_v45  ;;  %518 = vmatpush1.msra.mxu0 %v8862_v39  ;;  %v644_v57 = vand.u32 4294901760, %v8886_v47  ;;  %v577_v0 = vsub.f32 %v8868_v41, %v8889_v48  ;;  %v588_v9 = vsub.f32 %v8892_v49, %v8920_v1 }
  0x2e   : > { %v8912_v59 = vand.u32 4294901760, %v555_v52  ;;  %v627_v60 = vsub.f32 %v625_v43, %v626_v53  ;;  %v633_v61 = vsub.f32 %v8876_v44, %v632_v54  ;;  %739 = vmatprep.subr.mxu0 %v625_v43  ;;  %v8923_v4 = vand.u32 4294901760, %v566_v56  ;;  %3058 = vperm.xlu0 %8649, %v3050_v58   ;;  %v467_v43 = vld [vmem:[%s8845_s12 + $0x68] sm:$0xff]  ;;  %v458_v52 = vld [vmem:[%s8845_s12 + $0x20] sm:$0xff] }
  0x2f   : > { %v639_v62 = vsub.f32 %v8879_v45, %v638_v55  ;;  %v645_v63 = vsub.f32 %v8886_v47, %v644_v57  ;;  %v8931_v8 = vand.u32 4294901760, %v577_v0  ;;  %v8938_v10 = vand.u32 4294901760, %v465_v7 }
  0x30   : > { %557 = vmatmul.mubr.f32.vlgmr.msra.gmra.mxu0 %v8912_v59  ;;  %v628_v2 = vand.u32 4294901760, %v627_v60  ;;  %v634_v3 = vand.u32 4294901760, %v633_v61  ;;  %v8943_v11 = vand.u32 4294901760, %v588_v9  ;;  %v8969_v18 = vand.u32 4294901760, %v464_v14 }
  0x31   : > { %v640_v5 = vand.u32 4294901760, %v639_v62  ;;  %562 = vmatprep.mubr.f32.mxu0 %v11057_v19  ;;  %v646_v6 = vand.u32 4294901760, %v645_v63  ;;  %742 = vmatpush1.msra.mxu0 %v8876_v44  ;;  %v8950_v12 = vsub.f32 %v465_v7, %v8938_v10  ;;  %v8973_v20 = vand.u32 4294901760, %v457_v15 }
  0x32   : > { %629 = vmatprep.subr.mxu1 %v628_v2  ;;  %745 = vmatprep.subr.mxu0 %v8879_v45  ;;  %v8976_v21 = vand.u32 4294901760, %v456_v16  ;;  %v8982_v23 = vsub.f32 %v464_v14, %v8969_v18  ;;  %v9046_v44 = vand.u32 4294901760, %v467_v43  ;;  %v9088_v56 = vand.u32 4294901760, %v458_v52 }
  0x33   : > { %635 = vmatpush1.msra.mxu1 %v634_v3  ;;  %748 = vmatpush1.msra.mxu0 %v8886_v47  ;;  %v1264_v13 = vand.u32 4294901760, %v8950_v12  ;;  %v8987_v27 = vsub.f32 %v457_v15, %v8973_v20  ;;  %v468_v15 = vld [vmem:[%s8845_s12 + $0x70] sm:$0xff] }
  0x34   : > { %568 = vmatmul.mubr.f32.gmra.mxu0 %v8923_v4  ;;  %641 = vmatprep.subr.mxu1 %v640_v5  ;;  %v8992_v28 = vsub.f32 %v456_v16, %v8976_v21  ;;  %v1270_v29 = vand.u32 4294901760, %v8982_v23  ;;  %v9057_v45 = vsub.f32 %v467_v43, %v9046_v44  ;;  %v9104_v61 = vsub.f32 %v458_v52, %v9088_v56  ;;  %v461_v16 = vld [vmem:[%s8845_s12 + $0x38] sm:$0xff]  ;;  %v7781_v43 = vld [vmem:[%s11055_s10 + $0x8] sm:$0xff] }
  0x35   : > { %647 = vmatpush1.msra.mxu1 %v646_v6  ;;  %573 = vmatprep.mubr.f32.mxu0 %v11057_v19  ;;  %v1265_v17 = vsub.f32 %v8950_v12, %v1264_v13  ;;  %v1276_v30 = vand.u32 4294901760, %v8987_v27 }
  0x36   : > { %682 = vmatmul.mubr.f32.vlgmr.msra.gmra.mxu1 %v8834_v24  ;;  %843 = vmatprep.subr.mxu1 %v8852_v34  ;;  %v1282_v31 = vand.u32 4294901760, %v8992_v28  ;;  %v1271_v32 = vsub.f32 %v8982_v23, %v1270_v29  ;;  %v1902_v47 = vand.u32 4294901760, %v9057_v45  ;;  %v1920_v0 = vand.u32 4294901760, %v9104_v61 }
  0x37   : > { %687 = vmatprep.mubr.f32.mxu1 %v11057_v19  ;;  %845 = vmatpush1.msra.mxu1 %v8854_v35  ;;  %v1266_v22 = vand.u32 4294901760, %v1265_v17  ;;  %v460_v17 = vld [vmem:[%s8845_s12 + $0x30] sm:$0xff] }
  0x38   : > { %579 = vmatmul.mubr.f32.gmra.mxu0 %v8931_v8  ;;  %847 = vmatprep.subr.mxu1 %v8856_v36  ;;  %v1921_v5 = vsub.f32 %v9104_v61, %v1920_v0 }
  0x39   : > { %584 = vmatprep.mubr.f32.mxu0 %v11057_v19  ;;  %849 = vmatpush1.msra.mxu1 %v8862_v39 }
  0x3a   : > { %689 = vmatmul.mubr.f32.gmra.mxu1 %v8836_v25  ;;  %950 = vmatprep.subr.mxu0 %v626_v53  ;;  %v1903_v53 = vsub.f32 %v9057_v45, %v1902_v47  ;;  %v1922_v9 = vand.u32 4294901760, %v1921_v5 }
  0x3b   : > { %694 = vmatprep.mubr.f32.mxu1 %v11057_v19  ;;  %1053 = vmatprep.subr.mxu1 %v8852_v34  ;;  %v1277_v34 = vsub.f32 %v8987_v27, %v1276_v30 }
  0x3c   : > { %590 = vmatmul.mubr.f32.gmra.mxu0 %v8943_v11 }
  0x3d   : > { %781 = vmatprep.mubr.f32.mxu0 %v11057_v19  ;;  %v1278_v37 = vand.u32 4294901760, %v1277_v34  ;;  %v5543_v34 = vld [vmem:[%s11052_s7] sm:$0xff] }
  0x3e   : > { %696 = vmatmul.mubr.f32.gmra.mxu1 %v8838_v26 }
  0x3f   : > { %701 = vmatprep.mubr.f32.mxu1 %v11057_v19 }
  0x40   : > { %784 = vmatmul.mubr.f32.vlgmr.msra.gmra.mxu0 %v8860_v38 }
  0x41   : > { %789 = vmatprep.mubr.f32.mxu0 %v11057_v19  ;;  %954 = vmatpush1.msra.mxu0 %v632_v54  ;;  %v9081_v54 = vand.u32 4294901760, %v466_v50 }
  0x42   : > { %703 = vmatmul.mubr.f32.gmra.mxu1 %v8850_v33  ;;  %958 = vmatprep.subr.mxu0 %v638_v55  ;;  %v9085_v55 = vand.u32 4294901760, %v459_v51 }
  0x43   : > { %882 = vmatprep.mubr.f32.mxu1 %v11057_v19  ;;  %962 = vmatpush1.msra.mxu0 %v644_v57  ;;  %v1904_v57 = vand.u32 4294901760, %v1903_v53  ;;  %v9094_v58 = vsub.f32 %v466_v50, %v9081_v54 }
  0x44   : > { %792 = vmatmul.mubr.f32.gmra.mxu0 %v8865_v40  ;;  %1150 = vmatprep.subr.mxu0 %v8938_v10  ;;  %v9099_v60 = vsub.f32 %v459_v51, %v9085_v55 }
  0x45   : > { %797 = vmatprep.mubr.f32.mxu0 %v11057_v19  ;;  %v1908_v62 = vand.u32 4294901760, %v9094_v58 }
  0x46   : > { %886 = vmatmul.mubr.f32.vlgmr.msra.gmra.mxu1 %v8872_v42  ;;  %v1914_v63 = vand.u32 4294901760, %v9099_v60 }
  0x47   : > { %891 = vmatprep.mubr.f32.mxu1 %v11057_v19  ;;  %1055 = vmatpush1.msra.mxu1 %v8854_v35  ;;  %v1283_v35 = vsub.f32 %v8992_v28, %v1282_v31  ;;  %v1909_v2 = vsub.f32 %v9094_v58, %v1908_v62 }
  0x48   : > { %800 = vmatmul.mubr.f32.gmra.mxu0 %v8868_v41  ;;  %1057 = vmatprep.subr.mxu1 %v8856_v36  ;;  %v1272_v36 = vand.u32 4294901760, %v1271_v32  ;;  %v1915_v3 = vsub.f32 %v9099_v60, %v1914_v63 }
  0x49   : > { %805 = vmatprep.mubr.f32.mxu0 %v11057_v19  ;;  %1059 = vmatpush1.msra.mxu1 %v8862_v39  ;;  %v1284_v39 = vand.u32 4294901760, %v1283_v35  ;;  %v1910_v6 = vand.u32 4294901760, %v1909_v2 }
  0x4a   : > { %895 = vmatmul.mubr.f32.gmra.mxu1 %v8883_v46  ;;  %1267 = vmatprep.subr.mxu1 %v1266_v22  ;;  %v1916_v7 = vand.u32 4294901760, %v1915_v3  ;;  %v9200_v22 = vand.u32 4294901760, %v461_v16 }
  0x4b   : > { %900 = vmatprep.mubr.f32.mxu1 %v11057_v19 }
  0x4c   : > { %808 = vmatmul.mubr.f32.gmra.mxu0 %v8892_v49 }
  0x4d   : > { %995 = vmatprep.mubr.f32.mxu0 %v11057_v19 }
  0x4e   : > { %904 = vmatmul.mubr.f32.gmra.mxu1 %v8889_v48 }
  0x4f   : > { %909 = vmatprep.mubr.f32.mxu1 %v11057_v19 }
  0x50   : > { %997 = vmatmul.mubr.f32.vlgmr.msra.gmra.mxu0 %v8834_v24 }
  0x51   : > { %1002 = vmatprep.mubr.f32.mxu0 %v11057_v19  ;;  %1152 = vmatpush1.msra.mxu0 %v8969_v18 }
  0x52   : > { %913 = vmatmul.mubr.f32.gmra.mxu1 %v8920_v1  ;;  %1154 = vmatprep.subr.mxu0 %v8973_v20 }
  0x53   : > { %1092 = vmatprep.mubr.f32.mxu1 %v11057_v19  ;;  %1156 = vmatpush1.msra.mxu0 %v8976_v21 }
  0x54   : > { %1004 = vmatmul.mubr.f32.gmra.mxu0 %v8836_v25  ;;  %1377 = vmatprep.subr.mxu0 %v8950_v12 }
  0x55   : > { %1009 = vmatprep.mubr.f32.mxu0 %v11057_v19 }
  0x56   : > { %1094 = vmatmul.mubr.f32.vlgmr.msra.gmra.mxu1 %v8834_v24 }
  0x57   : > { %1099 = vmatprep.mubr.f32.mxu1 %v11057_v19  ;;  %1273 = vmatpush1.msra.mxu1 %v1272_v36 }
  0x58   : > { %1011 = vmatmul.mubr.f32.gmra.mxu0 %v8838_v26  ;;  %1279 = vmatprep.subr.mxu1 %v1278_v37  ;;  %v7780_v37 = vld [vmem:[%s11055_s10] sm:$0xff] }
  0x59   : > { %1016 = vmatprep.mubr.f32.mxu0 %v11057_v19  ;;  %1285 = vmatpush1.msra.mxu1 %v1284_v39 }
  0x5a   : > { %1101 = vmatmul.mubr.f32.gmra.mxu1 %v8836_v25  ;;  %1481 = vmatprep.subr.mxu1 %v8938_v10 }
  0x5b   : > { %1106 = vmatprep.mubr.f32.mxu1 %v11057_v19 }
  0x5c   : > { %1018 = vmatmul.mubr.f32.gmra.mxu0 %v8850_v33 }
  0x5d   : > { %1189 = vmatprep.mubr.f32.mxu0 %v11057_v19 }
  0x5e   : > { %1108 = vmatmul.mubr.f32.gmra.mxu1 %v8838_v26 }
  0x5f   : > { %1113 = vmatprep.mubr.f32.mxu1 %v11057_v19 }
  0x60   : > { %1195 = vmatmul.mubr.f32.vlgmr.msra.gmra.mxu0 %v8912_v59 }
  0x61   : > { %1200 = vmatprep.mubr.f32.mxu0 %v11057_v19  ;;  %1380 = vmatpush1.msra.mxu0 %v8982_v23  ;;  %v5472_v23 = vld [vmem:[%s11051_s6 + $0x8] sm:$0xff] }
  0x62   : > { %1115 = vmatmul.mubr.f32.gmra.mxu1 %v8850_v33  ;;  %1383 = vmatprep.subr.mxu0 %v8987_v27  ;;  %v9206_v27 = vand.u32 4294901760, %v460_v17 }
  0x63   : > { %1318 = vmatprep.mubr.f32.mxu1 %v11057_v19  ;;  %1386 = vmatpush1.msra.mxu0 %v8992_v28 }
  0x64   : > { %1206 = vmatmul.mubr.f32.gmra.mxu0 %v8923_v4  ;;  %1588 = vmatprep.subr.mxu0 %v1264_v13  ;;  %v9225_v32 = vsub.f32 %v460_v17, %v9206_v27 }
  0x65   : > { %1211 = vmatprep.mubr.f32.mxu0 %v11057_v19  ;;  %5480 = vperm.xlu1 %8650, %v5472_v23  }
  0x66   : > { %1320 = vmatmul.mubr.f32.vlgmr.msra.gmra.mxu1 %v8834_v24  ;;  %v2558_v39 = vand.u32 4294901760, %v9225_v32 }
  0x67   : > { %1325 = vmatprep.mubr.f32.mxu1 %v11057_v19  ;;  %1483 = vmatpush1.msra.mxu1 %v8969_v18 }
  0x68   : > { %1217 = vmatmul.mubr.f32.gmra.mxu0 %v8931_v8  ;;  %1485 = vmatprep.subr.mxu1 %v8973_v20 }
  0x69   : > { %1222 = vmatprep.mubr.f32.mxu0 %v11057_v19  ;;  %1487 = vmatpush1.msra.mxu1 %v8976_v21 }
  0x6a   : > { %1327 = vmatmul.mubr.f32.gmra.mxu1 %v8836_v25  ;;  %1691 = vmatprep.subr.mxu1 %v8938_v10  ;;  %v469_v10 = vld [vmem:[%s8845_s12 + $0x78] sm:$0xff] }
  0x6b   : > { %1332 = vmatprep.mubr.f32.mxu1 %v11057_v19  ;;  %v9158_v12 = vand.u32 4294901760, %v469_v10  ;;  %5547 = vperm.xlu1 %8650, %v5543_v34  }
  0x6c   : > { %1228 = vmatmul.mubr.f32.gmra.mxu0 %v8943_v11 }
  0x6d   : > { %1419 = vmatprep.mubr.f32.mxu0 %v11057_v19  ;;  %v9169_v13 = vsub.f32 %v469_v10, %v9158_v12 }
  0x6e   : > { %1334 = vmatmul.mubr.f32.gmra.mxu1 %v8838_v26 }
  0x6f   : > { %1339 = vmatprep.mubr.f32.mxu1 %v11057_v19  ;;  %v2540_v14 = vand.u32 4294901760, %v9169_v13  ;;  %7789 = vperm.xlu1 %8650, %v7781_v43  }
  0x70   : > { %1422 = vmatmul.mubr.f32.vlgmr.msra.gmra.mxu0 %v8860_v38 }
  0x71   : > { %1427 = vmatprep.mubr.f32.mxu0 %v11057_v19  ;;  %1592 = vmatpush1.msra.mxu0 %v1270_v29 }
  0x72   : > { %1341 = vmatmul.mubr.f32.gmra.mxu1 %v8850_v33  ;;  %1596 = vmatprep.subr.mxu0 %v1276_v30  ;;  %v9217_v30 = vsub.f32 %v461_v16, %v9200_v22 }
  0x73   : > { %1520 = vmatprep.mubr.f32.mxu1 %v11057_v19  ;;  %1600 = vmatpush1.msra.mxu0 %v1282_v31  ;;  %v5544_v31 = vld [vmem:[%s11052_s7 + $0x8] sm:$0xff] }
  0x74   : > { %1430 = vmatmul.mubr.f32.gmra.mxu0 %v8865_v40  ;;  %1788 = vmatprep.subr.mxu0 %v9046_v44  ;;  %v2552_v36 = vand.u32 4294901760, %v9217_v30 }
  0x75   : > { %1435 = vmatprep.mubr.f32.mxu0 %v11057_v19 }
  0x76   : > { %1524 = vmatmul.mubr.f32.vlgmr.msra.gmra.mxu1 %v8872_v42 }
  0x77   : > { %1529 = vmatprep.mubr.f32.mxu1 %v11057_v19  ;;  %1693 = vmatpush1.msra.mxu1 %v8969_v18  ;;  %v2541_v18 = vsub.f32 %v9169_v13, %v2540_v14 }
  0x78   : > { %1438 = vmatmul.mubr.f32.gmra.mxu0 %v8868_v41  ;;  %1695 = vmatprep.subr.mxu1 %v8973_v20  ;;  %v5471_v20 = vld [vmem:[%s11051_s6] sm:$0xff] }
  0x79   : > { %1443 = vmatprep.mubr.f32.mxu0 %v11057_v19  ;;  %1697 = vmatpush1.msra.mxu1 %v8976_v21  ;;  %v9196_v21 = vand.u32 4294901760, %v468_v15  ;;  %v2542_v28 = vand.u32 4294901760, %v2541_v18 }
  0x7a   : > { %1533 = vmatmul.mubr.f32.gmra.mxu1 %v8883_v46  ;;  %1905 = vmatprep.subr.mxu1 %v1904_v57 }
  0x7b   : > { %1538 = vmatprep.mubr.f32.mxu1 %v11057_v19  ;;  %5475 = vperm.xlu0 %8649, %v5471_v20   ;;  %v9212_v29 = vsub.f32 %v468_v15, %v9196_v21 }
  0x7c   : > { %1446 = vmatmul.mubr.f32.gmra.mxu0 %v8892_v49 }
  0x7d   : > { %1633 = vmatprep.mubr.f32.mxu0 %v11057_v19  ;;  %v2546_v35 = vand.u32 4294901760, %v9212_v29 }
  0x7e   : > { %1542 = vmatmul.mubr.f32.gmra.mxu1 %v8889_v48 }
  0x7f   : > { %1547 = vmatprep.mubr.f32.mxu1 %v11057_v19  ;;  %5552 = vperm.xlu0 %8649, %v5544_v31  }
  0x80   : > { %1635 = vmatmul.mubr.f32.vlgmr.msra.gmra.mxu0 %v8834_v24 }
  0x81   : > { %1640 = vmatprep.mubr.f32.mxu0 %v11057_v19  ;;  %1790 = vmatpush1.msra.mxu0 %v9081_v54 }
  0x82   : > { %1551 = vmatmul.mubr.f32.gmra.mxu1 %v8920_v1  ;;  %1792 = vmatprep.subr.mxu0 %v9085_v55 }
  0x83   : > { %1730 = vmatprep.mubr.f32.mxu1 %v11057_v19  ;;  %1794 = vmatpush1.msra.mxu0 %v9088_v56 }
  0x84   : > { %1642 = vmatmul.mubr.f32.gmra.mxu0 %v8836_v25  ;;  %2015 = vmatprep.subr.mxu0 %v9057_v45  ;;  %v2553_v45 = vsub.f32 %v9217_v30, %v2552_v36 }
  0x85   : > { %1647 = vmatprep.mubr.f32.mxu0 %v11057_v19  ;;  %7784 = vperm.xlu0 %8649, %v7780_v37  }
  0x86   : > { %1732 = vmatmul.mubr.f32.vlgmr.msra.gmra.mxu1 %v8834_v24  ;;  %v2554_v51 = vand.u32 4294901760, %v2553_v45 }
  0x87   : > { %1737 = vmatprep.mubr.f32.mxu1 %v11057_v19  ;;  %1911 = vmatpush1.msra.mxu1 %v1910_v6 }
  0x88   : > { %1649 = vmatmul.mubr.f32.gmra.mxu0 %v8838_v26  ;;  %1917 = vmatprep.subr.mxu1 %v1916_v7 }
  0x89   : > { %1654 = vmatprep.mubr.f32.mxu0 %v11057_v19  ;;  %1923 = vmatpush1.msra.mxu1 %v1922_v9 }
  0x8a   : > { %1739 = vmatmul.mubr.f32.gmra.mxu1 %v8836_v25  ;;  %2119 = vmatprep.subr.mxu1 %v9046_v44 }
  0x8b   : > { %1744 = vmatprep.mubr.f32.mxu1 %v11057_v19 }
  0x8c   : > { %1656 = vmatmul.mubr.f32.gmra.mxu0 %v8850_v33 }
  0x8d   : > { %1827 = vmatprep.mubr.f32.mxu0 %v11057_v19 }
  0x8e   : > { %1746 = vmatmul.mubr.f32.gmra.mxu1 %v8838_v26 }
  0x8f   : > { %1751 = vmatprep.mubr.f32.mxu1 %v11057_v19 }
  0x90   : > { %1833 = vmatmul.mubr.f32.vlgmr.msra.gmra.mxu0 %v8912_v59 }
  0x91   : > { %1838 = vmatprep.mubr.f32.mxu0 %v11057_v19  ;;  %2018 = vmatpush1.msra.mxu0 %v9094_v58 }
  0x92   : > { %1753 = vmatmul.mubr.f32.gmra.mxu1 %v8850_v33  ;;  %2021 = vmatprep.subr.mxu0 %v9099_v60 }
  0x93   : > { %1956 = vmatprep.mubr.f32.mxu1 %v11057_v19  ;;  %2024 = vmatpush1.msra.mxu0 %v9104_v61 }
  0x94   : > { %1844 = vmatmul.mubr.f32.gmra.mxu0 %v8923_v4  ;;  %2226 = vmatprep.subr.mxu0 %v1902_v47  ;;  %v2559_v47 = vsub.f32 %v9225_v32, %v2558_v39 }
  0x95   : > { %1849 = vmatprep.mubr.f32.mxu0 %v11057_v19 }
  0x96   : > { %1958 = vmatmul.mubr.f32.vlgmr.msra.gmra.mxu1 %v8834_v24  ;;  %v2560_v52 = vand.u32 4294901760, %v2559_v47 }
  0x97   : > { %1963 = vmatprep.mubr.f32.mxu1 %v11057_v19  ;;  %2121 = vmatpush1.msra.mxu1 %v9081_v54 }
  0x98   : > { %1855 = vmatmul.mubr.f32.gmra.mxu0 %v8931_v8  ;;  %2123 = vmatprep.subr.mxu1 %v9085_v55 }
  0x99   : > { %1860 = vmatprep.mubr.f32.mxu0 %v11057_v19  ;;  %2125 = vmatpush1.msra.mxu1 %v9088_v56 }
  0x9a   : > { %1965 = vmatmul.mubr.f32.gmra.mxu1 %v8836_v25  ;;  %2329 = vmatprep.subr.mxu1 %v9046_v44  ;;  %v2547_v44 = vsub.f32 %v9212_v29, %v2546_v35 }
  0x9b   : > { %1970 = vmatprep.mubr.f32.mxu1 %v11057_v19 }
  0x9c   : > { %1866 = vmatmul.mubr.f32.gmra.mxu0 %v8943_v11  ;;  %v2548_v50 = vand.u32 4294901760, %v2547_v44 }
  0x9d   : > { %2057 = vmatprep.mubr.f32.mxu0 %v11057_v19 }
  0x9e   : > { %1972 = vmatmul.mubr.f32.gmra.mxu1 %v8838_v26 }
  0x9f   : > { %1977 = vmatprep.mubr.f32.mxu1 %v11057_v19 }
  0xa0   : > { %2060 = vmatmul.mubr.f32.vlgmr.msra.gmra.mxu0 %v8860_v38 }
  0xa1   : > { %2065 = vmatprep.mubr.f32.mxu0 %v11057_v19  ;;  %2230 = vmatpush1.msra.mxu0 %v1908_v62 }
  0xa2   : > { %1979 = vmatmul.mubr.f32.gmra.mxu1 %v8850_v33  ;;  %2234 = vmatprep.subr.mxu0 %v1914_v63 }
  0xa3   : > { %2158 = vmatprep.mubr.f32.mxu1 %v11057_v19  ;;  %2238 = vmatpush1.msra.mxu0 %v1920_v0 }
  0xa4   : > { %2068 = vmatmul.mubr.f32.gmra.mxu0 %v8865_v40  ;;  %2426 = vmatprep.subr.mxu0 %v9158_v12 }
  0xa5   : > { %2073 = vmatprep.mubr.f32.mxu0 %v11057_v19 }
  0xa6   : > { %2162 = vmatmul.mubr.f32.vlgmr.msra.gmra.mxu1 %v8872_v42 }
  0xa7   : > { %2167 = vmatprep.mubr.f32.mxu1 %v11057_v19  ;;  %2331 = vmatpush1.msra.mxu1 %v9081_v54 }
  0xa8   : > { %2076 = vmatmul.mubr.f32.gmra.mxu0 %v8868_v41  ;;  %2333 = vmatprep.subr.mxu1 %v9085_v55 }
  0xa9   : > { %2081 = vmatprep.mubr.f32.mxu0 %v11057_v19  ;;  %2335 = vmatpush1.msra.mxu1 %v9088_v56 }
  0xaa   : > { %2171 = vmatmul.mubr.f32.gmra.mxu1 %v8883_v46  ;;  %2543 = vmatprep.subr.mxu1 %v2542_v28 }
  0xab   : > { %2176 = vmatprep.mubr.f32.mxu1 %v11057_v19 }
  0xac   : > { %2084 = vmatmul.mubr.f32.gmra.mxu0 %v8892_v49 }
  0xad   : > { %2271 = vmatprep.mubr.f32.mxu0 %v11057_v19 }
  0xae   : > { %2180 = vmatmul.mubr.f32.gmra.mxu1 %v8889_v48 }
  0xaf   : > { %2185 = vmatprep.mubr.f32.mxu1 %v11057_v19 }
  0xb0   : > { %2273 = vmatmul.mubr.f32.vlgmr.msra.gmra.mxu0 %v8834_v24 }
  0xb1   : > { %2278 = vmatprep.mubr.f32.mxu0 %v11057_v19  ;;  %2428 = vmatpush1.msra.mxu0 %v9196_v21 }
  0xb2   : > { %2189 = vmatmul.mubr.f32.gmra.mxu1 %v8920_v1  ;;  %2430 = vmatprep.subr.mxu0 %v9200_v22 }
  0xb3   : > { %2368 = vmatprep.mubr.f32.mxu1 %v11057_v19  ;;  %2432 = vmatpush1.msra.mxu0 %v9206_v27 }
  0xb4   : > { %2280 = vmatmul.mubr.f32.gmra.mxu0 %v8836_v25  ;;  %2653 = vmatprep.subr.mxu0 %v9169_v13 }
  0xb5   : > { %2285 = vmatprep.mubr.f32.mxu0 %v11057_v19 }
  0xb6   : > { %2370 = vmatmul.mubr.f32.vlgmr.msra.gmra.mxu1 %v8834_v24 }
  0xb7   : > { %2375 = vmatprep.mubr.f32.mxu1 %v11057_v19  ;;  %2549 = vmatpush1.msra.mxu1 %v2548_v50 }
  0xb8   : > { %2287 = vmatmul.mubr.f32.gmra.mxu0 %v8838_v26  ;;  %2555 = vmatprep.subr.mxu1 %v2554_v51 }
  0xb9   : > { %2292 = vmatprep.mubr.f32.mxu0 %v11057_v19  ;;  %2561 = vmatpush1.msra.mxu1 %v2560_v52 }
  0xba   : > { %2377 = vmatmul.mubr.f32.gmra.mxu1 %v8836_v25  ;;  %2757 = vmatprep.subr.mxu1 %v9158_v12 }
  0xbb   : > { %2382 = vmatprep.mubr.f32.mxu1 %v11057_v19 }
  0xbc   : > { %2294 = vmatmul.mubr.f32.gmra.mxu0 %v8850_v33 }
  0xbd   : > { %2465 = vmatprep.mubr.f32.mxu0 %v11057_v19 }
  0xbe   : > { %2384 = vmatmul.mubr.f32.gmra.mxu1 %v8838_v26 }
  0xbf   : > { %2389 = vmatprep.mubr.f32.mxu1 %v11057_v19 }
  0xc0   : > { %2471 = vmatmul.mubr.f32.vlgmr.msra.gmra.mxu0 %v8912_v59 }
  0xc1   : > { %2476 = vmatprep.mubr.f32.mxu0 %v11057_v19  ;;  %2656 = vmatpush1.msra.mxu0 %v9212_v29 }
  0xc2   : > { %2391 = vmatmul.mubr.f32.gmra.mxu1 %v8850_v33  ;;  %2659 = vmatprep.subr.mxu0 %v9217_v30 }
  0xc3   : > { %2594 = vmatprep.mubr.f32.mxu1 %v11057_v19  ;;  %2662 = vmatpush1.msra.mxu0 %v9225_v32 }
  0xc4   : > { %2482 = vmatmul.mubr.f32.gmra.mxu0 %v8923_v4  ;;  %2864 = vmatprep.subr.mxu0 %v2540_v14 }
  0xc5   : > { %2487 = vmatprep.mubr.f32.mxu0 %v11057_v19 }
  0xc6   : > { %2596 = vmatmul.mubr.f32.vlgmr.msra.gmra.mxu1 %v8834_v24 }
  0xc7   : > { %2601 = vmatprep.mubr.f32.mxu1 %v11057_v19  ;;  %2759 = vmatpush1.msra.mxu1 %v9196_v21 }
  0xc8   : > { %2493 = vmatmul.mubr.f32.gmra.mxu0 %v8931_v8  ;;  %2761 = vmatprep.subr.mxu1 %v9200_v22 }
  0xc9   : > { %2498 = vmatprep.mubr.f32.mxu0 %v11057_v19  ;;  %2763 = vmatpush1.msra.mxu1 %v9206_v27 }
  0xca   : > { %2603 = vmatmul.mubr.f32.gmra.mxu1 %v8836_v25  ;;  %2967 = vmatprep.subr.mxu1 %v9158_v12 }
  0xcb   : > { %2608 = vmatprep.mubr.f32.mxu1 %v11057_v19 }
  0xcc   : > { %2504 = vmatmul.mubr.f32.gmra.mxu0 %v8943_v11 }
  0xcd   : > { %2695 = vmatprep.mubr.f32.mxu0 %v11057_v19 }
  0xce   : > { %2610 = vmatmul.mubr.f32.gmra.mxu1 %v8838_v26 }
  0xcf   : > { %2615 = vmatprep.mubr.f32.mxu1 %v11057_v19 }
  0xd0   : > { %2698 = vmatmul.mubr.f32.vlgmr.msra.gmra.mxu0 %v8860_v38 }
  0xd1   : > { %2703 = vmatprep.mubr.f32.mxu0 %v11057_v19  ;;  %2868 = vmatpush1.msra.mxu0 %v2546_v35 }
  0xd2   : > { %2617 = vmatmul.mubr.f32.gmra.mxu1 %v8850_v33  ;;  %2872 = vmatprep.subr.mxu0 %v2552_v36 }
  0xd3   : > { %2796 = vmatprep.mubr.f32.mxu1 %v11057_v19  ;;  %2876 = vmatpush1.msra.mxu0 %v2558_v39 }
  0xd4   : > { %2706 = vmatmul.mubr.f32.gmra.mxu0 %v8865_v40 }
  0xd5   : > { %2711 = vmatprep.mubr.f32.mxu0 %v11057_v19 }
  0xd6   : > { %2800 = vmatmul.mubr.f32.vlgmr.msra.gmra.mxu1 %v8872_v42 }
  0xd7   : > { %2805 = vmatprep.mubr.f32.mxu1 %v11057_v19  ;;  %2969 = vmatpush1.msra.mxu1 %v9196_v21 }
  0xd8   : > { %2714 = vmatmul.mubr.f32.gmra.mxu0 %v8868_v41  ;;  %2971 = vmatprep.subr.mxu1 %v9200_v22 }
  0xd9   : > { %2719 = vmatprep.mubr.f32.mxu0 %v11057_v19  ;;  %2973 = vmatpush1.msra.mxu1 %v9206_v27 }
  0xda   : > { %2809 = vmatmul.mubr.f32.gmra.mxu1 %v8883_v46 }
  0xdb   : > { %2814 = vmatprep.mubr.f32.mxu1 %v11057_v19 }
  0xdc   : > { %2722 = vmatmul.mubr.f32.gmra.mxu0 %v8892_v49 }
  0xdd   : > { %2909 = vmatprep.mubr.f32.mxu0 %v11057_v19 }
  0xde   : > { %2818 = vmatmul.mubr.f32.gmra.mxu1 %v8889_v48 }
  0xdf   : > { %2823 = vmatprep.mubr.f32.mxu1 %v11057_v19 }
  0xe0   : > { %2911 = vmatmul.mubr.f32.vlgmr.msra.gmra.mxu0 %v8834_v24 }
  0xe1   : > { %2916 = vmatprep.mubr.f32.mxu0 %v11057_v19 }
  0xe2   : > { %2827 = vmatmul.mubr.f32.gmra.mxu1 %v8920_v1 }
  0xe3   : > { %3006 = vmatprep.mubr.f32.mxu1 %v11057_v19 }
  0xe4   : > { %2918 = vmatmul.mubr.f32.gmra.mxu0 %v8836_v25 }
  0xe5   : > { %2923 = vmatprep.mubr.f32.mxu0 %v11057_v19 }
  0xe6   : > { %3008 = vmatmul.mubr.f32.vlgmr.msra.gmra.mxu1 %v8834_v24 }
  0xe7   : > { %3013 = vmatprep.mubr.f32.mxu1 %v11057_v19 }
  0xe8   : > { %2925 = vmatmul.mubr.f32.gmra.mxu0 %v8838_v26 }
  0xe9   : > { %2930 = vmatprep.mubr.f32.mxu0 %v11057_v19 }
  0xea   : > { %3015 = vmatmul.mubr.f32.gmra.mxu1 %v8836_v25 }
  0xeb   : > { %3020 = vmatprep.mubr.f32.mxu1 %v11057_v19 }
  0xec   : > { %2932 = vmatmul.mubr.f32.gmra.mxu0 %v8850_v33 }
  0xed   : > { %3379 = vmatprep.mubr.f32.mxu0 %v11057_v19 }
  0xee   : > { %3022 = vmatmul.mubr.f32.gmra.mxu1 %v8838_v26 }
  0xef   : > { %3027 = vmatprep.mubr.f32.mxu1 %v11057_v19 }
  0xf0   : > { %v558_v38 = vpop.f32.mrf.mxu0 }
  0xf2   : > { %v9341_v24 = vpop.f32.mrf.mxu0  ;;  %3029 = vmatmul.mubr.f32.gmra.mxu1 %v8850_v33 }
  0xf3   : > { %3486 = vmatprep.mubr.f32.mxu1 %v11057_v19 }
  0xf4   : > { %v569_v40 = vpop.f32.mrf.mxu0 }
  0xf6   : > { %v9345_v41 = vpop.f32.mrf.mxu0  ;;  %v683_v25 = vpop.f32.mrf.mxu1 }
  0xf7   : > { %v684_v42 = vadd.f32 %v683_v25, %v558_v38 }
  0xf8   : > { %v580_v46 = vpop.f32.mrf.mxu0  ;;  %v9347_v48 = vpop.f32.mrf.mxu1 }
  0xfa   : > { %v9349_v49 = vpop.f32.mrf.mxu0  ;;  %v690_v26 = vpop.f32.mrf.mxu1 }
  0xfb   : > { %v691_v59 = vadd.f32 %v690_v26, %v569_v40 }
  0xfc   : > { %v591_v1 = vpop.f32.mrf.mxu0  ;;  %v9351_v4 = vpop.f32.mrf.mxu1 }
  0xfe   : > { %v9353_v8 = vpop.f32.mrf.mxu0  ;;  %v697_v33 = vpop.f32.mrf.mxu1 }
  0xff   : > { %v698_v11 = vadd.f32 %v697_v33, %v580_v46 }
 0x100   : > { %v9355_v53 = vpop.f32.mrf.mxu1  ;;  %v785_v54 = vpop.f32.mrf.mxu0 }
 0x101   : > { %v786_v55 = vadd.f32 %v785_v54, %v684_v42 }
 0x102   : > { %v704_v56 = vpop.f32.mrf.mxu1  ;;  %v9357_v57 = vpop.f32.mrf.mxu0 }
 0x103   : > { %v705_v58 = vadd.f32 %v704_v56, %v591_v1 }
 0x104   : > { %v9359_v60 = vpop.f32.mrf.mxu1  ;;  %v793_v61 = vpop.f32.mrf.mxu0 }
 0x105   : > { %v794_v62 = vadd.f32 %v793_v61, %v691_v59 }
 0x106   : > { %v9361_v63 = vpop.f32.mrf.mxu0  ;;  %v887_v0 = vpop.f32.mrf.mxu1 }
 0x107   : > { %v888_v2 = vadd.f32 %v887_v0, %v786_v55 }
 0x108   : > { %v801_v3 = vpop.f32.mrf.mxu0  ;;  %v9363_v5 = vpop.f32.mrf.mxu1 }
 0x109   : > { %v802_v6 = vadd.f32 %v801_v3, %v698_v11 }
 0x10a   : > { %v9365_v7 = vpop.f32.mrf.mxu0  ;;  %v896_v9 = vpop.f32.mrf.mxu1 }
 0x10b   : > { %v897_v10 = vadd.f32 %v896_v9, %v794_v62 }
 0x10c   : > { %v809_v12 = vpop.f32.mrf.mxu0  ;;  %v9367_v13 = vpop.f32.mrf.mxu1 }
 0x10d   : > { %v810_v14 = vadd.f32 %v809_v12, %v705_v58 }
 0x10e   : > { %v9369_v15 = vpop.f32.mrf.mxu0  ;;  %v905_v16 = vpop.f32.mrf.mxu1 }
 0x10f   : > { %v906_v17 = vadd.f32 %v905_v16, %v802_v6 }
 0x110   : > { %v9371_v18 = vpop.f32.mrf.mxu1  ;;  %v998_v20 = vpop.f32.mrf.mxu0 }
 0x111   : > { %v999_v21 = vadd.f32 %v998_v20, %v888_v2 }
 0x112   : > { %v914_v22 = vpop.f32.mrf.mxu1  ;;  %v9373_v23 = vpop.f32.mrf.mxu0 }
 0x113   : > { %v915_v27 = vadd.f32 %v914_v22, %v810_v14 }
 0x114   : > { %v9375_v28 = vpop.f32.mrf.mxu1  ;;  %v1005_v29 = vpop.f32.mrf.mxu0 }
 0x115   : > { %v1006_v30 = vadd.f32 %v1005_v29, %v897_v10 }
 0x116   : > { %v9377_v31 = vpop.f32.mrf.mxu0  ;;  %v1095_v32 = vpop.f32.mrf.mxu1 }
 0x117   : > { %v9379_v34 = vadd.f32 %v1095_v32, %v999_v21 }
 0x118   : > { %v1012_v35 = vpop.f32.mrf.mxu0  ;;  %v9381_v36 = vpop.f32.mrf.mxu1 }
 0x119   : > { %v1013_v37 = vadd.f32 %v1012_v35, %v906_v17 }
 0x11a   : > { %v9383_v39 = vpop.f32.mrf.mxu0  ;;  %v1102_v43 = vpop.f32.mrf.mxu1 }
 0x11b   : > { %v9385_v44 = vadd.f32 %v1102_v43, %v1006_v30 }
 0x11c   : > { %v1019_v45 = vpop.f32.mrf.mxu0  ;;  %v9387_v47 = vpop.f32.mrf.mxu1 }
 0x11d   : > { %11114 = vst [vmem:[#allocation4_spill] sm:$0xff] %v9387_v47  ;;  %v1020_v50 = vadd.f32 %v1019_v45, %v915_v27 }
 0x11e   : > { %v9389_v51 = vpop.f32.mrf.mxu0  ;;  %v1109_v52 = vpop.f32.mrf.mxu1 }
 0x11f   : > { %v9391_v38 = vadd.f32 %v1109_v52, %v1013_v37 }
 0x120   : > { %v9393_v40 = vpop.f32.mrf.mxu1  ;;  %v1196_v25 = vpop.f32.mrf.mxu0 }
 0x122   : > { %v1116_v42 = vpop.f32.mrf.mxu1  ;;  %v9395_v46 = vpop.f32.mrf.mxu0 }
 0x123   : > { %v9397_v26 = vadd.f32 %v1116_v42, %v1020_v50 }
 0x124   : > { %v9399_v59 = vpop.f32.mrf.mxu1  ;;  %v1207_v1 = vpop.f32.mrf.mxu0 }
 0x126   : > { %v9401_v33 = vpop.f32.mrf.mxu0  ;;  %v1321_v11 = vpop.f32.mrf.mxu1 }
 0x127   : > { %v1322_v54 = vadd.f32 %v1321_v11, %v1196_v25 }
 0x128   : > { %v1218_v55 = vpop.f32.mrf.mxu0  ;;  %v9403_v56 = vpop.f32.mrf.mxu1 }
 0x12a   : > { %v9405_v58 = vpop.f32.mrf.mxu0  ;;  %v1328_v61 = vpop.f32.mrf.mxu1 }
 0x12b   : > { %v1329_v62 = vadd.f32 %v1328_v61, %v1207_v1 }
 0x12c   : > { %v1229_v0 = vpop.f32.mrf.mxu0  ;;  %v9407_v2 = vpop.f32.mrf.mxu1 }
 0x12e   : > { %v9409_v3 = vpop.f32.mrf.mxu0  ;;  %v1335_v6 = vpop.f32.mrf.mxu1 }
 0x12f   : > { %11115 = vst [vmem:[#allocation5_spill] sm:$0xff] %v9409_v3  ;;  %v1336_v9 = vadd.f32 %v1335_v6, %v1218_v55 }
 0x130   : > { %v9411_v10 = vpop.f32.mrf.mxu1  ;;  %v1423_v12 = vpop.f32.mrf.mxu0 }
 0x131   : > { %v1424_v14 = vadd.f32 %v1423_v12, %v1322_v54 }
 0x132   : > { %v1342_v16 = vpop.f32.mrf.mxu1  ;;  %v9413_v17 = vpop.f32.mrf.mxu0 }
 0x133   : > { %v1343_v20 = vadd.f32 %v1342_v16, %v1229_v0 }
 0x134   : > { %v9415_v21 = vpop.f32.mrf.mxu1  ;;  %v1431_v22 = vpop.f32.mrf.mxu0 }
 0x135   : > { %11116 = vst [vmem:[#allocation6_spill] sm:$0xff] %v9415_v21  ;;  %v1432_v27 = vadd.f32 %v1431_v22, %v1329_v62 }
 0x136   : > { %v9417_v29 = vpop.f32.mrf.mxu0  ;;  %v1525_v30 = vpop.f32.mrf.mxu1 }
 0x137   : > { %11117 = vst [vmem:[#allocation7_spill] sm:$0xff] %v9417_v29  ;;  %v1526_v32 = vadd.f32 %v1525_v30, %v1424_v14 }
 0x138   : > { %v1439_v35 = vpop.f32.mrf.mxu0  ;;  %v9419_v37 = vpop.f32.mrf.mxu1 }
 0x139   : > { %v1440_v43 = vadd.f32 %v1439_v35, %v1336_v9 }
 0x13a   : > { %v9421_v45 = vpop.f32.mrf.mxu0  ;;  %v1534_v50 = vpop.f32.mrf.mxu1 }
 0x13b   : > { %11118 = vst [vmem:[#allocation8_spill] sm:$0xff] %v9421_v45  ;;  %v1535_v52 = vadd.f32 %v1534_v50, %v1432_v27 }
 0x13c   : > { %v1447_v25 = vpop.f32.mrf.mxu0  ;;  %v9423_v42 = vpop.f32.mrf.mxu1 }
 0x13d   : > { %11119 = vst [vmem:[#allocation9_spill] sm:$0xff] %v9423_v42  ;;  %v1448_v1 = vadd.f32 %v1447_v25, %v1343_v20 }
 0x13e   : > { %v9425_v11 = vpop.f32.mrf.mxu0  ;;  %v1543_v54 = vpop.f32.mrf.mxu1 }
 0x13f   : > { %11120 = vst [vmem:[#allocation10_spill] sm:$0xff] %v9425_v11  ;;  %v1544_v55 = vadd.f32 %v1543_v54, %v1440_v43 }
 0x140   : > { %v9427_v61 = vpop.f32.mrf.mxu1  ;;  %v1636_v62 = vpop.f32.mrf.mxu0 }
 0x141   : > { %11121 = vst [vmem:[#allocation11_spill] sm:$0xff] %v9427_v61  ;;  %v1637_v0 = vadd.f32 %v1636_v62, %v1526_v32 }
 0x142   : > { %v1552_v6 = vpop.f32.mrf.mxu1  ;;  %v9429_v12 = vpop.f32.mrf.mxu0 }
 0x143   : > { %v1553_v9 = vadd.f32 %v1552_v6, %v1448_v1 }
 0x144   : > { %v9431_v14 = vpop.f32.mrf.mxu1  ;;  %v1643_v16 = vpop.f32.mrf.mxu0 }
 0x145   : > { %11122 = vst [vmem:[#allocation12_spill] sm:$0xff] %v9431_v14  ;;  %v1644_v22 = vadd.f32 %v1643_v16, %v1535_v52 }
 0x146   : > { %v9433_v27 = vpop.f32.mrf.mxu0  ;;  %v1733_v30 = vpop.f32.mrf.mxu1 }
 0x147   : > { %11123 = vst [vmem:[#allocation13_spill] sm:$0xff] %v9433_v27  ;;  %v9435_v20 = vadd.f32 %v1733_v30, %v1637_v0 }
 0x148   : > { %v1650_v35 = vpop.f32.mrf.mxu0  ;;  %v9437_v50 = vpop.f32.mrf.mxu1 }
 0x149   : > { %11124 = vst [vmem:[#allocation14_spill] sm:$0xff] %v9435_v20  ;;  %v1651_v43 = vadd.f32 %v1650_v35, %v1544_v55 }
 0x14a   : > { %v9439_v25 = vpop.f32.mrf.mxu0  ;;  %v1740_v32 = vpop.f32.mrf.mxu1 }
 0x14b   : > { %11125 = vst [vmem:[#allocation15_spill] sm:$0xff] %v9439_v25  ;;  %v9441_v54 = vadd.f32 %v1740_v32, %v1644_v22 }
 0x14c   : > { %v1657_v62 = vpop.f32.mrf.mxu0  ;;  %v9443_v1 = vpop.f32.mrf.mxu1 }
 0x14d   : > { %11126 = vst [vmem:[#allocation16_spill] sm:$0xff] %v9441_v54  ;;  %11127 = vst [vmem:[#allocation17_spill] sm:$0xff] %v9443_v1  ;;  %v1658_v6 = vadd.f32 %v1657_v62, %v1553_v9 }
 0x14e   : > { %v9445_v19 = vpop.f32.mrf.mxu0  ;;  %v1747_v52 = vpop.f32.mrf.mxu1 }
 0x14f   : > { %11128 = vst [vmem:[#allocation18_spill] sm:$0xff] %v9445_v19  ;;  %v9447_v16 = vadd.f32 %v1747_v52, %v1651_v43 }
 0x150   : > { %v9449_v0 = vpop.f32.mrf.mxu1  ;;  %v1834_v30 = vpop.f32.mrf.mxu0 }
 0x151   : > { %11129 = vst [vmem:[#allocation19_spill] sm:$0xff] %v9447_v16  ;;  %11130 = vst [vmem:[#allocation20_spill] sm:$0xff] %v9449_v0 }
 0x152   : > { %v1754_v14 = vpop.f32.mrf.mxu1  ;;  %v1836_v11 = vpop.f32.mrf.mxu0 }
 0x153   : > { %v9451_v55 = vadd.f32 %v1754_v14, %v1658_v6 }
 0x154   : > { %v9453_v35 = vpop.f32.mrf.mxu1  ;;  %v1845_v22 = vpop.f32.mrf.mxu0 }
 0x155   : > { %11131 = vst [vmem:[#allocation21_spill] sm:$0xff] %v9451_v55  ;;  %11132 = vst [vmem:[#allocation22_spill] sm:$0xff] %v9453_v35 }
 0x156   : > { %v9455_v32 = vpop.f32.mrf.mxu0  ;;  %v1959_v54 = vpop.f32.mrf.mxu1 }
 0x157   : > { %11133 = vst [vmem:[#allocation23_spill] sm:$0xff] %v9455_v32  ;;  %v1960_v1 = vadd.f32 %v1959_v54, %v1834_v30 }
 0x158   : > { %v1856_v9 = vpop.f32.mrf.mxu0  ;;  %v1961_v62 = vpop.f32.mrf.mxu1 }
 0x15a   : > { %v1858_v19 = vpop.f32.mrf.mxu0  ;;  %v1966_v25 = vpop.f32.mrf.mxu1 }
 0x15b   : > { %v1967_v43 = vadd.f32 %v1966_v25, %v1845_v22 }
 0x15c   : > { %v1867_v52 = vpop.f32.mrf.mxu0  ;;  %v9457_v27 = vpop.f32.mrf.mxu1 }
 0x15d   : > { %11134 = vst [vmem:[#allocation24_spill] sm:$0xff] %v9457_v27 }
 0x15e   : > { %v9459_v0 = vpop.f32.mrf.mxu0  ;;  %v1973_v61 = vpop.f32.mrf.mxu1 }
 0x15f   : > { %11135 = vst [vmem:[#allocation25_spill] sm:$0xff] %v9459_v0  ;;  %v1974_v14 = vadd.f32 %v1973_v61, %v1856_v9 }
 0x160   : > { %v1975_v6 = vpop.f32.mrf.mxu1  ;;  %v2061_v55 = vpop.f32.mrf.mxu0 }
 0x161   : > { %v2062_v35 = vadd.f32 %v2061_v55, %v1960_v1 }
 0x162   : > { %v1980_v21 = vpop.f32.mrf.mxu1  ;;  %v2063_v3 = vpop.f32.mrf.mxu0 }
 0x163   : > { %v9461_v32 = vadd.f32 %v1980_v21, %v1867_v52 }
 0x164   : > { %v9463_v54 = vpop.f32.mrf.mxu1  ;;  %v2069_v30 = vpop.f32.mrf.mxu0 }
 0x165   : > { %11136 = vst [vmem:[#allocation26_spill] sm:$0xff] %v9461_v32  ;;  %11137 = vst [vmem:[#allocation27_spill] sm:$0xff] %v9463_v54  ;;  %v2070_v42 = vadd.f32 %v2069_v30, %v1967_v43  ;;  %v700_v43 = vadd.f32 %v9355_v53, %v9349_v49 }
 0x166   : > { %v9465_v45 = vpop.f32.mrf.mxu0  ;;  %v2163_v25 = vpop.f32.mrf.mxu1 }
 0x167   : > { %11138 = vst [vmem:[#allocation28_spill] sm:$0xff] %v9465_v45  ;;  %v2164_v22 = vadd.f32 %v2163_v25, %v2062_v35  ;;  %v3040_v45 = vpop.permute.xlu1 %3039  ;;  %v686_v35 = vadd.f32 %v9347_v48, %v9341_v24  ;;  %v804_v25 = vadd.f32 %v9365_v7, %v700_v43 }
 0x168   : > { %v2077_v27 = vpop.f32.mrf.mxu0  ;;  %v2165_v29 = vpop.f32.mrf.mxu1 }
 0x16a   : > { %v2079_v0 = vpop.f32.mrf.mxu0  ;;  %v2172_v47 = vpop.f32.mrf.mxu1 }
 0x16b   : > { %v9467_v61 = vadd.f32 %v2172_v47, %v2070_v42  ;;  %v3054_v49 = vpop.permute.xlu1 %3053 }
 0x16c   : > { %v9469_v9 = vpop.f32.mrf.mxu0  ;;  %v9471_v1 = vpop.f32.mrf.mxu1  ;;  %v9494_v7 = vadd.f32 %v3054_v49, %v9391_v38 }
 0x16d   : > { %11139 = vst [vmem:[#allocation29_spill] sm:$0xff] %v9467_v61  ;;  %11140 = vst [vmem:[#allocation30_spill] sm:$0xff] %v9469_v9  ;;  %v788_v61 = vadd.f32 %v9357_v57, %v686_v35 }
 0x16e   : > { %11141 = vst [vmem:[#allocation31_spill] sm:$0xff] %v9471_v1  ;;  %v9473_v21 = vpop.f32.mrf.mxu0  ;;  %v2181_v55 = vpop.f32.mrf.mxu1  ;;  %v908_v1 = vadd.f32 %v9371_v18, %v804_v25  ;;  %11143 = vst [vmem:[#allocation33_spill] sm:$0xff] %v9494_v7  ;;  %v1962_v18 = vadd.f32 %v1961_v62, %v1836_v11  ;;  %v1324_v25 = vadd.f32 %v9403_v56, %v9395_v46  ;;  %v3303_v46 = vld [vmem:[%s11050_s5] sm:$0xff] }
 0x16f   : > { %11142 = vst [vmem:[#allocation32_spill] sm:$0xff] %v9473_v21  ;;  %v890_v53 = vadd.f32 %v9363_v5, %v788_v61  ;;  %v1976_v5 = vadd.f32 %v1975_v6, %v1858_v19  ;;  %v2078_v61 = vadd.f32 %v2077_v27, %v1974_v14 }
 0x170   : > { %v2183_v52 = vpop.f32.mrf.mxu1  ;;  %v2274_v30 = vpop.f32.mrf.mxu0  ;;  %v1015_v9 = vadd.f32 %v9383_v39, %v908_v1  ;;  %v9502_v39 = vadd.f32 %v3040_v45, %v9379_v34 }
 0x171   : > { %v1001_v48 = vadd.f32 %v9373_v23, %v890_v53  ;;  %v2064_v23 = vadd.f32 %v2063_v3, %v1962_v18  ;;  %v2080_v11 = vadd.f32 %v2079_v0, %v1976_v5  ;;  %v2182_v62 = vadd.f32 %v2181_v55, %v2078_v61 }
 0x172   : > { %v9480_v47 = vpop.f32.mrf.mxu1  ;;  %v2276_v42 = vpop.f32.mrf.mxu0  ;;  %v9497_v57 = vadd.f32 %v9393_v40, %v1015_v9  ;;  %11145 = vst [vmem:[#allocation35_spill] sm:$0xff] %v9502_v39  ;;  %v1426_v40 = vadd.f32 %v9413_v17, %v1324_v25  ;;  %v2275_v27 = vadd.f32 %v2274_v30, %v2164_v22  ;;  %v693_v25 = vadd.f32 %v9351_v4, %v9345_v41 }
 0x173   : > { %v9505_v1 = vadd.f32 %v9381_v36, %v1001_v48  ;;  %v2166_v19 = vadd.f32 %v2165_v29, %v2064_v23  ;;  %v2184_v17 = vadd.f32 %v2183_v52, %v2080_v11  ;;  %v3306_v29 = vsel %vm470_vm0, %v3303_v46, 0 }
 0x174   : > { %v9484_v21 = vpop.f32.mrf.mxu1  ;;  %v9486_v54 = vpop.f32.mrf.mxu0  ;;  %11144 = vst [vmem:[#allocation34_spill] sm:$0xff] %v9497_v57  ;;  %v3093_v36 = vmul.f32 %v9502_v39, %v9497_v57  ;;  %v1528_v45 = vadd.f32 %v9419_v37, %v1426_v40  ;;  %v707_v37 = vadd.f32 %v9359_v60, %v9353_v8  ;;  %v9557_v61 = vand.u32 4294901760, %v3306_v29 }
 0x175   : > { %11146 = vst [vmem:[#allocation36_spill] sm:$0xff] %v9505_v1  ;;  %v3095_v3 = vmul.f32 %v9494_v7, %v9505_v1  ;;  %v2277_v14 = vadd.f32 %v2276_v42, %v2166_v19  ;;  %v796_v23 = vadd.f32 %v9361_v63, %v693_v25 }
 0x176   : > { %v9490_v32 = vpop.f32.mrf.mxu0  ;;  %v2371_v24 = vpop.f32.mrf.mxu1  ;;  %v1639_v55 = vadd.f32 %v9429_v12, %v1528_v45  ;;  %v3304_v12 = vld [vmem:[%s11050_s5 + $0x8] sm:$0xff]  ;;  %v812_v8 = vadd.f32 %v9369_v15, %v707_v37  ;;  %11149 = vst [vmem:[#allocation39_spill] sm:$0xff] %v9557_v61 }
 0x177   : > { %v9526_v53 = vadd.f32 %v2371_v24, %v2275_v27  ;;  %v3097_v42 = vadd.f32 %v3095_v3, %v3093_v36  ;;  %v3045_v24 = vpop.permute.xlu0 %3044  ;;  %v3309_v11 = vsel %vm470_vm0, %v3304_v12, 0  ;;  %v899_v19 = vadd.f32 %v9367_v13, %v796_v23 }
 0x178   : > { %v2288_v43 = vpop.f32.mrf.mxu0  ;;  %v2373_v35 = vpop.f32.mrf.mxu1  ;;  %v917_v15 = vadd.f32 %v9375_v28, %v812_v8  ;;  %v9583_v28 = vand.u32 4294901760, %v3309_v11 }
 0x179   : > { %v2289_v0 = vadd.f32 %v2288_v43, %v2182_v62  ;;  %11147 = vst [vmem:[#allocation37_spill] sm:$0xff] %v9526_v53  ;;  %v9534_v22 = vadd.f32 %v2373_v35, %v2277_v14  ;;  %v9542_v43 = vadd.f32 %v9437_v50, %v1639_v55  ;;  %v3107_v27 = vmul.f32 %v9526_v53, %v9447_v16 }
 0x17a   : > { %v2290_v38 = vpop.f32.mrf.mxu0  ;;  %v9507_v49 = vpop.f32.mrf.mxu1  ;;  %v1022_v45 = vadd.f32 %v9389_v51, %v917_v15  ;;  %11153 = vst [vmem:[#allocation43_spill] sm:$0xff] %v9583_v28  ;;  %v1008_v14 = vadd.f32 %v9377_v31, %v899_v19  ;;  %v1331_v51 = vadd.f32 %v9407_v2, %v9401_v33  ;;  %v1338_v31 = vadd.f32 %v9411_v10, %v9405_v58  ;;  %v11162_v10 = vld [vmem:[#allocation9_spill] sm:$0xff]  ;;  %v11166_v19 = vld [vmem:[#allocation6_spill] sm:$0xff] }
 0x17b   : > { %v2291_v48 = vadd.f32 %v2290_v38, %v2184_v17  ;;  %11148 = vst [vmem:[#allocation38_spill] sm:$0xff] %v9534_v22  ;;  %v3059_v36 = vpop.permute.xlu0 %3058  ;;  %v9617_v12 = vsub.f32 %v3309_v11, %v9583_v28  ;;  %v3063_v58 = vmul.f32 %v9494_v7, %v9502_v39  ;;  %v3065_v11 = vmul.f32 %v9497_v57, %v9505_v1  ;;  %v11165_v15 = vld [vmem:[#allocation5_spill] sm:$0xff] }
 0x17c   : > { %v9513_v56 = vpop.f32.mrf.mxu0  ;;  %v9515_v34 = vpop.f32.mrf.mxu1  ;;  %v9587_v13 = vadd.f32 %v3059_v36, %v9397_v26  ;;  %v11156_v26 = vld [vmem:[#allocation4_spill] sm:$0xff]  ;;  %v1345_v36 = vadd.f32 %v11166_v19, %v11165_v15  ;;  %v11173_v19 = vld [vmem:[#allocation15_spill] sm:$0xff] }
 0x17d   : > { %v9606_v37 = vadd.f32 %v11156_v26, %v1008_v14  ;;  %11160 = vst [vmem:[#allocation46_spill] sm:$0xff] %v9617_v12 }
 0x17e   : > { %v9522_v6 = vpop.f32.mrf.mxu0  ;;  %v2385_v9 = vpop.f32.mrf.mxu1  ;;  %11154 = vst [vmem:[#allocation44_spill] sm:$0xff] %v9587_v13 }
 0x17f   : > { %v9528_v18 = vadd.f32 %v2385_v9, %v2289_v0  ;;  %v9581_v0 = vsub.f32 %v3306_v29, %v9557_v61  ;;  %v9590_v9 = vadd.f32 %v9399_v59, %v1022_v45  ;;  %v9601_v29 = vadd.f32 %v3045_v24, %v9385_v44  ;;  %11157 = vst [vmem:[#allocation4_spill] sm:$0xff] %v9606_v37  ;;  %v11158_v59 = vld [vmem:[#allocation7_spill] sm:$0xff]  ;;  %v11161_v44 = vld [vmem:[#allocation8_spill] sm:$0xff] }
 0x180   : > { %v2387_v52 = vpop.f32.mrf.mxu1  ;;  %v9536_v30 = vpop.f32.mrf.mxu0  ;;  %v1442_v24 = vadd.f32 %v11161_v44, %v1338_v31  ;;  %v9648_v44 = vand.u32 4294901760, %v9617_v12 }
 0x181   : > { %v9544_v5 = vadd.f32 %v2387_v52, %v2291_v48  ;;  %v3099_v41 = vmul.f32 %v9528_v18, %v9435_v20  ;;  %v9550_v4 = vmul.f32 %v9528_v18, %v9526_v53  ;;  %v9561_v50 = vmul.f32 %v9528_v18, %v9534_v22  ;;  %11152 = vst [vmem:[#allocation42_spill] sm:$0xff] %v9581_v0 }
 0x182   : > { %v9553_v60 = vpop.f32.mrf.mxu1  ;;  %v9555_v35 = vpop.f32.mrf.mxu0  ;;  %11155 = vst [vmem:[#allocation45_spill] sm:$0xff] %v9590_v9  ;;  %v1434_v52 = vadd.f32 %v11158_v59, %v1331_v51  ;;  %v9614_v2 = vand.u32 4294901760, %v9581_v0  ;;  %v3066_v14 = vmul.f32 %v9590_v9, %v9606_v37  ;;  %v11168_v51 = vld [vmem:[#allocation13_spill] sm:$0xff]  ;;  %11170 = vst [vmem:[#allocation6_spill] sm:$0xff] %v9648_v44 }
 0x183   : > { %11150 = vst [vmem:[#allocation40_spill] sm:$0xff] %v9561_v50  ;;  %v3101_v38 = vsub.f32 %v3097_v42, %v3099_v41  ;;  %v3103_v40 = vmul.f32 %v9544_v5, %v9542_v43  ;;  %v11174_v50 = vld [vmem:[#allocation17_spill] sm:$0xff] }
 0x184   : > { %v9568_v62 = vpop.f32.mrf.mxu1  ;;  %v9570_v46 = vpop.f32.mrf.mxu0  ;;  %11159 = vst [vmem:[#allocation7_spill] sm:$0xff] %v9614_v2  ;;  %v1537_v41 = vadd.f32 %v11162_v10, %v1434_v52  ;;  %v3383_v52 = vsub.f32 %v9581_v0, %v9614_v2  ;;  %v11172_v10 = vld [vmem:[#allocation10_spill] sm:$0xff]  ;;  %v3067_v2 = vadd.f32 %v3065_v11, %v3063_v58  ;;  %v11178_v0 = vld [vmem:[#allocation12_spill] sm:$0xff]  ;;  %v9681_v58 = vmul.f32 %v9494_v7, %v9435_v20 }
 0x185   : > { %v3105_v3 = vsub.f32 %v3101_v38, %v3103_v40  ;;  %v3094_v38 = vmul.f32 %v9601_v29, %v9590_v9  ;;  %v3096_v40 = vmul.f32 %v9587_v13, %v9606_v37  ;;  %v1450_v15 = vadd.f32 %v11172_v10, %v1345_v36  ;;  %v11186_v11 = vld [vmem:[#allocation16_spill] sm:$0xff]  ;;  %v11189_v10 = vld [vmem:[#allocation26_spill] sm:$0xff] }
 0x186   : > { %v9574_v17 = vpop.f32.mrf.mxu0  ;;  %v9576_v63 = vpop.f32.mrf.mxu1  ;;  %v1646_v31 = vadd.f32 %v11168_v51, %v1537_v41  ;;  %v3069_v36 = vmul.f32 %v9447_v16, %v9435_v20 }
 0x187   : > { %11151 = vst [vmem:[#allocation41_spill] sm:$0xff] %v9574_v17  ;;  %v9598_v25 = vadd.f32 %v3107_v27, %v3105_v3  ;;  %v11167_v3 = vld [vmem:[#allocation11_spill] sm:$0xff]  ;;  %v3064_v27 = vmul.f32 %v9587_v13, %v9601_v29  ;;  %v9663_v61 = vadd.f32 %v3096_v40, %v3094_v38 }
 0x188   : > { %v9594_v55 = vpop.f32.mrf.mxu0  ;;  %v9596_v48 = vpop.f32.mrf.mxu1  ;;  %v1546_v45 = vadd.f32 %v11167_v3, %v1442_v24  ;;  %v9652_v24 = vmul.f32 %v9544_v5, %v9526_v53  ;;  %v9657_v41 = vadd.f32 %v11174_v50, %v1646_v31  ;;  %v9675_v31 = vand.u32 4294901760, %v3383_v52 }
 0x189   : > { %v9698_v52 = vmul.f32 %v9542_v43, %v9497_v57  ;;  %v3071_v12 = vadd.f32 %v3069_v36, %v3067_v2 }
 0x18a   : > { %v9609_v42 = vpop.f32.mrf.mxu0  ;;  %v9611_v33 = vpop.f32.mrf.mxu1  ;;  %11171 = vst [vmem:[#allocation11_spill] sm:$0xff] %v9652_v24  ;;  %v1653_v3 = vadd.f32 %v11173_v19, %v1546_v45  ;;  %11175 = vst [vmem:[#allocation13_spill] sm:$0xff] %v9657_v41  ;;  %v3068_v24 = vadd.f32 %v3066_v14, %v3064_v27  ;;  %v9690_v27 = vmul.f32 %v9587_v13, %v11186_v11 }
 0x18b   : > { %11183 = vst [vmem:[#allocation47_spill] sm:$0xff] %v9675_v31  ;;  %v9694_v14 = vmul.f32 %v9494_v7, %v9542_v43  ;;  %11188 = vst [vmem:[#allocation16_spill] sm:$0xff] %v9698_v52  ;;  %v11196_v52 = vld [vmem:[#allocation22_spill] sm:$0xff] }
 0x18c   : > { %v9623_v8 = vpop.f32.mrf.mxu0  ;;  %v9625_v23 = vpop.f32.mrf.mxu1 }
 0x18d   : > { %11163 = vst [vmem:[#allocation8_spill] sm:$0xff] %v9623_v8  ;;  %11164 = vst [vmem:[#allocation9_spill] sm:$0xff] %v9625_v23  ;;  %v11179_v23 = vld [vmem:[#allocation20_spill] sm:$0xff] }
 0x18e   : > { %v9641_v26 = vpop.f32.mrf.mxu0  ;;  %v9643_v59 = vpop.f32.mrf.mxu1  ;;  %v9667_v17 = vadd.f32 %v11179_v23, %v1653_v3  ;;  %v11185_v23 = vld [vmem:[#allocation18_spill] sm:$0xff] }
 0x18f   : > { %11169 = vst [vmem:[#allocation5_spill] sm:$0xff] %v9641_v26  ;;  %v1555_v26 = vadd.f32 %v11178_v0, %v1450_v15  ;;  %v9685_v0 = vmul.f32 %v9435_v20, %v9497_v57  ;;  %11187 = vst [vmem:[#allocation18_spill] sm:$0xff] %v9694_v14  ;;  %v11190_v15 = vld [vmem:[#allocation30_spill] sm:$0xff]  ;;  %v11199_v14 = vld [vmem:[#allocation23_spill] sm:$0xff] }
 0x190   : > { %v9659_v51 = vpop.f32.mrf.mxu1  ;;  %v9661_v28 = vpop.f32.mrf.mxu0  ;;  %11180 = vst [vmem:[#allocation17_spill] sm:$0xff] %v9667_v17  ;;  %v2086_v19 = vadd.f32 %v11190_v15, %v11189_v10  ;;  %v11198_v10 = vld [vmem:[#allocation21_spill] sm:$0xff]  ;;  %v3073_v31 = vmul.f32 %v9667_v17, %v9542_v43  ;;  %v9738_v2 = vmul.f32 %v9502_v39, %v9667_v17  ;;  %v9742_v36 = vmul.f32 %v9667_v17, %v9505_v1 }
 0x191   : > { %11176 = vst [vmem:[#allocation10_spill] sm:$0xff] %v9659_v51  ;;  %11177 = vst [vmem:[#allocation15_spill] sm:$0xff] %v9661_v28  ;;  %v1660_v40 = vadd.f32 %v11185_v23, %v1555_v26  ;;  %v9708_v26 = vmul.f32 %v9587_v13, %v9657_v41  ;;  %v9712_v23 = vmul.f32 %v9657_v41, %v9590_v9 }
 0x192   : > { %v9671_v45 = vpop.f32.mrf.mxu1  ;;  %v9673_v50 = vpop.f32.mrf.mxu0  ;;  %11184 = vst [vmem:[#allocation48_spill] sm:$0xff] %v9685_v0  ;;  %v9716_v0 = vmul.f32 %v11186_v11, %v9590_v9  ;;  %v3070_v15 = vmul.f32 %v11198_v10, %v11186_v11  ;;  %v2191_v8 = vadd.f32 %v9480_v47, %v2086_v19  ;;  %v9750_v47 = vmul.f32 %v9447_v16, %v9542_v43  ;;  %v11209_v19 = vld [vmem:[#allocation32_spill] sm:$0xff] }
 0x193   : > { %11181 = vst [vmem:[#allocation12_spill] sm:$0xff] %v9671_v45  ;;  %11182 = vst [vmem:[#allocation20_spill] sm:$0xff] %v9673_v50  ;;  %v9719_v44 = vadd.f32 %v11196_v52, %v1660_v40  ;;  %v11202_v45 = vld [vmem:[#allocation27_spill] sm:$0xff]  ;;  %v3123_v40 = vmul.f32 %v9502_v39, %v9447_v16  ;;  %v3075_v51 = vadd.f32 %v3073_v31, %v3071_v12 }
 0x194   : > { %v9702_v3 = vpop.f32.mrf.mxu1  ;;  %v9704_v38 = vpop.f32.mrf.mxu0  ;;  %11193 = vst [vmem:[#allocation49_spill] sm:$0xff] %v9708_v26  ;;  %11194 = vst [vmem:[#allocation50_spill] sm:$0xff] %v9712_v23  ;;  %v11200_v26 = vld [vmem:[#allocation24_spill] sm:$0xff]  ;;  %v3072_v28 = vadd.f32 %v3070_v15, %v3068_v24 }
 0x195   : > { %11191 = vst [vmem:[#allocation26_spill] sm:$0xff] %v9702_v3  ;;  %11192 = vst [vmem:[#allocation30_spill] sm:$0xff] %v9704_v38  ;;  %v1969_v38 = vadd.f32 %v11200_v26, %v11199_v14  ;;  %v11201_v3 = vld [vmem:[#allocation25_spill] sm:$0xff]  ;;  %v11208_v14 = vld [vmem:[#allocation28_spill] sm:$0xff]  ;;  %v2296_v26 = vadd.f32 %v9513_v56, %v2191_v8  ;;  %v9780_v12 = vmul.f32 %v9601_v29, %v9719_v44 }
 0x196   : > { %11195 = vst [vmem:[#allocation51_spill] sm:$0xff] %v9716_v0  ;;  %11197 = vst [vmem:[#allocation22_spill] sm:$0xff] %v9719_v44  ;;  %v1983_v23 = vadd.f32 %v11202_v45, %v11201_v3  ;;  %v9730_v50 = vpop.f32.mrf.mxu0  ;;  %v9732_v0 = vpop.f32.mrf.mxu1  ;;  %v9746_v45 = vmul.f32 %v9447_v16, %v9505_v1  ;;  %v11212_v8 = vld [vmem:[#allocation29_spill] sm:$0xff]  ;;  %v9784_v31 = vmul.f32 %v9719_v44, %v9606_v37 }
 0x197   : > { %11203 = vst [vmem:[#allocation21_spill] sm:$0xff] %v9730_v50  ;;  %11204 = vst [vmem:[#allocation23_spill] sm:$0xff] %v9732_v0  ;;  %v2072_v52 = vadd.f32 %v11208_v14, %v1969_v38  ;;  %v3124_v38 = vmul.f32 %v9601_v29, %v11198_v10  ;;  %v11211_v14 = vld [vmem:[#allocation31_spill] sm:$0xff] }
 0x198   : > { %11205 = vst [vmem:[#allocation24_spill] sm:$0xff] %v9742_v36  ;;  %11206 = vst [vmem:[#allocation25_spill] sm:$0xff] %v9746_v45  ;;  %v2088_v3 = vadd.f32 %v11209_v19, %v1983_v23  ;;  %v9755_v50 = vpop.f32.mrf.mxu0  ;;  %v9757_v0 = vpop.f32.mrf.mxu1  ;;  %v9761_v36 = vmul.f32 %v9667_v17, %v9435_v20  ;;  %v3074_v45 = vmul.f32 %v9719_v44, %v9657_v41 }
 0x199   : > { %11207 = vst [vmem:[#allocation27_spill] sm:$0xff] %v9750_v47  ;;  %v2175_v23 = vadd.f32 %v11211_v14, %v2072_v52  ;;  %v2282_v19 = vadd.f32 %v9486_v54, %v11212_v8  ;;  %v9772_v47 = vadd.f32 %v9553_v60, %v2296_v26  ;;  %v9792_v54 = vmul.f32 %v11198_v10, %v9657_v41 }
 0x19a   : > { %11210 = vst [vmem:[#allocation28_spill] sm:$0xff] %v9761_v36  ;;  %v2193_v56 = vadd.f32 %v9484_v21, %v2088_v3  ;;  %v9774_v20 = vpop.f32.mrf.mxu0  ;;  %v9776_v24 = vpop.f32.mrf.mxu1  ;;  %v9788_v21 = vmul.f32 %v11198_v10, %v9606_v37  ;;  %v9805_v14 = vmul.f32 %v9719_v44, %v11186_v11  ;;  %v3076_v8 = vadd.f32 %v3074_v45, %v3072_v28 }
 0x19b   : > { %11213 = vst [vmem:[#allocation32_spill] sm:$0xff] %v9792_v54  ;;  %v2284_v60 = vadd.f32 %v9490_v32, %v2175_v23  ;;  %v9796_v15 = vadd.f32 %v9507_v49, %v2282_v19  ;;  %v9809_v36 = vmul.f32 %v9526_v53, %v9497_v57  ;;  %v9813_v32 = vmul.f32 %v9494_v7, %v9526_v53 }
 0x19c   : > { %v2298_v52 = vadd.f32 %v9522_v6, %v2193_v56  ;;  %v9799_v3 = vpop.f32.mrf.mxu0  ;;  %v9801_v26 = vpop.f32.mrf.mxu1  ;;  %11215 = vst [vmem:[#allocation29_spill] sm:$0xff] %v9805_v14  ;;  %v9817_v49 = vmul.f32 %v9526_v53, %v9667_v17  ;;  %v3100_v45 = vmul.f32 %v9772_v47, %v11186_v11  ;;  %v3111_v19 = vmul.f32 %v9534_v22, %v9667_v17 }
 0x19d   : > { %11214 = vst [vmem:[#allocation31_spill] sm:$0xff] %v9796_v15  ;;  %11216 = vst [vmem:[#allocation52_spill] sm:$0xff] %v9809_v36  ;;  %v9820_v6 = vadd.f32 %v9515_v34, %v2284_v60  ;;  %v9835_v54 = vmul.f32 %v9534_v22, %v9497_v57  ;;  %v3125_v34 = vmul.f32 %v9528_v18, %v9505_v1 }
 0x19e   : > { %11217 = vst [vmem:[#allocation53_spill] sm:$0xff] %v9813_v32  ;;  %11218 = vst [vmem:[#allocation54_spill] sm:$0xff] %v9817_v49  ;;  %v9823_v23 = vadd.f32 %v9568_v62, %v2298_v52  ;;  %v9825_v56 = vpop.f32.mrf.mxu0  ;;  %v9827_v28 = vpop.f32.mrf.mxu1  ;;  %v9841_v62 = vmul.f32 %v9494_v7, %v9534_v22  ;;  %v9845_v60 = vmul.f32 %v9534_v22, %v9447_v16 }
 0x19f   : > { %11219 = vst [vmem:[#allocation55_spill] sm:$0xff] %v9835_v54  ;;  %v3108_v14 = vmul.f32 %v9796_v15, %v11198_v10  ;;  %v3078_v32 = vmul.f32 %v9772_v47, %v9796_v15  ;;  %v3126_v57 = vmul.f32 %v9772_v47, %v9606_v37  ;;  %v9859_v7 = vmul.f32 %v9796_v15, %v9590_v9 }
 0x1a0   : > { %11220 = vst [vmem:[#allocation56_spill] sm:$0xff] %v9841_v62  ;;  %11221 = vst [vmem:[#allocation57_spill] sm:$0xff] %v9845_v60  ;;  %v9847_v52 = vpop.f32.mrf.mxu1  ;;  %v9849_v49 = vpop.f32.mrf.mxu0  ;;  %v3079_v62 = vsub.f32 %v3075_v51, %v9550_v4  ;;  %v3081_v60 = vmul.f32 %v9544_v5, %v9534_v22  ;;  %v9866_v17 = vmul.f32 %v9587_v13, %v9796_v15 }
 0x1a1   : > { %11222 = vst [vmem:[#allocation58_spill] sm:$0xff] %v9859_v7  ;;  %v9870_v16 = vmul.f32 %v9796_v15, %v9719_v44  ;;  %v3102_v53 = vsub.f32 %v9663_v61, %v3100_v45  ;;  %v3104_v7 = vmul.f32 %v9823_v23, %v9657_v41  ;;  %v9879_v4 = vmul.f32 %v9820_v6, %v9719_v44 }
 0x1a2   : > { %11223 = vst [vmem:[#allocation59_spill] sm:$0xff] %v9866_v17  ;;  %v9872_v54 = vpop.f32.mrf.mxu1  ;;  %v2914_v36 = vpop.f32.mrf.mxu0  ;;  %v3155_v51 = vmul.f32 %v9544_v5, %v9505_v1  ;;  %v9885_v17 = vmul.f32 %v9820_v6, %v9590_v9  ;;  %v9889_v22 = vmul.f32 %v9587_v13, %v9820_v6  ;;  %v9893_v61 = vmul.f32 %v9820_v6, %v11198_v10 }
 0x1a3   : > { %11224 = vst [vmem:[#allocation60_spill] sm:$0xff] %v9870_v16  ;;  %v3127_v16 = vadd.f32 %v3125_v34, %v3123_v40  ;;  %v3080_v44 = vsub.f32 %v3076_v8, %v3078_v32  ;;  %v3082_v41 = vmul.f32 %v9823_v23, %v9820_v6  ;;  %v3156_v1 = vmul.f32 %v9823_v23, %v9606_v37 }
 0x1a4   : > { %11225 = vst [vmem:[#allocation61_spill] sm:$0xff] %v9885_v17  ;;  %11226 = vst [vmem:[#allocation62_spill] sm:$0xff] %v9889_v22  ;;  %v2830_v45 = vpop.f32.mrf.mxu1  ;;  %v2919_v15 = vpop.f32.mrf.mxu0  ;;  %v3128_v9 = vadd.f32 %v3126_v57, %v3124_v38  ;;  %v9899_v17 = vsub.f32 %v3079_v62, %v3081_v60  ;;  %v9903_v40 = vmul.f32 %v9502_v39, %v9544_v5 }
 0x1a5   : > { %11227 = vst [vmem:[#allocation63_spill] sm:$0xff] %v9893_v61  ;;  %v9907_v34 = vmul.f32 %v9502_v39, %v9528_v18  ;;  %v9911_v8 = vmul.f32 %v9528_v18, %v9542_v43  ;;  %v3106_v61 = vsub.f32 %v3102_v53, %v3104_v7  ;;  %v9914_v13 = vadd.f32 %v3155_v51, %v9738_v2 }
 0x1a6   : > { %v2921_v32 = vpop.f32.mrf.mxu0  ;;  %v3009_v22 = vpop.f32.mrf.mxu1  ;;  %v3214_v57 = vmul.f32 %v9601_v29, %v9823_v23  ;;  %v3184_v38 = vmul.f32 %v9601_v29, %v9772_v47  ;;  %v2598_v62 = vadd.f32 %v9576_v63, %v9536_v30  ;;  %v2600_v60 = vadd.f32 %v9596_v48, %v9555_v35  ;;  %v11229_v63 = vld [vmem:[#allocation10_spill] sm:$0xff] }
 0x1a7   : > { %11228 = vst [vmem:[#allocation64_spill] sm:$0xff] %v9911_v8  ;;  %v2612_v8 = vadd.f32 %v9643_v59, %v9594_v55  ;;  %v9927_v7 = vadd.f32 %v9681_v58, %v3127_v16  ;;  %v9929_v51 = vsub.f32 %v3080_v44, %v3082_v41  ;;  %v9932_v39 = vadd.f32 %v3111_v19, %v9598_v25  ;;  %v11230_v55 = vld [vmem:[#allocation15_spill] sm:$0xff]  ;;  %v11231_v44 = vld [vmem:[#allocation20_spill] sm:$0xff] }
 0x1a8   : > { %v2926_v53 = vpop.f32.mrf.mxu0  ;;  %v3011_v2 = vpop.f32.mrf.mxu1  ;;  %v9935_v37 = vadd.f32 %v3156_v1, %v9780_v12  ;;  %v9938_v30 = vadd.f32 %v9690_v27, %v3128_v9  ;;  %v2605_v35 = vadd.f32 %v9611_v33, %v9570_v46  ;;  %v2614_v16 = vadd.f32 %v11229_v63, %v9609_v42  ;;  %v11232_v27 = vld [vmem:[#allocation8_spill] sm:$0xff]  ;;  %v11234_v12 = vld [vmem:[#allocation23_spill] sm:$0xff] }
 0x1a9   : > { %v2700_v48 = vadd.f32 %v11230_v55, %v2598_v62  ;;  %v2716_v59 = vadd.f32 %v9755_v50, %v2612_v8  ;;  %v2702_v41 = vadd.f32 %v11231_v44, %v2600_v60  ;;  %v3110_v19 = vadd.f32 %v3108_v14, %v3106_v61  ;;  %v11233_v46 = vld [vmem:[#allocation12_spill] sm:$0xff]  ;;  %v11235_v8 = vld [vmem:[#allocation41_spill] sm:$0xff]  ;;  %v11238_v14 = vld [vmem:[#allocation26_spill] sm:$0xff] }
 0x1aa   : > { %v2928_v25 = vpop.f32.mrf.mxu0  ;;  %v3016_v58 = vpop.f32.mrf.mxu1  ;;  %v9948_v1 = vadd.f32 %v9784_v31, %v3214_v57  ;;  %v9951_v9 = vadd.f32 %v9788_v21, %v3184_v38  ;;  %v2619_v33 = vadd.f32 %v11233_v46, %v11232_v27  ;;  %v2718_v62 = vadd.f32 %v9774_v20, %v2614_v16  ;;  %v11236_v60 = vld [vmem:[#allocation9_spill] sm:$0xff]  ;;  %v11239_v31 = vld [vmem:[#allocation30_spill] sm:$0xff] }
 0x1ab   : > { %v2802_v42 = vadd.f32 %v11234_v12, %v2700_v48  ;;  %v2820_v50 = vadd.f32 %v9827_v28, %v2716_v59  ;;  %v2607_v63 = vadd.f32 %v11236_v60, %v11235_v8  ;;  %v11237_v55 = vld [vmem:[#allocation5_spill] sm:$0xff]  ;;  %v2708_v57 = vadd.f32 %v11239_v31, %v2605_v35 }
 0x1ac   : > { %v2621_v61 = vadd.f32 %v11238_v14, %v11237_v55  ;;  %v2804_v21 = vadd.f32 %v9757_v0, %v2702_v41  ;;  %v2933_v38 = vpop.f32.mrf.mxu0  ;;  %v3018_v44 = vpop.f32.mrf.mxu1  ;;  %v2724_v27 = vadd.f32 %v9799_v3, %v2619_v33  ;;  %v2822_v48 = vadd.f32 %v9847_v52, %v2718_v62  ;;  %v11240_v28 = vld [vmem:[#allocation21_spill] sm:$0xff] }
 0x1ad   : > { %v2913_v20 = vadd.f32 %v9849_v49, %v2802_v42  ;;  %v2927_v16 = vadd.f32 %v2926_v53, %v2820_v50  ;;  %v2710_v59 = vadd.f32 %v11240_v28, %v2607_v63  ;;  %v2811_v46 = vadd.f32 %v9776_v24, %v2708_v57 }
 0x1ae   : > { %v2726_v12 = vadd.f32 %v9825_v56, %v2621_v61  ;;  %v2915_v8 = vadd.f32 %v2914_v36, %v2804_v21  ;;  %v3023_v60 = vpop.f32.mrf.mxu1  ;;  %v2829_v35 = vadd.f32 %v9872_v54, %v2724_v27  ;;  %v2929_v41 = vadd.f32 %v2928_v25, %v2822_v48  ;;  %v2935_v55 = vpop.f32.mrf.mxu0  ;;  %v11241_v54 = vld [vmem:[#allocation14_spill] sm:$0xff] }
 0x1af   : > { %v9971_v0 = vadd.f32 %v3009_v22, %v2913_v20  ;;  %v9973_v3 = vadd.f32 %v3023_v60, %v2927_v16  ;;  %v2813_v52 = vadd.f32 %v9801_v26, %v2710_v59  ;;  %v2920_v53 = vadd.f32 %v2919_v15, %v2811_v46  ;;  %v11242_v20 = vld [vmem:[#allocation13_spill] sm:$0xff] }
 0x1b0   : > { %v2831_v49 = vadd.f32 %v2830_v45, %v2726_v12  ;;  %v9976_v33 = vadd.f32 %v3011_v2, %v2915_v8  ;;  %v3025_v42 = vpop.f32.mrf.mxu1  ;;  %v2934_v24 = vadd.f32 %v2933_v38, %v2829_v35  ;;  %v11244_v8 = vld [vmem:[#allocation37_spill] sm:$0xff] }
 0x1b1   : > { %v9978_v62 = vadd.f32 %v3025_v42, %v2929_v41  ;;  %v3085_v36 = vmul.f32 %v9973_v3, %v9971_v0  ;;  %v3159_v22 = vmul.f32 %v9973_v3, %v11241_v54  ;;  %v2922_v56 = vadd.f32 %v2921_v32, %v2813_v52  ;;  %v11245_v52 = vld [vmem:[#allocation49_spill] sm:$0xff] }
 0x1b2   : > { %v9984_v25 = vadd.f32 %v3016_v58, %v2920_v53  ;;  %v2936_v50 = vadd.f32 %v2935_v55, %v2831_v49  ;;  %v3030_v63 = vpop.f32.mrf.mxu1  ;;  %v3133_v15 = vmul.f32 %v9973_v3, %v9542_v43  ;;  %v3114_v58 = vadd.f32 %v9879_v4, %v3110_v19  ;;  %v11243_v19 = vld [vmem:[#allocation18_spill] sm:$0xff]  ;;  %v11246_v53 = vld [vmem:[#allocation31_spill] sm:$0xff] }
 0x1b3   : > { %v9988_v26 = vadd.f32 %v3030_v63, %v2934_v24  ;;  %v3115_v45 = vmul.f32 %v9978_v62, %v9971_v0  ;;  %v3087_v2 = vsub.f32 %v9899_v17, %v3085_v36  ;;  %v3089_v14 = vmul.f32 %v9978_v62, %v9976_v33  ;;  %v11247_v36 = vld [vmem:[#allocation24_spill] sm:$0xff] }
 0x1b4   : > { %v9995_v61 = vadd.f32 %v3018_v44, %v2922_v56  ;;  %v3032_v32 = vpop.f32.mrf.mxu1  ;;  %v3119_v31 = vmul.f32 %v9973_v3, %v9976_v33  ;;  %v3161_v57 = vadd.f32 %v3159_v22, %v9914_v13  ;;  %v3135_v27 = vsub.f32 %v9927_v7, %v3133_v15  ;;  %v11248_v63 = vld [vmem:[#allocation52_spill] sm:$0xff] }
 0x1b5   : > { %v10001_v21 = vadd.f32 %v3032_v32, %v2936_v50  ;;  %v3086_v38 = vmul.f32 %v9988_v26, %v9984_v25  ;;  %v3117_v17 = vsub.f32 %v9932_v39, %v3115_v45  ;;  %v3091_v48 = vsub.f32 %v3087_v2, %v3089_v14  ;;  %v11249_v2 = vld [vmem:[#allocation55_spill] sm:$0xff] }
 0x1b6   : > { %v3160_v44 = vmul.f32 %v9988_v26, %v11186_v11  ;;  %v3134_v4 = vmul.f32 %v9988_v26, %v11242_v20  ;;  %v3165_v16 = vadd.f32 %v11243_v19, %v3161_v57  ;;  %v3120_v7 = vmul.f32 %v9988_v26, %v9995_v61  ;;  %v11250_v32 = vld [vmem:[#allocation19_spill] sm:$0xff]  ;;  %v11251_v57 = vld [vmem:[#allocation58_spill] sm:$0xff] }
 0x1b7   : > { %v3116_v13 = vmul.f32 %v10001_v21, %v9984_v25  ;;  %v3088_v28 = vsub.f32 %v9929_v51, %v3086_v38  ;;  %v3090_v59 = vmul.f32 %v10001_v21, %v9995_v61  ;;  %v3121_v39 = vsub.f32 %v3117_v17, %v3119_v31  ;;  %v11252_v17 = vld [vmem:[#allocation25_spill] sm:$0xff] }
 0x1b8   : > { %v10019_v46 = vand.u32 4294901760, %v3091_v48  ;;  %v3162_v12 = vadd.f32 %v3160_v44, %v9935_v37  ;;  %v3167_v60 = vmul.f32 %v9978_v62, %v11244_v8  ;;  %v3136_v51 = vsub.f32 %v9938_v30, %v3134_v4 }
 0x1b9   : > { %v3118_v35 = vsub.f32 %v3114_v58, %v3116_v13  ;;  %v3092_v41 = vsub.f32 %v3088_v28, %v3090_v59  ;;  %v10024_v55 = vand.u32 4294901760, %v3121_v39  ;;  %v3168_v42 = vmul.f32 %v10001_v21, %v11246_v53 }
 0x1ba   : > { %v3166_v49 = vadd.f32 %v11245_v52, %v3162_v12  ;;  %v3169_v24 = vsub.f32 %v3165_v16, %v3167_v60  ;;  %v10032_v22 = vadd.f32 %v11247_v36, %v9903_v40  ;;  %v3139_v15 = vsub.f32 %v3135_v27, %v11248_v63  ;;  %v11253_v27 = vld [vmem:[#allocation61_spill] sm:$0xff]  ;;  %v11255_v36 = vld [vmem:[#allocation22_spill] sm:$0xff]  ;;  %v11256_v63 = vld [vmem:[#allocation51_spill] sm:$0xff] }
 0x1bb   : > { %v3122_v37 = vsub.f32 %v3118_v35, %v3120_v7  ;;  %v10034_v56 = vand.u32 4294901760, %v3092_v41  ;;  %v10037_v50 = vsub.f32 %v3121_v39, %v10024_v55  ;;  %v10041_v30 = vsub.f32 %v3091_v48, %v10019_v46 }
 0x1bc   : > { %v3170_v45 = vsub.f32 %v3166_v49, %v3168_v42  ;;  %v3173_v14 = vsub.f32 %v3169_v24, %v11249_v2  ;;  %v3175_v58 = vmul.f32 %v9971_v0, %v11250_v32  ;;  %v3140_v38 = vsub.f32 %v3136_v51, %v11251_v57  ;;  %v11254_v51 = vld [vmem:[#allocation38_spill] sm:$0xff]  ;;  %v11257_v2 = vld [vmem:[#allocation47_spill] sm:$0xff] }
 0x1bd   : > { %v10046_v31 = vand.u32 4294901760, %v3122_v37  ;;  %v10049_v40 = vsub.f32 %v3092_v41, %v10034_v56  ;;  %v10054_v44 = vadd.f32 %v11252_v17, %v9907_v34  ;;  %v3176_v4 = vmul.f32 %v9984_v25, %v11198_v10 }
 0x1be   : > { %v3174_v48 = vsub.f32 %v3170_v45, %v11253_v27  ;;  %v3177_v19 = vsub.f32 %v3173_v14, %v3175_v58  ;;  %v3179_v16 = vmul.f32 %v9976_v33, %v9528_v18  ;;  %v11105_v59 = vand.u32 4294901760, %v10037_v50  ;;  %v11258_v14 = vld [vmem:[#allocation46_spill] sm:$0xff]  ;;  %v11263_v45 = vld [vmem:[#allocation17_spill] sm:$0xff] }
 0x1bf   : > { %3340 = vmatprep.subr.mxu0 %v10046_v31  ;;  %v3431_v13 = vsub.f32 %v3122_v37, %v10046_v31  ;;  %v11106_v28 = vand.u32 4294901760, %v10049_v40  ;;  %v3142_v34 = vmul.f32 %v10001_v21, %v9820_v6  ;;  %v11107_v39 = vand.u32 4294901760, %v10041_v30  ;;  %v11259_v58 = vld [vmem:[#allocation6_spill] sm:$0xff] }
 0x1c0   : > { %3342 = vmatpush1.msra.mxu0 %v10034_v56  ;;  %v3178_v7 = vsub.f32 %v3174_v48, %v3176_v4  ;;  %v10069_v12 = vsub.f32 %v3177_v19, %v3179_v16  ;;  %v10073_v60 = vmul.f32 %v9823_v23, %v11186_v11  ;;  %v3141_v52 = vmul.f32 %v9978_v62, %v11254_v51 }
 0x1c1   : > { %3344 = vmatprep.subr.mxu0 %v10024_v55  ;;  %v3432_v35 = vand.u32 4294901760, %v3431_v13  ;;  %v3144_v41 = vadd.f32 %v3142_v34, %v3140_v38  ;;  %v10080_v49 = vmul.f32 %v9772_v47, %v11242_v20  ;;  %v3439_v42 = vsub.f32 %v10049_v40, %v11106_v28 }
 0x1c2   : > { %3346 = vmatpush1.msra.mxu0 %v10019_v46  ;;  %v3180_v24 = vmul.f32 %v9995_v61, %v9772_v47  ;;  %v3146_v37 = vmul.f32 %v9984_v25, %v11255_v36  ;;  %v11260_v57 = vsub.f32 %v11258_v14, %v11259_v58  ;;  %v3445_v27 = vsub.f32 %v10037_v50, %v11105_v59 }
 0x1c3   : > { %3385 = vmatmul.mubr.f32.vlgmr.msra.gmra.mxu0 %v11257_v2  ;;  %3531 = vmatprep.subr.mxu0 %v3431_v13  ;;  %v3433_v17 = vsub.f32 %v3431_v13, %v3432_v35  ;;  %v3143_v48 = vadd.f32 %v3141_v52, %v3139_v15  ;;  %v11262_v4 = vmov 0.0   ;;  %v3451_v19 = vsub.f32 %v10041_v30, %v11107_v39  ;;  %v11264_v52 = vld [vmem:[#allocation48_spill] sm:$0xff] }
 0x1c4   : > { %v10096_v38 = vand.u32 4294901760, %v11260_v57  ;;  %3534 = vmatpush1.msra.mxu0 %v10049_v40  ;;  %3390 = vmatprep.mubr.f32.mxu0 %v11262_v4  ;;  %v3182_v16 = vsub.f32 %v3178_v7, %v3180_v24  ;;  %v10108_v34 = vmul.f32 %v9823_v23, %v11246_v53  ;;  %v3148_v57 = vadd.f32 %v3146_v37, %v3144_v41 }
 0x1c5   : > { %3537 = vmatprep.subr.mxu0 %v10037_v50  ;;  %v3434_v13 = vand.u32 4294901760, %v3433_v17  ;;  %v3145_v15 = vmul.f32 %v9971_v0, %v11263_v45  ;;  %v3191_v59 = vsub.f32 %v10054_v44, %v11264_v52  ;;  %v3440_v28 = vand.u32 4294901760, %v3439_v42 }
 0x1c6   : > { %11261 = vst [vmem:[#allocation10_spill] sm:$0xff] %v10096_v38  ;;  %3540 = vmatpush1.msra.mxu0 %v10041_v30  ;;  %v3150_v7 = vmul.f32 %v9995_v61, %v9823_v23  ;;  %v10120_v24 = vmul.f32 %v9772_v47, %v9820_v6  ;;  %v10124_v17 = vmul.f32 %v9544_v5, %v11241_v54  ;;  %v3446_v41 = vand.u32 4294901760, %v3445_v27 }
 0x1c7   : > { %3396 = vmatmul.mubr.f32.gmra.mxu0 %v10096_v38  ;;  %3435 = vmatprep.subr.mxu1 %v3434_v13  ;;  %v3147_v37 = vadd.f32 %v3145_v15, %v3143_v48  ;;  %v3219_v44 = vmul.f32 %v9978_v62, %v11241_v54  ;;  %v3193_v42 = vmul.f32 %v9978_v62, %v9542_v43  ;;  %v3452_v52 = vand.u32 4294901760, %v3451_v19  ;;  %v11266_v48 = vld [vmem:[#allocation45_spill] sm:$0xff]  ;;  %v11267_v19 = vld [vmem:[#allocation34_spill] sm:$0xff]  ;;  %v11270_v15 = vld [vmem:[#allocation16_spill] sm:$0xff] }
 0x1c8   : > { %3708 = vmatprep.subr.mxu0 %v3432_v35  ;;  %3441 = vmatpush1.msra.mxu1 %v3440_v28  ;;  %v10131_v39 = vand.u32 4294901760, %v3182_v16  ;;  %v3149_v45 = vmul.f32 %v9976_v33, %v9544_v5  ;;  %v10137_v32 = vmul.f32 %v9971_v0, %v9528_v18  ;;  %v3152_v27 = vadd.f32 %v3150_v7, %v3148_v57  ;;  %v11268_v57 = vld [vmem:[#allocation39_spill] sm:$0xff] }
 0x1c9   : > { %3447 = vmatprep.subr.mxu1 %v3446_v41  ;;  %3573 = vmatprep.mubr.f32.mxu0 %v11262_v4  ;;  %v3220_v54 = vmul.f32 %v10001_v21, %v11186_v11  ;;  %v3221_v43 = vsub.f32 %v10032_v22, %v3219_v44  ;;  %v10145_v28 = vmul.f32 %v9984_v25, %v9772_v47  ;;  %v11269_v11 = vld [vmem:[#allocation42_spill] sm:$0xff]  ;;  %v11280_v38 = vld [vmem:[#allocation43_spill] sm:$0xff] }
 0x1ca   : > { %11265 = vst [vmem:[#allocation15_spill] sm:$0xff] %v10137_v32  ;;  %3453 = vmatpush1.msra.mxu1 %v3452_v52  ;;  %v3227_v35 = vmul.f32 %v9973_v3, %v11244_v8  ;;  %v10151_v18 = vmul.f32 %v9984_v25, %v11266_v48  ;;  %v10155_v13 = vmul.f32 %v9971_v0, %v11267_v19  ;;  %v11271_v8 = vand.u32 4294901760, %v10049_v40  ;;  %v11272_v52 = vld [vmem:[#allocation4_spill] sm:$0xff] }
 0x1cb   : > { %3488 = vmatmul.mubr.f32.vlgmr.msra.gmra.mxu1 %v11268_v57  ;;  %3576 = vmatmul.mubr.f32.vlgmr.msra.gmra.mxu0 %v11269_v11  ;;  %v3151_v22 = vadd.f32 %v3149_v45, %v3147_v37  ;;  %v3225_v7 = vsub.f32 %v3221_v43, %v11270_v15  ;;  %v3195_v47 = vadd.f32 %v3193_v42, %v3191_v59  ;;  %v11273_v45 = vand.u32 4294901760, %v10037_v50  ;;  %v11274_v42 = vld [vmem:[#allocation53_spill] sm:$0xff]  ;;  %v11277_v50 = vld [vmem:[#allocation36_spill] sm:$0xff] }
 0x1cc   : > { %3619 = vmatprep.subr.mxu1 %v10046_v31  ;;  %3712 = vmatpush1.msra.mxu0 %v11271_v8  ;;  %v10164_v41 = vsub.f32 %v3182_v16, %v10131_v39  ;;  %v3274_v44 = vmul.f32 %v9601_v29, %v10001_v21  ;;  %v3276_v36 = vmul.f32 %v9988_v26, %v11272_v52  ;;  %v10173_v59 = vand.u32 4294901760, %v3152_v27  ;;  %v11276_v8 = vld [vmem:[#allocation44_spill] sm:$0xff] }
 0x1cd   : > { %3621 = vmatpush1.msra.mxu1 %v10034_v56  ;;  %3716 = vmatprep.subr.mxu0 %v11273_v45  ;;  %v3222_v37 = vsub.f32 %v9948_v1, %v3220_v54  ;;  %v3229_v40 = vadd.f32 %v3227_v35, %v3225_v7  ;;  %v10177_v43 = vadd.f32 %v11274_v42, %v3195_v47  ;;  %v11275_v16 = vand.u32 4294901760, %v10041_v30  ;;  %v11278_v35 = vld [vmem:[#allocation56_spill] sm:$0xff]  ;;  %v11279_v42 = vld [vmem:[#allocation35_spill] sm:$0xff] }
 0x1ce   : > { %3623 = vmatprep.subr.mxu1 %v10024_v55  ;;  %v3278_v15 = vadd.f32 %v3276_v36, %v3274_v44  ;;  %v10184_v11 = vmul.f32 %v11276_v8, %v9984_v25  ;;  %v3275_v45 = vmul.f32 %v9973_v3, %v11277_v50  ;;  %3493 = vmatprep.mubr.f32.mxu1 %v11262_v4  ;;  %v10191_v1 = vand.u32 4294901760, %v10069_v12 }
 0x1cf   : > { %3720 = vmatpush1.msra.mxu0 %v11275_v16  ;;  %3581 = vmatprep.mubr.f32.mxu0 %v11262_v4  ;;  %v10193_v54 = vand.u32 4294901760, %v3151_v22  ;;  %v10196_v30 = vadd.f32 %v11278_v35, %v3229_v40  ;;  %v3244_v36 = vmul.f32 %v9601_v29, %v9988_v26  ;;  %v3246_v44 = vmul.f32 %v10001_v21, %v11272_v52  ;;  %v11281_v40 = vld [vmem:[#allocation50_spill] sm:$0xff] }
 0x1d0   : > { %3625 = vmatpush1.msra.mxu1 %v10019_v46  ;;  %3880 = vmatprep.subr.mxu0 %v10131_v39  ;;  %v3282_v47 = vsub.f32 %v3278_v15, %v10073_v60  ;;  %v3273_v16 = vmul.f32 %v11279_v42, %v9978_v62  ;;  %v10211_v29 = vsub.f32 %v3152_v27, %v10173_v59  ;;  %v11282_v7 = vand.u32 4294901760, %v10164_v41 }
 0x1d1   : > { %3495 = vmatmul.mubr.f32.gmra.mxu1 %v11280_v38  ;;  %3584 = vmatmul.mubr.f32.gmra.mxu0 %v11258_v14  ;;  %v3226_v35 = vsub.f32 %v3222_v37, %v11281_v40  ;;  %v3228_v60 = vmul.f32 %v9988_v26, %v11246_v53  ;;  %v3248_v15 = vadd.f32 %v3246_v44, %v3244_v36  ;;  %v11283_v14 = vld [vmem:[#allocation60_spill] sm:$0xff]  ;;  %v11285_v44 = vld [vmem:[#allocation7_spill] sm:$0xff] }
 0x1d2   : > { %3797 = vmatprep.subr.mxu1 %v10046_v31  ;;  %3658 = vmatprep.mubr.f32.mxu1 %v11262_v4  ;;  %v3286_v52 = vadd.f32 %v10080_v49, %v3282_v47  ;;  %v10223_v27 = vsub.f32 %v3151_v22, %v10193_v54  ;;  %v10227_v37 = vsub.f32 %v10069_v12, %v10191_v1  ;;  %v11284_v47 = vld [vmem:[#allocation29_spill] sm:$0xff]  ;;  %v3978_v12 = vand.u32 4294901760, %v10211_v29 }
 0x1d3   : > { %3753 = vmatprep.mubr.f32.mxu0 %v11262_v4  ;;  %v3194_v31 = vmul.f32 %v10001_v21, %v11242_v20  ;;  %v3277_v40 = vadd.f32 %v3275_v45, %v3273_v16  ;;  %v3973_v53 = vsub.f32 %v10164_v41, %v11282_v7  ;;  %v3300_v36 = vmul.f32 %v11276_v8, %v9995_v61  ;;  %v11287_v45 = vld [vmem:[#allocation32_spill] sm:$0xff] }
 0x1d4   : > { %v3290_v49 = vadd.f32 %v11283_v14, %v3286_v52  ;;  %v3252_v22 = vadd.f32 %v11284_v47, %v3248_v15  ;;  %v3230_v32 = vadd.f32 %v3228_v60, %v3226_v35  ;;  %v3245_v20 = vmul.f32 %v9978_v62, %v11277_v50  ;;  %v11286_v14 = vld [vmem:[#allocation63_spill] sm:$0xff]  ;;  %v11289_v52 = vld [vmem:[#allocation64_spill] sm:$0xff] }
 0x1d5   : > { %3662 = vmatmul.mubr.f32.vlgmr.msra.gmra.mxu1 %v11285_v44  ;;  %3755 = vmatmul.mubr.f32.vlgmr.msra.gmra.mxu0 %v11268_v57  ;;  %v3281_v21 = vsub.f32 %v3277_v40, %v10124_v17  ;;  %v3270_v16 = vmul.f32 %v9995_v61, %v11266_v48  ;;  %v3984_v17 = vand.u32 4294901760, %v10227_v37  ;;  %v3990_v35 = vand.u32 4294901760, %v10223_v27 }
 0x1d6   : > { %3799 = vmatpush1.msra.mxu1 %v10034_v56  ;;  %3882 = vmatpush1.msra.mxu0 %v10173_v59  ;;  %v3294_v8 = vsub.f32 %v3290_v49, %v11286_v14  ;;  %v3256_v7 = vsub.f32 %v3252_v22, %v11287_v45  ;;  %v11288_v62 = vsub.f32 %v9951_v9, %v11256_v63  ;;  %v3974_v48 = vand.u32 4294901760, %v3973_v53  ;;  %v11290_v63 = vld [vmem:[#allocation62_spill] sm:$0xff]  ;;  %v11292_v49 = vld [vmem:[#allocation28_spill] sm:$0xff] }
 0x1d7   : > { %3801 = vmatprep.subr.mxu1 %v10024_v55  ;;  %3884 = vmatprep.subr.mxu0 %v10191_v1  ;;  %v3243_v50 = vmul.f32 %v11279_v42, %v9973_v3  ;;  %v3285_v15 = vadd.f32 %v11289_v52, %v3281_v21  ;;  %v3979_v9 = vsub.f32 %v10211_v29, %v3978_v12  ;;  %v11294_v21 = vld [vmem:[#allocation57_spill] sm:$0xff] }
 0x1d8   : > { %v3196_v56 = vadd.f32 %v3194_v31, %v11288_v62  ;;  %3803 = vmatpush1.msra.mxu1 %v10019_v46  ;;  %3886 = vmatpush1.msra.mxu0 %v10193_v54  ;;  %v3298_v55 = vadd.f32 %v10151_v18, %v3294_v8  ;;  %v3260_v60 = vsub.f32 %v3256_v7, %v10108_v34  ;;  %v11291_v18 = vld [vmem:[#allocation54_spill] sm:$0xff]  ;;  %v11295_v8 = vld [vmem:[#allocation33_spill] sm:$0xff]  ;;  %v11296_v7 = vld [vmem:[#allocation27_spill] sm:$0xff] }
 0x1d9   : > { %3667 = vmatprep.mubr.f32.mxu1 %v11262_v4  ;;  %3760 = vmatprep.mubr.f32.mxu0 %v11262_v4  ;;  %v3234_v42 = vadd.f32 %v11290_v63, %v3230_v32  ;;  %v3247_v46 = vadd.f32 %v3245_v20, %v3243_v50  ;;  %v3289_v40 = vadd.f32 %v11291_v18, %v3285_v15  ;;  %v3980_v50 = vand.u32 4294901760, %v3979_v9 }
 0x1da   : > { %3975 = vmatprep.subr.mxu1 %v3974_v48  ;;  %4071 = vmatprep.subr.mxu0 %v10164_v41  ;;  %v10271_v31 = vadd.f32 %v3300_v36, %v3298_v55  ;;  %v3264_v34 = vadd.f32 %v10120_v24, %v3260_v60  ;;  %v3985_v53 = vsub.f32 %v10227_v37, %v3984_v17  ;;  %v11293_v24 = vld [vmem:[#allocation59_spill] sm:$0xff] }
 0x1db   : > { %3671 = vmatmul.mubr.f32.gmra.mxu1 %v11259_v58  ;;  %3762 = vmatmul.mubr.f32.gmra.mxu0 %v11280_v38  ;;  %v3991_v32 = vsub.f32 %v10223_v27, %v3990_v35  ;;  %v3251_v47 = vadd.f32 %v11292_v49, %v3247_v46  ;;  %v3200_v36 = vadd.f32 %v11293_v24, %v3196_v56  ;;  %v11304_v24 = vld [vmem:[#allocation42_spill] sm:$0xff] }
 0x1dc   : > { %3836 = vmatprep.mubr.f32.mxu1 %v11262_v4  ;;  %3919 = vmatprep.mubr.f32.mxu0 %v11262_v4  ;;  %v3268_v22 = vadd.f32 %v10184_v11, %v3264_v34  ;;  %v3293_v20 = vsub.f32 %v3289_v40, %v11294_v21  ;;  %v3202_v14 = vmul.f32 %v9988_v26, %v9820_v6  ;;  %v3986_v11 = vand.u32 4294901760, %v3985_v53  ;;  %v11297_v26 = vld [vmem:[#allocation11_spill] sm:$0xff] }
 0x1dd   : > { %v3299_v45 = vmul.f32 %v11295_v8, %v9976_v33  ;;  %v3255_v62 = vsub.f32 %v3251_v47, %v11296_v7  ;;  %v3238_v48 = vsub.f32 %v3234_v42, %v10145_v28  ;;  %v3240_v6 = vmul.f32 %v9995_v61, %v11198_v10 }
 0x1de   : > { %v10295_v55 = vadd.f32 %v3270_v16, %v3268_v22  ;;  %v3297_v60 = vadd.f32 %v10155_v13, %v3293_v20  ;;  %v3992_v52 = vand.u32 4294901760, %v3991_v32  ;;  %v3204_v15 = vsub.f32 %v3200_v36, %v3202_v14  ;;  %v11298_v13 = vld [vmem:[#allocation40_spill] sm:$0xff]  ;;  %v11302_v32 = vld [vmem:[#allocation19_spill] sm:$0xff] }
 0x1df   : > { %3838 = vmatmul.mubr.f32.vlgmr.msra.gmra.mxu1 %v11268_v57  ;;  %3925 = vmatmul.mubr.f32.vlgmr.msra.gmra.mxu0 %v11257_v2  ;;  %v3259_v56 = vsub.f32 %v3255_v62, %v11297_v26  ;;  %v3201_v28 = vmul.f32 %v9973_v3, %v11254_v51  ;;  %v3265_v10 = vmul.f32 %v11295_v8, %v9971_v0  ;;  %v11299_v34 = vand.u32 4294901760, %v10164_v41  ;;  %v11305_v36 = vld [vmem:[#allocation15_spill] sm:$0xff] }
 0x1e0   : > { %3981 = vmatpush1.msra.mxu1 %v3980_v50  ;;  %4074 = vmatpush1.msra.mxu0 %v10211_v29  ;;  %v10306_v16 = vadd.f32 %v3299_v45, %v3297_v60  ;;  %v3242_v63 = vsub.f32 %v3238_v48, %v3240_v6  ;;  %v3206_v42 = vmul.f32 %v9984_v25, %v9823_v23  ;;  %v11300_v23 = vld [vmem:[#allocation10_spill] sm:$0xff]  ;;  %v10395_v60 = vand.u32 4294901760, %v10271_v31 }
 0x1e1   : > { %3987 = vmatprep.subr.mxu1 %v3986_v11  ;;  %4077 = vmatprep.subr.mxu0 %v10227_v37  ;;  %v3263_v9 = vadd.f32 %v11298_v13, %v3259_v56  ;;  %v3203_v46 = vsub.f32 %v10177_v43, %v3201_v28  ;;  %v3269_v51 = vmul.f32 %v9976_v33, %v11267_v19  ;;  %v11301_v43 = vld [vmem:[#allocation22_spill] sm:$0xff]  ;;  %v10405_v6 = vand.u32 4294901760, %v10295_v55 }
 0x1e2   : > { %3993 = vmatpush1.msra.mxu1 %v3992_v52  ;;  %4080 = vmatpush1.msra.mxu0 %v10223_v27  ;;  %v3208_v18 = vadd.f32 %v3206_v42, %v3204_v15  ;;  %v3205_v40 = vmul.f32 %v9971_v0, %v9544_v5  ;;  %v10331_v19 = vand.u32 4294901760, %v3242_v63  ;;  %v3210_v41 = vmul.f32 %v9995_v61, %v11301_v43  ;;  %v11303_v0 = vld [vmem:[#allocation17_spill] sm:$0xff] }
 0x1e3   : > { %3843 = vmatprep.mubr.f32.mxu1 %v11262_v4  ;;  %3930 = vmatprep.mubr.f32.mxu0 %v11262_v4  ;;  %v3267_v3 = vadd.f32 %v3265_v10, %v3263_v9  ;;  %v3239_v49 = vmul.f32 %v9976_v33, %v11302_v32  ;;  %v3209_v47 = vmul.f32 %v9976_v33, %v11303_v0  ;;  %v10410_v26 = vand.u32 4294901760, %v10306_v16 }
 0x1e4   : > { %4159 = vmatprep.subr.mxu1 %v10131_v39  ;;  %4248 = vmatprep.subr.mxu0 %v11299_v34  ;;  %v3207_v53 = vadd.f32 %v3205_v40, %v3203_v46  ;;  %v3212_v5 = vadd.f32 %v3210_v41, %v3208_v18  ;;  %v11306_v22 = vsub.f32 %v10196_v30, %v11305_v36 }
 0x1e5   : > { %3845 = vmatmul.mubr.f32.gmra.mxu1 %v11280_v38  ;;  %3936 = vmatmul.mubr.f32.gmra.mxu0 %v11300_v23  ;;  %v10327_v25 = vadd.f32 %v3269_v51, %v3267_v3  ;;  %v4511_v20 = vsub.f32 %v3242_v63, %v10331_v19  ;;  %v5051_v11 = vsub.f32 %v10271_v31, %v10395_v60 }
 0x1e6   : > { %4026 = vmatprep.mubr.f32.mxu1 %v11262_v4  ;;  %4113 = vmatprep.mubr.f32.mxu0 %v11262_v4  ;;  %v3241_v21 = vsub.f32 %v11306_v22, %v3239_v49  ;;  %v3211_v61 = vadd.f32 %v3209_v47, %v3207_v53  ;;  %v10354_v33 = vand.u32 4294901760, %v3212_v5  ;;  %v5057_v52 = vsub.f32 %v10295_v55, %v10405_v6 }
 0x1e7   : > { %v4512_v37 = vand.u32 4294901760, %v4511_v20  ;;  %v10415_v31 = vand.u32 4294901760, %v10327_v25  ;;  %v5052_v56 = vand.u32 4294901760, %v5051_v11  ;;  %v5063_v15 = vsub.f32 %v10306_v16, %v10410_v26 }
 0x1e8   : > { %v10358_v30 = vand.u32 4294901760, %v3241_v21  ;;  %v10362_v29 = vand.u32 4294901760, %v3211_v61  ;;  %v4517_v27 = vsub.f32 %v3212_v5, %v10354_v33  ;;  %v5058_v9 = vand.u32 4294901760, %v5057_v52 }
 0x1e9   : > { %4028 = vmatmul.mubr.f32.vlgmr.msra.gmra.mxu1 %v11268_v57  ;;  %4116 = vmatmul.mubr.f32.vlgmr.msra.gmra.mxu0 %v11304_v24  ;;  %v5069_v28 = vsub.f32 %v10327_v25, %v10415_v31  ;;  %v5053_v13 = vsub.f32 %v5051_v11, %v5052_v56  ;;  %v5064_v55 = vand.u32 4294901760, %v5063_v15 }
 0x1ea   : > { %4161 = vmatpush1.msra.mxu1 %v10173_v59  ;;  %4252 = vmatpush1.msra.mxu0 %v3978_v12  ;;  %v11307_v12 = vld [vmem:[#allocation46_spill] sm:$0xff]  ;;  %v4518_v14 = vand.u32 4294901760, %v4517_v27  ;;  %v5059_v63 = vsub.f32 %v5057_v52, %v5058_v9 }
 0x1eb   : > { %4163 = vmatprep.subr.mxu1 %v10191_v1  ;;  %4256 = vmatprep.subr.mxu0 %v3984_v17  ;;  %v4523_v17 = vsub.f32 %v3241_v21, %v10358_v30  ;;  %v5054_v16 = vand.u32 4294901760, %v5053_v13  ;;  %v5070_v10 = vand.u32 4294901760, %v5069_v28  ;;  %v5065_v42 = vsub.f32 %v5063_v15, %v5064_v55 }
 0x1ec   : > { %4165 = vmatpush1.msra.mxu1 %v10193_v54  ;;  %4260 = vmatpush1.msra.mxu0 %v3990_v35  ;;  %v4529_v35 = vsub.f32 %v3211_v61, %v10362_v29  ;;  %v5060_v3 = vand.u32 4294901760, %v5059_v63 }
 0x1ed   : > { %4033 = vmatprep.mubr.f32.mxu1 %v11262_v4  ;;  %4121 = vmatprep.mubr.f32.mxu0 %v11262_v4  ;;  %v4524_v8 = vand.u32 4294901760, %v4523_v17  ;;  %v5071_v46 = vsub.f32 %v5069_v28, %v5070_v10  ;;  %v5066_v51 = vand.u32 4294901760, %v5065_v42 }
 0x1ee   : > { %4337 = vmatprep.subr.mxu1 %v10131_v39  ;;  %4420 = vmatprep.subr.mxu0 %v10331_v19  ;;  %v4513_v39 = vsub.f32 %v4511_v20, %v4512_v37  ;;  %v4530_v7 = vand.u32 4294901760, %v4529_v35 }
 0x1ef   : > { %4035 = vmatmul.mubr.f32.gmra.mxu1 %v11280_v38  ;;  %4124 = vmatmul.mubr.f32.gmra.mxu0 %v11307_v12  ;;  %v5072_v34 = vand.u32 4294901760, %v5071_v46 }
 0x1f0   : > { %4198 = vmatprep.mubr.f32.mxu1 %v11262_v4  ;;  %4293 = vmatprep.mubr.f32.mxu0 %v11262_v4  ;;  %v4514_v45 = vand.u32 4294901760, %v4513_v39 }
 0x1f3   : > { %4202 = vmatmul.mubr.f32.vlgmr.msra.gmra.mxu1 %v11285_v44  ;;  %4295 = vmatmul.mubr.f32.vlgmr.msra.gmra.mxu0 %v11268_v57 }
 0x1f4   : > { %4339 = vmatpush1.msra.mxu1 %v10173_v59  ;;  %4422 = vmatpush1.msra.mxu0 %v10354_v33  ;;  %v4519_v59 = vsub.f32 %v4517_v27, %v4518_v14 }
 0x1f5   : > { %4341 = vmatprep.subr.mxu1 %v10191_v1  ;;  %4424 = vmatprep.subr.mxu0 %v10358_v30  ;;  %v4525_v1 = vsub.f32 %v4523_v17, %v4524_v8 }
 0x1f6   : > { %4343 = vmatpush1.msra.mxu1 %v10193_v54  ;;  %4426 = vmatpush1.msra.mxu0 %v10362_v29  ;;  %v4531_v54 = vsub.f32 %v4529_v35, %v4530_v7  ;;  %v4520_v62 = vand.u32 4294901760, %v4519_v59 }
 0x1f7   : > { %4207 = vmatprep.mubr.f32.mxu1 %v11262_v4  ;;  %4300 = vmatprep.mubr.f32.mxu0 %v11262_v4  ;;  %v4526_v50 = vand.u32 4294901760, %v4525_v1 }
 0x1f8   : > { %4515 = vmatprep.subr.mxu1 %v4514_v45  ;;  %4611 = vmatprep.subr.mxu0 %v4511_v20  ;;  %v4532_v48 = vand.u32 4294901760, %v4531_v54 }
 0x1f9   : > { %4211 = vmatmul.mubr.f32.gmra.mxu1 %v11259_v58  ;;  %4302 = vmatmul.mubr.f32.gmra.mxu0 %v11280_v38 }
 0x1fa   : > { %4376 = vmatprep.mubr.f32.mxu1 %v11262_v4  ;;  %4459 = vmatprep.mubr.f32.mxu0 %v11262_v4 }
 0x1fd   : > { %4378 = vmatmul.mubr.f32.vlgmr.msra.gmra.mxu1 %v11268_v57  ;;  %4465 = vmatmul.mubr.f32.vlgmr.msra.gmra.mxu0 %v11257_v2 }
 0x1fe   : > { %4521 = vmatpush1.msra.mxu1 %v4520_v62  ;;  %4614 = vmatpush1.msra.mxu0 %v4517_v27 }
 0x1ff   : > { %4527 = vmatprep.subr.mxu1 %v4526_v50  ;;  %4617 = vmatprep.subr.mxu0 %v4523_v17 }
 0x200   : > { %4533 = vmatpush1.msra.mxu1 %v4532_v48  ;;  %4620 = vmatpush1.msra.mxu0 %v4529_v35 }
 0x201   : > { %4383 = vmatprep.mubr.f32.mxu1 %v11262_v4  ;;  %4470 = vmatprep.mubr.f32.mxu0 %v11262_v4 }
 0x202   : > { %4699 = vmatprep.subr.mxu1 %v10331_v19  ;;  %4788 = vmatprep.subr.mxu0 %v4512_v37 }
 0x203   : > { %4385 = vmatmul.mubr.f32.gmra.mxu1 %v11280_v38  ;;  %4476 = vmatmul.mubr.f32.gmra.mxu0 %v11300_v23 }
 0x204   : > { %4566 = vmatprep.mubr.f32.mxu1 %v11262_v4  ;;  %4653 = vmatprep.mubr.f32.mxu0 %v11262_v4 }
 0x207   : > { %4568 = vmatmul.mubr.f32.vlgmr.msra.gmra.mxu1 %v11268_v57  ;;  %4656 = vmatmul.mubr.f32.vlgmr.msra.gmra.mxu0 %v11304_v24 }
 0x208   : > { %4701 = vmatpush1.msra.mxu1 %v10354_v33  ;;  %4792 = vmatpush1.msra.mxu0 %v4518_v14 }
 0x209   : > { %4703 = vmatprep.subr.mxu1 %v10358_v30  ;;  %4796 = vmatprep.subr.mxu0 %v4524_v8 }
 0x20a   : > { %4705 = vmatpush1.msra.mxu1 %v10362_v29  ;;  %4800 = vmatpush1.msra.mxu0 %v4530_v7 }
 0x20b   : > { %4573 = vmatprep.mubr.f32.mxu1 %v11262_v4  ;;  %4661 = vmatprep.mubr.f32.mxu0 %v11262_v4 }
 0x20c   : > { %4877 = vmatprep.subr.mxu1 %v10331_v19  ;;  %4960 = vmatprep.subr.mxu0 %v10395_v60 }
 0x20d   : > { %4575 = vmatmul.mubr.f32.gmra.mxu1 %v11280_v38  ;;  %4664 = vmatmul.mubr.f32.gmra.mxu0 %v11307_v12 }
 0x20e   : > { %4738 = vmatprep.mubr.f32.mxu1 %v11262_v4  ;;  %4833 = vmatprep.mubr.f32.mxu0 %v11262_v4 }
 0x211   : > { %4742 = vmatmul.mubr.f32.vlgmr.msra.gmra.mxu1 %v11285_v44  ;;  %4835 = vmatmul.mubr.f32.vlgmr.msra.gmra.mxu0 %v11268_v57 }
 0x212   : > { %4879 = vmatpush1.msra.mxu1 %v10354_v33  ;;  %4962 = vmatpush1.msra.mxu0 %v10405_v6 }
 0x213   : > { %4881 = vmatprep.subr.mxu1 %v10358_v30  ;;  %4964 = vmatprep.subr.mxu0 %v10410_v26 }
 0x214   : > { %4883 = vmatpush1.msra.mxu1 %v10362_v29  ;;  %4966 = vmatpush1.msra.mxu0 %v10415_v31 }
 0x215   : > { %4747 = vmatprep.mubr.f32.mxu1 %v11262_v4  ;;  %4840 = vmatprep.mubr.f32.mxu0 %v11262_v4 }
 0x216   : > { %5055 = vmatprep.subr.mxu1 %v5054_v16  ;;  %5151 = vmatprep.subr.mxu0 %v5051_v11 }
 0x217   : > { %4751 = vmatmul.mubr.f32.gmra.mxu1 %v11259_v58  ;;  %4842 = vmatmul.mubr.f32.gmra.mxu0 %v11280_v38 }
 0x218   : > { %4916 = vmatprep.mubr.f32.mxu1 %v11262_v4  ;;  %4999 = vmatprep.mubr.f32.mxu0 %v11262_v4 }
 0x21b   : > { %4918 = vmatmul.mubr.f32.vlgmr.msra.gmra.mxu1 %v11268_v57  ;;  %5005 = vmatmul.mubr.f32.vlgmr.msra.gmra.mxu0 %v11257_v2 }
 0x21c   : > { %5061 = vmatpush1.msra.mxu1 %v5060_v3  ;;  %5154 = vmatpush1.msra.mxu0 %v5057_v52 }
 0x21d   : > { %5067 = vmatprep.subr.mxu1 %v5066_v51  ;;  %5157 = vmatprep.subr.mxu0 %v5063_v15 }
 0x21e   : > { %5073 = vmatpush1.msra.mxu1 %v5072_v34  ;;  %5160 = vmatpush1.msra.mxu0 %v5069_v28 }
 0x21f   : > { %4923 = vmatprep.mubr.f32.mxu1 %v11262_v4  ;;  %5010 = vmatprep.mubr.f32.mxu0 %v11262_v4 }
 0x220   : > { %5239 = vmatprep.subr.mxu1 %v10395_v60  ;;  %5328 = vmatprep.subr.mxu0 %v5052_v56 }
 0x221   : > { %4925 = vmatmul.mubr.f32.gmra.mxu1 %v11280_v38  ;;  %5016 = vmatmul.mubr.f32.gmra.mxu0 %v11300_v23 }
 0x222   : > { %5106 = vmatprep.mubr.f32.mxu1 %v11262_v4  ;;  %5193 = vmatprep.mubr.f32.mxu0 %v11262_v4 }
 0x225   : > { %5108 = vmatmul.mubr.f32.vlgmr.msra.gmra.mxu1 %v11268_v57  ;;  %5196 = vmatmul.mubr.f32.vlgmr.msra.gmra.mxu0 %v11304_v24 }
 0x226   : > { %5241 = vmatpush1.msra.mxu1 %v10405_v6  ;;  %5332 = vmatpush1.msra.mxu0 %v5058_v9 }
 0x227   : > { %5243 = vmatprep.subr.mxu1 %v10410_v26  ;;  %5336 = vmatprep.subr.mxu0 %v5064_v55 }
 0x228   : > { %5245 = vmatpush1.msra.mxu1 %v10415_v31  ;;  %5340 = vmatpush1.msra.mxu0 %v5070_v10 }
 0x229   : > { %5113 = vmatprep.mubr.f32.mxu1 %v11262_v4  ;;  %5417 = vmatprep.subr.mxu1 %v10395_v60 }
 0x22a   : > { %5115 = vmatmul.mubr.f32.gmra.mxu1 %v11280_v38  ;;  %5201 = vmatprep.mubr.f32.mxu0 %v11262_v4 }
 0x22b   : > { %5204 = vmatmul.mubr.f32.gmra.mxu0 %v11307_v12  ;;  %5278 = vmatprep.mubr.f32.mxu1 %v11262_v4 }
 0x22c   : > { %5373 = vmatprep.mubr.f32.mxu0 %v11262_v4 }
 0x22e   : > { %5282 = vmatmul.mubr.f32.vlgmr.msra.gmra.mxu1 %v11285_v44 }
 0x22f   : > { %5419 = vmatpush1.msra.mxu1 %v10405_v6  ;;  %5375 = vmatmul.mubr.f32.vlgmr.msra.gmra.mxu0 %v11268_v57 }
 0x230   : > { %5421 = vmatprep.subr.mxu1 %v10410_v26  ;;  %5287 = vmatprep.mubr.f32.mxu1 %v11262_v4 }
 0x231   : > { %5423 = vmatpush1.msra.mxu1 %v10415_v31  ;;  %5380 = vmatprep.mubr.f32.mxu0 %v11262_v4 }
 0x232   : > { %5291 = vmatmul.mubr.f32.gmra.mxu1 %v11259_v58 }
 0x233   : > { %5382 = vmatmul.mubr.f32.gmra.mxu0 %v11280_v38  ;;  %5456 = vmatprep.mubr.f32.mxu1 %v11262_v4 }
 0x234   : > { %5723 = vmatprep.mubr.f32.mxu0 %v11262_v4 }
 0x236   : > { %5458 = vmatmul.mubr.f32.vlgmr.msra.gmra.mxu1 %v11268_v57 }
 0x237   : > { %5463 = vmatprep.mubr.f32.mxu1 %v11262_v4 }
 0x23a   : > { %5465 = vmatmul.mubr.f32.gmra.mxu1 %v11280_v38 }
 0x23b   : > { %5830 = vmatprep.mubr.f32.mxu1 %v11262_v4 }
 0x283   : > { %v3386_v2 = vpop.f32.mrf.mxu0 }
 0x285   : > { %v3388_v44 = vpop.f32.mrf.mxu0 }
 0x287   : > { %v3397_v18 = vpop.f32.mrf.mxu0 }
 0x289   : > { %v3399_v40 = vpop.f32.mrf.mxu0 }
 0x28b   : > { %v3489_v23 = vpop.f32.mrf.mxu1  ;;  %v3577_v58 = vpop.f32.mrf.mxu0 }
 0x28c   : > { %v3490_v25 = vadd.f32 %v3489_v23, %v3386_v2 }
 0x28d   : > { %v3491_v19 = vpop.f32.mrf.mxu1  ;;  %v3579_v43 = vpop.f32.mrf.mxu0 }
 0x28e   : > { %v3492_v41 = vadd.f32 %v3491_v19, %v3388_v44  ;;  %v3578_v53 = vadd.f32 %v3577_v58, %v3490_v25 }
 0x290   : > { %v3580_v32 = vadd.f32 %v3579_v43, %v3492_v41 }
 0x291   : > { %v3496_v49 = vpop.f32.mrf.mxu1  ;;  %v3585_v57 = vpop.f32.mrf.mxu0 }
 0x292   : > { %v3497_v5 = vadd.f32 %v3496_v49, %v3397_v18 }
 0x293   : > { %v3498_v0 = vpop.f32.mrf.mxu1  ;;  %v3587_v47 = vpop.f32.mrf.mxu0 }
 0x294   : > { %v3499_v38 = vadd.f32 %v3498_v0, %v3399_v40  ;;  %v3586_v24 = vadd.f32 %v3585_v57, %v3497_v5 }
 0x295   : > { %v3663_v36 = vpop.f32.mrf.mxu1  ;;  %v3756_v22 = vpop.f32.mrf.mxu0 }
 0x296   : > { %v3588_v21 = vadd.f32 %v3587_v47, %v3499_v38  ;;  %v3664_v61 = vadd.f32 %v3663_v36, %v3578_v53 }
 0x297   : > { %v3665_v20 = vpop.f32.mrf.mxu1  ;;  %v3758_v33 = vpop.f32.mrf.mxu0 }
 0x298   : > { %v3666_v30 = vadd.f32 %v3665_v20, %v3580_v32  ;;  %v3757_v29 = vadd.f32 %v3756_v22, %v3664_v61 }
 0x29a   : > { %v3759_v37 = vadd.f32 %v3758_v33, %v3666_v30 }
 0x29b   : > { %v3672_v12 = vpop.f32.mrf.mxu1  ;;  %v10477_v27 = vpop.f32.mrf.mxu0 }
 0x29c   : > { %v10479_v17 = vadd.f32 %v3672_v12, %v3586_v24 }
 0x29d   : > { %v3674_v35 = vpop.f32.mrf.mxu1  ;;  %v10481_v39 = vpop.f32.mrf.mxu0 }
 0x29e   : > { %v10483_v14 = vadd.f32 %v3674_v35, %v3588_v21 }
 0x29f   : > { %v3839_v8 = vpop.f32.mrf.mxu1  ;;  %v3926_v45 = vpop.f32.mrf.mxu0 }
 0x2a0   : > { %v10485_v7 = vadd.f32 %v3839_v8, %v3757_v29 }
 0x2a1   : > { %v3841_v59 = vpop.f32.mrf.mxu1  ;;  %v3928_v1 = vpop.f32.mrf.mxu0 }
 0x2a2   : > { %v10487_v54 = vadd.f32 %v3841_v59, %v3759_v37 }
 0x2a5   : > { %v10489_v62 = vpop.f32.mrf.mxu1  ;;  %v3937_v50 = vpop.f32.mrf.mxu0 }
 0x2a7   : > { %v10491_v48 = vpop.f32.mrf.mxu1  ;;  %v3939_v60 = vpop.f32.mrf.mxu0 }
 0x2a9   : > { %v4029_v11 = vpop.f32.mrf.mxu1  ;;  %v4117_v6 = vpop.f32.mrf.mxu0 }
 0x2aa   : > { %v4030_v36 = vadd.f32 %v4029_v11, %v3926_v45  ;;  %v3764_v45 = vadd.f32 %v10477_v27, %v10479_v17  ;;  %v5481_v17 = vpop.permute.xlu1 %5480 }
 0x2ab   : > { %v4031_v26 = vpop.f32.mrf.mxu1  ;;  %v4119_v31 = vpop.f32.mrf.mxu0 }
 0x2ac   : > { %v4118_v33 = vadd.f32 %v4117_v6, %v4030_v36  ;;  %v4032_v37 = vadd.f32 %v4031_v26, %v3928_v1 }
 0x2ae   : > { %v4120_v11 = vadd.f32 %v4119_v31, %v4032_v37 }
 0x2af   : > { %v4036_v56 = vpop.f32.mrf.mxu1  ;;  %v4125_v52 = vpop.f32.mrf.mxu0 }
 0x2b0   : > { %v4037_v12 = vadd.f32 %v4036_v56, %v3937_v50  ;;  %v3847_v50 = vadd.f32 %v10489_v62, %v3764_v45 }
 0x2b1   : > { %v4038_v15 = vpop.f32.mrf.mxu1  ;;  %v10493_v28 = vpop.f32.mrf.mxu0 }
 0x2b2   : > { %v4126_v6 = vadd.f32 %v4125_v52, %v4037_v12 }
 0x2b3   : > { %v4203_v13 = vpop.f32.mrf.mxu1  ;;  %v4296_v9 = vpop.f32.mrf.mxu0 }
 0x2b4   : > { %v4204_v35 = vadd.f32 %v4203_v13, %v4118_v33 }
 0x2b5   : > { %v4205_v55 = vpop.f32.mrf.mxu1  ;;  %v10495_v16 = vpop.f32.mrf.mxu0 }
 0x2b6   : > { %v4297_v36 = vadd.f32 %v4296_v9, %v4204_v35  ;;  %v4206_v26 = vadd.f32 %v4205_v55, %v4120_v11  ;;  %v5487_v55 = vmul.f32 %v10487_v54, %v10487_v54 }
 0x2b9   : > { %v4212_v10 = vpop.f32.mrf.mxu1  ;;  %v10497_v63 = vpop.f32.mrf.mxu0 }
 0x2ba   : > { %v4213_v13 = vadd.f32 %v4212_v10, %v4126_v6  ;;  %v10542_v10 = vadd.f32 %v5481_v17, %v3847_v50 }
 0x2bb   : > { %v10499_v42 = vpop.f32.mrf.mxu1  ;;  %v10501_v46 = vpop.f32.mrf.mxu0 }
 0x2bd   : > { %v4379_v3 = vpop.f32.mrf.mxu1  ;;  %v4466_v51 = vpop.f32.mrf.mxu0 }
 0x2bf   : > { %v10503_v34 = vpop.f32.mrf.mxu1  ;;  %v4468_v2 = vpop.f32.mrf.mxu0 }
 0x2c3   : > { %v10505_v44 = vpop.f32.mrf.mxu1  ;;  %v4477_v18 = vpop.f32.mrf.mxu0 }
 0x2c5   : > { %v10507_v40 = vpop.f32.mrf.mxu1  ;;  %v10509_v23 = vpop.f32.mrf.mxu0 }
 0x2c6   : > { %11308 = vst [vmem:[#allocation20_spill] sm:$0xff] %v10507_v40  ;;  %v5476_v40 = vpop.permute.xlu0 %5475 }
 0x2c7   : > { %v4569_v58 = vpop.f32.mrf.mxu1  ;;  %v4657_v25 = vpop.f32.mrf.mxu0 }
 0x2c8   : > { %v4570_v8 = vadd.f32 %v4569_v58, %v4466_v51  ;;  %v10533_v51 = vadd.f32 %v4379_v3, %v4297_v36 }
 0x2c9   : > { %v4571_v19 = vpop.f32.mrf.mxu1  ;;  %v4659_v43 = vpop.f32.mrf.mxu0 }
 0x2ca   : > { %v4658_v56 = vadd.f32 %v4657_v25, %v4570_v8  ;;  %v4572_v58 = vadd.f32 %v4571_v19, %v4468_v2  ;;  %v4299_v2 = vadd.f32 %v10495_v16, %v4206_v26 }
 0x2cd   : > { %v4576_v41 = vpop.f32.mrf.mxu1  ;;  %v4665_v53 = vpop.f32.mrf.mxu0  ;;  %v11312_v6 = vld [vmem:[#allocation20_spill] sm:$0xff] }
 0x2cf   : > { %v4578_v32 = vpop.f32.mrf.mxu1  ;;  %v10511_v49 = vpop.f32.mrf.mxu0 }
 0x2d0   : > { %v4579_v25 = vadd.f32 %v4578_v32, %v10509_v23 }
 0x2d1   : > { %v4743_v57 = vpop.f32.mrf.mxu1  ;;  %v4836_v5 = vpop.f32.mrf.mxu0 }
 0x2d2   : > { %v4744_v31 = vadd.f32 %v4743_v57, %v4658_v56 }
 0x2d3   : > { %v4745_v0 = vpop.f32.mrf.mxu1  ;;  %v10513_v47 = vpop.f32.mrf.mxu0 }
 0x2d7   : > { %v4752_v38 = vpop.f32.mrf.mxu1  ;;  %v10515_v24 = vpop.f32.mrf.mxu0 }
 0x2d8   : > { %11309 = vst [vmem:[#allocation8_spill] sm:$0xff] %v10515_v24  ;;  %v4039_v24 = vadd.f32 %v4038_v15, %v3939_v60  ;;  %v4577_v60 = vadd.f32 %v4576_v41, %v4477_v18  ;;  %v5491_v18 = vmul.f32 %v10533_v51, %v10533_v51  ;;  %v4837_v41 = vadd.f32 %v4836_v5, %v4744_v31 }
 0x2d9   : > { %v10517_v22 = vpop.f32.mrf.mxu1  ;;  %v10519_v21 = vpop.f32.mrf.mxu0 }
 0x2da   : > { %11310 = vst [vmem:[#allocation12_spill] sm:$0xff] %v10519_v21  ;;  %v10528_v21 = vadd.f32 %v5476_v40, %v10485_v7  ;;  %v3766_v7 = vadd.f32 %v10481_v39, %v10483_v14  ;;  %v4128_v15 = vadd.f32 %v10493_v28, %v4039_v24  ;;  %v4304_v14 = vadd.f32 %v10497_v63, %v4213_v13 }
 0x2db   : > { %v4919_v61 = vpop.f32.mrf.mxu1  ;;  %v5006_v20 = vpop.f32.mrf.mxu0  ;;  %v4660_v28 = vadd.f32 %v4659_v43, %v4572_v58  ;;  %v10553_v40 = vadd.f32 %v10503_v34, %v4299_v2  ;;  %v4666_v19 = vadd.f32 %v4665_v53, %v4577_v60  ;;  %v5486_v34 = vmul.f32 %v10542_v10, %v10542_v10 }
 0x2dc   : > { %v5485_v52 = vmul.f32 %v10528_v21, %v10528_v21  ;;  %v10545_v3 = vadd.f32 %v10491_v48, %v3766_v7  ;;  %v4215_v39 = vadd.f32 %v10499_v42, %v4128_v15  ;;  %v10557_v48 = vadd.f32 %v10505_v44, %v4304_v14 }
 0x2dd   : > { %v10521_v30 = vpop.f32.mrf.mxu1  ;;  %v5008_v29 = vpop.f32.mrf.mxu0  ;;  %v4746_v16 = vadd.f32 %v4745_v0, %v4660_v28  ;;  %v4753_v63 = vadd.f32 %v4752_v38, %v4666_v19  ;;  %v10559_v12 = vadd.f32 %v4919_v61, %v4837_v41  ;;  %v5495_v5 = vmul.f32 %v10553_v40, %v10553_v40 }
 0x2de   : > { %11311 = vst [vmem:[#allocation23_spill] sm:$0xff] %v10521_v30  ;;  %v5489_v37 = vadd.f32 %v5487_v55, %v5485_v52  ;;  %v5488_v23 = vmul.f32 %v10545_v3, %v10545_v3  ;;  %v4306_v32 = vadd.f32 %v10501_v46, %v4215_v39  ;;  %v4668_v0 = vadd.f32 %v10511_v49, %v4579_v25 }
 0x2df   : > { %v5492_v61 = vmul.f32 %v10557_v48, %v10557_v48  ;;  %v11313_v36 = vld [vmem:[#allocation8_spill] sm:$0xff]  ;;  %v5499_v26 = vmul.f32 %v10559_v12, %v10559_v12 }
 0x2e0   : > { %v5493_v44 = vadd.f32 %v5491_v18, %v5489_v37  ;;  %v4755_v46 = vadd.f32 %v10517_v22, %v4668_v0  ;;  %v4844_v50 = vadd.f32 %v11313_v36, %v4753_v63 }
 0x2e1   : > { %v10523_v59 = vpop.f32.mrf.mxu1  ;;  %v5017_v4 = vpop.f32.mrf.mxu0 }
 0x2e2   : > { %v5497_v17 = vadd.f32 %v5495_v5, %v5493_v44  ;;  %v10583_v7 = vadd.f32 %v10523_v59, %v4844_v50 }
 0x2e3   : > { %v10530_v30 = vpop.f32.mrf.mxu1  ;;  %v5019_v1 = vpop.f32.mrf.mxu0 }
 0x2e4   : > { %v5501_v2 = vadd.f32 %v5499_v26, %v5497_v17  ;;  %v5500_v59 = vmul.f32 %v10583_v7, %v10583_v7 }
 0x2e5   : > { %v5109_v33 = vpop.f32.mrf.mxu1  ;;  %v5197_v27 = vpop.f32.mrf.mxu0  ;;  %v11314_v56 = vld [vmem:[#allocation23_spill] sm:$0xff] }
 0x2e6   : > { %v5110_v24 = vadd.f32 %v5109_v33, %v5006_v20  ;;  %v4839_v20 = vadd.f32 %v10513_v47, %v4746_v16 }
 0x2e7   : > { %v5111_v62 = vpop.f32.mrf.mxu1  ;;  %v5199_v9 = vpop.f32.mrf.mxu0 }
 0x2e8   : > { %v5112_v43 = vadd.f32 %v5111_v62, %v5008_v29  ;;  %v5198_v8 = vadd.f32 %v5197_v27, %v5110_v24  ;;  %v10573_v29 = vadd.f32 %v11312_v6, %v4306_v32  ;;  %v10580_v13 = vadd.f32 %v11314_v56, %v4839_v20  ;;  %v11315_v62 = vld [vmem:[#allocation12_spill] sm:$0xff] }
 0x2e9   : > { %v4846_v55 = vadd.f32 %v11315_v62, %v4755_v46 }
 0x2ea   : > { %v5116_v57 = vpop.f32.mrf.mxu1  ;;  %v5200_v58 = vadd.f32 %v5199_v9, %v5112_v43  ;;  %v5496_v15 = vmul.f32 %v10573_v29, %v10573_v29 }
 0x2eb   : > { %v5205_v42 = vpop.f32.mrf.mxu0  ;;  %v5117_v45 = vadd.f32 %v5116_v57, %v5017_v4  ;;  %v5490_v4 = vadd.f32 %v5488_v23, %v5486_v34  ;;  %v10593_v25 = vadd.f32 %v10530_v30, %v4846_v55 }
 0x2ec   : > { %v5118_v35 = vpop.f32.mrf.mxu1 }
 0x2ed   : > { %v5207_v53 = vpop.f32.mrf.mxu0  ;;  %v5119_v33 = vadd.f32 %v5118_v35, %v5019_v1  ;;  %v5206_v22 = vadd.f32 %v5205_v42, %v5117_v45  ;;  %v5494_v52 = vadd.f32 %v5492_v61, %v5490_v4  ;;  %v5503_v1 = vmul.f32 %v10580_v13, %v10580_v13 }
 0x2ee   : > { %v5283_v38 = vpop.f32.mrf.mxu1  ;;  %v5504_v30 = vmul.f32 %v10593_v25, %v10593_v25 }
 0x2ef   : > { %v5376_v11 = vpop.f32.mrf.mxu0  ;;  %v5284_v47 = vadd.f32 %v5283_v38, %v5198_v8  ;;  %v5208_v14 = vadd.f32 %v5207_v53, %v5119_v33  ;;  %v5498_v24 = vadd.f32 %v5496_v15, %v5494_v52  ;;  %v5505_v63 = vadd.f32 %v5503_v1, %v5501_v2 }
 0x2f0   : > { %v5285_v49 = vpop.f32.mrf.mxu1 }
 0x2f1   : > { %v5378_v27 = vpop.f32.mrf.mxu0  ;;  %v5286_v31 = vadd.f32 %v5285_v49, %v5200_v58  ;;  %v5377_v18 = vadd.f32 %v5376_v11, %v5284_v47  ;;  %v5502_v43 = vadd.f32 %v5500_v59, %v5498_v24 }
 0x2f2   : > { %v5292_v60 = vpop.f32.mrf.mxu1 }
 0x2f3   : > { %v5383_v9 = vpop.f32.mrf.mxu0  ;;  %v5293_v28 = vadd.f32 %v5292_v60, %v5206_v22  ;;  %v5379_v41 = vadd.f32 %v5378_v27, %v5286_v31  ;;  %v5506_v45 = vadd.f32 %v5504_v30, %v5502_v43 }
 0x2f4   : > { %v5294_v39 = vpop.f32.mrf.mxu1 }
 0x2f5   : > { %v5295_v57 = vadd.f32 %v5294_v39, %v5208_v14  ;;  %v5385_v42 = vpop.f32.mrf.mxu0  ;;  %v5384_v35 = vadd.f32 %v5383_v9, %v5293_v28  ;;  %v5548_v28 = vpop.permute.xlu1 %5547 }
 0x2f6   : > { %v5459_v19 = vpop.f32.mrf.mxu1 }
 0x2f7   : > { %v10595_v16 = vadd.f32 %v5459_v19, %v5377_v18  ;;  %v5386_v32 = vadd.f32 %v5385_v42, %v5295_v57  ;;  %v5553_v18 = vpop.permute.xlu0 %5552  ;;  %v5559_v42 = vld [vmem:[%s8845_s12] sm:$0xff] }
 0x2f8   : > { %v5461_v37 = vpop.f32.mrf.mxu1 }
 0x2f9   : > { %v5507_v34 = vmul.f32 %v10595_v16, %v10595_v16  ;;  %v10599_v23 = vadd.f32 %v5461_v37, %v5379_v41  ;;  %v5560_v41 = vld [vmem:[%s8845_s12 + $0x40] sm:$0xff] }
 0x2fa   : > { %v5466_v53 = vpop.f32.mrf.mxu1 }
 0x2fb   : > { %v5509_v44 = vadd.f32 %v5507_v34, %v5505_v63  ;;  %v5511_v5 = vmul.f32 %v10599_v23, %v10599_v23  ;;  %v10605_v0 = vadd.f32 %v5466_v53, %v5384_v35 }
 0x2fc   : > { %v5468_v38 = vpop.f32.mrf.mxu1 }
 0x2fd   : > { %v5513_v61 = vadd.f32 %v5511_v5, %v5509_v44  ;;  %v5508_v20 = vmul.f32 %v10605_v0, %v10605_v0  ;;  %v5469_v8 = vadd.f32 %v5468_v38, %v5386_v32 }
 0x2ff   : > { %8651 = vrsqrt.f32 %v5513_v61  ;;  %v5510_v11 = vadd.f32 %v5508_v20, %v5506_v45  ;;  %v5512_v6 = vmul.f32 %v5469_v8, %v5469_v8  ;;  %vm5517_vm1 = vcmp.eq.f32.partialorder %v5513_v61, inf }
 0x300   : > { %v5520_v58 = vand.u32 2147483648, %v5513_v61  ;;  %vm5519_vm3 = vcmp.eq.f32.partialorder %v5513_v61, 0.0 }
 0x301   : > { %v5514_v46 = vadd.f32 %v5512_v6, %v5510_v11 }
 0x303   : > { %8653 = vrsqrt.f32 %v5514_v46  ;;  %vm5524_vm2 = vcmp.eq.f32.partialorder %v5514_v46, inf  ;;  %v5527_v33 = vand.u32 2147483648, %v5514_v46  ;;  %vm5526_vm4 = vcmp.eq.f32.partialorder %v5514_v46, 0.0 }
 0x30c   : > { %v8652_v36 = vpop.eup %8651 }
 0x30d   : > { %v5516_v50 = vmul.f32 %v8652_v36, %v5513_v61 }
 0x30f   : > { %v5518_v49 = vsel %vm5517_vm1, %v5513_v61, %v5516_v50 }
 0x310   : > { %v8654_v26 = vpop.eup %8653  ;;  %v5521_v27 = vsel %vm5519_vm3, %v5520_v58, %v5518_v49  ;;  %v5647_v49 = vld [vmem:[%s11053_s8] sm:$0xff]  ;;  %v5648_v58 = vld [vmem:[%s11053_s8 + $0x8] sm:$0xff] }
 0x311   : > { %v5523_v56 = vmul.f32 %v8654_v26, %v5514_v46 }
 0x313   : > { %v5525_v47 = vsel %vm5524_vm2, %v5514_v46, %v5523_v56  ;;  %v5650_v56 = vsel %vm470_vm0, %v5647_v49, 0 }
 0x314   : > { %v5528_v4 = vsel %vm5526_vm4, %v5527_v33, %v5525_v47  ;;  %v10639_v33 = vand.u32 4294901760, %v5650_v56  ;;  %v5653_v47 = vsel %vm470_vm0, %v5648_v58, 0 }
 0x315   : > { %v5529_v17 = vadd.f32 %v5528_v4, %v5521_v27  ;;  %v10645_v4 = vand.u32 4294901760, %v5653_v47 }
 0x316   : > { %v10643_v27 = vsub.f32 %v5650_v56, %v10639_v33 }
 0x317   : > { %v5530_v60 = vrot.slane %v5529_v17, 4 }
 0x319   : > { %v5531_v22 = vadd.f32 %v5530_v60, %v5529_v17 }
 0x31b   : > { %v5532_v31 = vrot.slane %v5531_v22, 2 }
 0x31d   : > { %v5533_v52 = vadd.f32 %v5532_v31, %v5531_v22 }
 0x31f   : > { %v5534_v15 = vrot.slane %v5533_v52, 1 }
 0x321   : > { %v5535_v62 = vadd.f32 %v5534_v15, %v5533_v52  ;;  %v5572_v15 = vld [vmem:[%s8845_s12 + $0x50] sm:$0xff] }
 0x323   : > { %v5537_v55 = vmul.f32 0.0625, %v5535_v62  ;;  %v5566_v62 = vld [vmem:[%s8845_s12 + $0x48] sm:$0xff] }
 0x325   : > { %v5538_v2 = vadd.f32 1e-06, %v5537_v55 }
 0x327   : > { %8655 = vrcp.f32 %v5538_v2 }
 0x334   : > { %v8656_v39 = vpop.eup %8655 }
 0x335   : > { %v5540_v9 = vmul.f32 %v8656_v39, %v5538_v2 }
 0x337   : > { %v5541_v1 = vsub.f32 2.0, %v5540_v9  ;;  %v10658_v9 = vand.u32 4294901760, %v10643_v27 }
 0x339   : > { %v5542_v14 = vmul.f32 %v8656_v39, %v5541_v1 }
 0x33b   : > { %v10609_v59 = vmul.f32 %v5548_v28, %v5542_v14  ;;  %v10611_v19 = vmul.f32 %v5553_v18, %v5542_v14  ;;  %v5571_v14 = vld [vmem:[%s8845_s12 + $0x10] sm:$0xff]  ;;  %v5565_v18 = vld [vmem:[%s8845_s12 + $0x8] sm:$0xff] }
 0x33d   : > { %v5558_v57 = vmul.f32 %v10611_v19, %v10542_v10  ;;  %v5600_v24 = vmul.f32 %v10611_v19, %v5469_v8  ;;  %v5557_v37 = vmul.f32 %v10609_v59, %v10528_v21  ;;  %v5570_v31 = vmul.f32 %v10611_v19, %v10557_v48 }
 0x33e   : > { %v5564_v52 = vmul.f32 %v10611_v19, %v10545_v3  ;;  %v5569_v55 = vmul.f32 %v10609_v59, %v10533_v51  ;;  %v5563_v39 = vmul.f32 %v10609_v59, %v10487_v54  ;;  %v10663_v48 = vsub.f32 %v5653_v47, %v10645_v4  ;;  %v8665_v3 = vld [vmem:[%s8845_s12 + $0x78] sm:$0xff] }
 0x33f   : > { %v10620_v63 = vadd.f32 %v5560_v41, %v5558_v57  ;;  %v10622_v35 = vadd.f32 %v5559_v42, %v5557_v37  ;;  %v5602_v41 = vadd.f32 %v8665_v3, %v5600_v24  ;;  %v5574_v42 = vadd.f32 %v5572_v15, %v5570_v31  ;;  %v8666_v3 = vld [vmem:[%s8845_s12 + $0x38] sm:$0xff] }
 0x340   : > { %v5568_v51 = vadd.f32 %v5566_v62, %v5564_v52  ;;  %v5573_v37 = vadd.f32 %v5571_v14, %v5569_v55  ;;  %v5567_v54 = vadd.f32 %v5565_v18, %v5563_v39  ;;  %v10678_v24 = vand.u32 4294901760, %v10663_v48  ;;  %v5578_v39 = vld [vmem:[%s8845_s12 + $0x58] sm:$0xff]  ;;  %v5583_v14 = vld [vmem:[%s8845_s12 + $0x20] sm:$0xff] }
 0x341   : > { %v5604_v34 = vmul.f32 0.044715, %v10620_v63  ;;  %v5603_v43 = vmul.f32 0.044715, %v10622_v35  ;;  %v5576_v47 = vmul.f32 %v10611_v19, %v10573_v29  ;;  %v5599_v31 = vmul.f32 %v10609_v59, %v10599_v23 }
 0x342   : > { %v11316_v52 = vmov 0.0   ;;  %v5575_v23 = vmul.f32 %v10609_v59, %v10553_v40 }
 0x343   : > { %v5606_v30 = vmul.f32 %v5604_v34, %v10620_v63  ;;  %v5605_v53 = vmul.f32 %v5603_v43, %v10622_v35  ;;  %v5727_v43 = vsub.f32 %v10643_v27, %v10658_v9 }
 0x345   : > { %v5608_v10 = vmul.f32 %v5606_v30, %v10620_v63  ;;  %v5607_v32 = vmul.f32 %v5605_v53, %v10622_v35 }
 0x347   : > { %v5610_v44 = vadd.f32 %v5608_v10, %v10620_v63  ;;  %v5609_v21 = vadd.f32 %v5607_v32, %v10622_v35 }
 0x349   : > { %v5612_v5 = vmul.f32 2.0, %v5610_v44  ;;  %v5611_v38 = vmul.f32 2.0, %v5609_v21 }
 0x34b   : > { %v5614_v61 = vmul.f32 0.7978846, %v5612_v5  ;;  %v5613_v20 = vmul.f32 0.7978846, %v5611_v38 }
 0x34d   : > { %v5616_v8 = vsub.f32 0.0, %v5614_v61  ;;  %v5615_v45 = vsub.f32 0.0, %v5613_v20  ;;  %v5582_v20 = vmul.f32 %v10611_v19, %v10583_v7 }
 0x34f   : > { %v5619_v11 = vmul.f32 1.442695, %v5616_v8  ;;  %v5617_v6 = vmul.f32 1.442695, %v5615_v45  ;;  %v10693_v8 = vand.u32 4294901760, %v5727_v43 }
 0x351   : > { %8657 = vpow2.f32 %v5619_v11 }
 0x352   : > { %8659 = vpow2.f32 %v5617_v6  ;;  %v5738_v6 = vsub.f32 %v10663_v48, %v10678_v24 }
 0x35e   : > { %v8658_v46 = vpop.eup %8657 }
 0x35f   : > { %v8660_v36 = vpop.eup %8659  ;;  %v5622_v50 = vadd.f32 1.0, %v8658_v46  ;;  %v5584_v46 = vld [vmem:[%s8845_s12 + $0x60] sm:$0xff] }
 0x360   : > { %v5621_v26 = vadd.f32 1.0, %v8660_v36  ;;  %v5586_v58 = vadd.f32 %v5584_v46, %v5582_v20 }
 0x361   : > { %8661 = vrcp.f32 %v5622_v50 }
 0x362   : > { %8663 = vrcp.f32 %v5621_v26 }
 0x36e   : > { %v8662_v17 = vpop.eup %8661 }
 0x36f   : > { %v8664_v60 = vpop.eup %8663  ;;  %v5626_v22 = vmul.f32 %v8662_v17, %v5622_v50 }
 0x370   : > { %v5625_v2 = vmul.f32 %v8664_v60, %v5621_v26 }
 0x371   : > { %v5628_v1 = vsub.f32 2.0, %v5626_v22 }
 0x372   : > { %v5627_v28 = vsub.f32 2.0, %v5625_v2 }
 0x373   : > { %v10666_v57 = vmul.f32 %v8662_v17, %v5628_v1  ;;  %v10708_v17 = vand.u32 4294901760, %v5738_v6  ;;  %v5581_v1 = vmul.f32 %v10609_v59, %v10559_v12 }
 0x374   : > { %v10668_v34 = vmul.f32 %v8664_v60, %v5627_v28  ;;  %v5577_v28 = vld [vmem:[%s8845_s12 + $0x18] sm:$0xff] }
 0x375   : > { %v10673_v30 = vmul.f32 %v10666_v57, %v5602_v41  ;;  %v5636_v53 = vmul.f32 %v10666_v57, %v5574_v42  ;;  %v5634_v10 = vmul.f32 %v10666_v57, %v5568_v51  ;;  %v5640_v29 = vmul.f32 %v10666_v57, %v5586_v58  ;;  %v5596_v58 = vld [vmem:[%s8845_s12 + $0x70] sm:$0xff] }
 0x376   : > { %v5635_v32 = vmul.f32 %v10668_v34, %v5573_v37  ;;  %v5633_v44 = vmul.f32 %v10668_v34, %v5567_v54  ;;  %v5601_v41 = vadd.f32 %v8666_v3, %v5599_v31  ;;  %v5580_v37 = vadd.f32 %v5578_v39, %v5576_v47 }
 0x377   : > { %v10682_v21 = vand.u32 4294901760, %v5636_v53  ;;  %v10684_v5 = vand.u32 4294901760, %v5634_v10  ;;  %v10723_v51 = vand.u32 4294901760, %v5640_v29  ;;  %v5585_v12 = vadd.f32 %v5583_v14, %v5581_v1 }
 0x378   : > { %v10686_v38 = vand.u32 4294901760, %v5635_v32  ;;  %v10688_v61 = vand.u32 4294901760, %v5633_v44  ;;  %v10727_v54 = vmul.f32 %v10668_v34, %v5601_v41  ;;  %v5638_v40 = vmul.f32 %v10666_v57, %v5580_v37 }
 0x379   : > { %5684 = vmatprep.subr.mxu0 %v10682_v21  ;;  %v5775_v45 = vsub.f32 %v5636_v53, %v10682_v21  ;;  %v5781_v11 = vsub.f32 %v5634_v10, %v10684_v5  ;;  %v5579_v43 = vadd.f32 %v5577_v28, %v5575_v23  ;;  %v5639_v53 = vmul.f32 %v10668_v34, %v5585_v12 }
 0x37a   : > { %5686 = vmatpush1.msra.mxu0 %v10684_v5  ;;  %v5787_v36 = vsub.f32 %v5635_v32, %v10686_v38  ;;  %v5793_v50 = vsub.f32 %v5633_v44, %v10688_v61  ;;  %v10736_v32 = vsub.f32 %v5640_v29, %v10723_v51  ;;  %v10740_v44 = vand.u32 4294901760, %v5638_v40 }
 0x37b   : > { %5688 = vmatprep.subr.mxu0 %v10686_v38  ;;  %v5776_v7 = vand.u32 4294901760, %v5775_v45  ;;  %v5782_v26 = vand.u32 4294901760, %v5781_v11  ;;  %v5637_v10 = vmul.f32 %v10668_v34, %v5579_v43  ;;  %v10744_v20 = vand.u32 4294901760, %v5639_v53 }
 0x37c   : > { %5690 = vmatpush1.msra.mxu0 %v10688_v61  ;;  %v5788_v49 = vand.u32 4294901760, %v5787_v36  ;;  %v5794_v56 = vand.u32 4294901760, %v5793_v50  ;;  %v10756_v6 = vsub.f32 %v5638_v40, %v10740_v44  ;;  %v5593_v29 = vmul.f32 %v10609_v59, %v10595_v16 }
 0x37d   : > { %5729 = vmatmul.mubr.f32.vlgmr.msra.gmra.mxu0 %v10693_v8  ;;  %5875 = vmatprep.subr.mxu0 %v5775_v45  ;;  %v5777_v60 = vsub.f32 %v5775_v45, %v5776_v7  ;;  %v5783_v22 = vsub.f32 %v5781_v11, %v5782_v26  ;;  %v10748_v45 = vand.u32 4294901760, %v5637_v10  ;;  %v10760_v46 = vsub.f32 %v5639_v53, %v10744_v20 }
 0x37e   : > { %5878 = vmatpush1.msra.mxu0 %v5781_v11  ;;  %5734 = vmatprep.mubr.f32.mxu0 %v11316_v52  ;;  %v5789_v15 = vsub.f32 %v5787_v36, %v5788_v49  ;;  %v5795_v62 = vsub.f32 %v5793_v50, %v5794_v56  ;;  %v6316_v11 = vand.u32 4294901760, %v10736_v32 }
 0x37f   : > { %5881 = vmatprep.subr.mxu0 %v5787_v36  ;;  %v5778_v55 = vand.u32 4294901760, %v5777_v60  ;;  %v5784_v2 = vand.u32 4294901760, %v5783_v22  ;;  %v10763_v36 = vsub.f32 %v5637_v10, %v10748_v45 }
 0x380   : > { %5884 = vmatpush1.msra.mxu0 %v5793_v50  ;;  %v5790_v18 = vand.u32 4294901760, %v5789_v15  ;;  %v5796_v42 = vand.u32 4294901760, %v5795_v62  ;;  %v6317_v50 = vsub.f32 %v10736_v32, %v6316_v11  ;;  %v5588_v15 = vmul.f32 %v10611_v19, %v10593_v25  ;;  %v5590_v62 = vld [vmem:[%s8845_s12 + $0x68] sm:$0xff] }
 0x381   : > { %5740 = vmatmul.mubr.f32.gmra.mxu0 %v10708_v17  ;;  %5779 = vmatprep.subr.mxu1 %v5778_v55  ;;  %v5595_v55 = vld [vmem:[%s8845_s12 + $0x30] sm:$0xff]  ;;  %v5589_v25 = vld [vmem:[%s8845_s12 + $0x28] sm:$0xff]  ;;  %s445_s12 = scalar_select %p444_p10, %s8769_s20, 3 }
 0x382   : > { %6052 = vmatprep.subr.mxu0 %v5776_v7  ;;  %5785 = vmatpush1.msra.mxu1 %v5784_v2  ;;  %v6328_v7 = vand.u32 4294901760, %v10760_v46  ;;  %v5587_v2 = vmul.f32 %v10609_v59, %v10580_v13  ;;  %v5592_v39 = vadd.f32 %v5590_v62, %v5588_v15  ;;  %v5597_v16 = vadd.f32 %v5595_v55, %v5593_v29 }
 0x383   : > { %5791 = vmatprep.subr.mxu1 %v5790_v18  ;;  %5917 = vmatprep.mubr.f32.mxu0 %v11316_v52  ;;  %s8465_s22 = sshll.u32 %s445_s12, 3 }
 0x384   : > { %5797 = vmatpush1.msra.mxu1 %v5796_v42  ;;  %v5642_v1 = vmul.f32 %v10666_v57, %v5592_v39  ;;  %v5591_v14 = vadd.f32 %v5589_v25, %v5587_v2  ;;  %v5643_v13 = vmul.f32 %v10668_v34, %v5597_v16  ;;  %s447_s19 = scalar_lea.vmem %s11045_s0, %s8465_s22 }
 0x385   : > { %5832 = vmatmul.mubr.f32.vlgmr.msra.gmra.mxu1 %v10639_v33  ;;  %5920 = vmatmul.mubr.f32.vlgmr.msra.gmra.mxu0 %v10643_v27 }
 0x386   : > { %5963 = vmatprep.subr.mxu1 %v10682_v21  ;;  %6056 = vmatpush1.msra.mxu0 %v5782_v26  ;;  %v6318_v26 = vand.u32 4294901760, %v6317_v50  ;;  %v5641_v59 = vmul.f32 %v10668_v34, %v5591_v14  ;;  %v10823_v18 = vand.u32 4294901760, %v5642_v1  ;;  %v10827_v28 = vand.u32 4294901760, %v5643_v13 }
 0x387   : > { %5965 = vmatpush1.msra.mxu1 %v10684_v5  ;;  %6060 = vmatprep.subr.mxu0 %v5788_v49  ;;  %v6334_v49 = vand.u32 4294901760, %v10763_v36  ;;  %v10876_v50 = vand.u32 4294901760, %v10727_v54 }
 0x388   : > { %5967 = vmatprep.subr.mxu1 %v10686_v38  ;;  %6064 = vmatpush1.msra.mxu0 %v5794_v56  ;;  %v5594_v56 = vmul.f32 %v10611_v19, %v10605_v0  ;;  %v10831_v3 = vand.u32 4294901760, %v5641_v59  ;;  %v6861_v42 = vsub.f32 %v5642_v1, %v10823_v18  ;;  %v6867_v37 = vsub.f32 %v5643_v13, %v10827_v28 }
 0x389   : > { %5837 = vmatprep.mubr.f32.mxu1 %v11316_v52  ;;  %5925 = vmatprep.mubr.f32.mxu0 %v11316_v52 }
 0x38a   : > { %5969 = vmatpush1.msra.mxu1 %v10688_v61  ;;  %6224 = vmatprep.subr.mxu0 %v10723_v51  ;;  %v5598_v31 = vadd.f32 %v5596_v58, %v5594_v56  ;;  %v6873_v12 = vsub.f32 %v5641_v59, %v10831_v3  ;;  %v6862_v40 = vand.u32 4294901760, %v6861_v42  ;;  %v6868_v43 = vand.u32 4294901760, %v6867_v37 }
 0x38b   : > { %5839 = vmatmul.mubr.f32.gmra.mxu1 %v10645_v4  ;;  %5928 = vmatmul.mubr.f32.gmra.mxu0 %v10663_v48 }
 0x38c   : > { %6141 = vmatprep.subr.mxu1 %v10682_v21  ;;  %6002 = vmatprep.mubr.f32.mxu1 %v11316_v52  ;;  %v6322_v21 = vand.u32 4294901760, %v10756_v6  ;;  %v5644_v0 = vmul.f32 %v10666_v57, %v5598_v31  ;;  %v6874_v10 = vand.u32 4294901760, %v6873_v12 }
 0x38d   : > { %6097 = vmatprep.mubr.f32.mxu0 %v11316_v52 }
 0x38e   : > { %v10812_v19 = vand.u32 4294901760, %v5644_v0 }
 0x38f   : > { %6006 = vmatmul.mubr.f32.vlgmr.msra.gmra.mxu1 %v10658_v9  ;;  %6099 = vmatmul.mubr.f32.vlgmr.msra.gmra.mxu0 %v10639_v33 }
 0x390   : > { %6143 = vmatpush1.msra.mxu1 %v10684_v5  ;;  %6226 = vmatpush1.msra.mxu0 %v10740_v44  ;;  %v6323_v5 = vsub.f32 %v10756_v6, %v6322_v21  ;;  %v6855_v23 = vsub.f32 %v5644_v0, %v10812_v19 }
 0x391   : > { %6145 = vmatprep.subr.mxu1 %v10686_v38  ;;  %6228 = vmatprep.subr.mxu0 %v10744_v20  ;;  %v6329_v38 = vsub.f32 %v10760_v46, %v6328_v7 }
 0x392   : > { %6147 = vmatpush1.msra.mxu1 %v10688_v61  ;;  %6230 = vmatpush1.msra.mxu0 %v10748_v45  ;;  %v6335_v61 = vsub.f32 %v10763_v36, %v6334_v49  ;;  %v6324_v47 = vand.u32 4294901760, %v6323_v5  ;;  %v6856_v41 = vand.u32 4294901760, %v6855_v23 }
 0x393   : > { %6011 = vmatprep.mubr.f32.mxu1 %v11316_v52  ;;  %6104 = vmatprep.mubr.f32.mxu0 %v11316_v52  ;;  %v6330_v60 = vand.u32 4294901760, %v6329_v38 }
 0x394   : > { %6319 = vmatprep.subr.mxu1 %v6318_v26  ;;  %6415 = vmatprep.subr.mxu0 %v10736_v32  ;;  %v6336_v22 = vand.u32 4294901760, %v6335_v61  ;;  %v6863_v32 = vsub.f32 %v6861_v42, %v6862_v40  ;;  %v7778_v26 = vld [vmem:[%s11054_s9] sm:$0xff] }
 0x395   : > { %6015 = vmatmul.mubr.f32.gmra.mxu1 %v10678_v24  ;;  %6106 = vmatmul.mubr.f32.gmra.mxu0 %v10645_v4  ;;  %v7794_v38 = vsel %vm7792_vm5, %v7778_v26, 0 }
 0x396   : > { %6180 = vmatprep.mubr.f32.mxu1 %v11316_v52  ;;  %6263 = vmatprep.mubr.f32.mxu0 %v11316_v52  ;;  %v10911_v58 = vand.u32 4294901760, %v7794_v38 }
 0x398   : > { %v10920_v0 = vsub.f32 %v7794_v38, %v10911_v58 }
 0x399   : > { %6182 = vmatmul.mubr.f32.vlgmr.msra.gmra.mxu1 %v10639_v33  ;;  %6269 = vmatmul.mubr.f32.vlgmr.msra.gmra.mxu0 %v10693_v8 }
 0x39a   : > { %6325 = vmatpush1.msra.mxu1 %v6324_v47  ;;  %6418 = vmatpush1.msra.mxu0 %v10756_v6  ;;  %v7777_v47 = vld [vmem:[%s447_s19] sm:$0xff]  ;;  %v7869_v62 = vand.u32 4294901760, %v10920_v0 }
 0x39b   : > { %6331 = vmatprep.subr.mxu1 %v6330_v60  ;;  %6421 = vmatprep.subr.mxu0 %v10760_v46  ;;  %v10862_v46 = vand.u32 4294901760, %v10673_v30  ;;  %v10917_v31 = vand.u32 4294901760, %v7777_v47 }
 0x39c   : > { %6337 = vmatpush1.msra.mxu1 %v6336_v22  ;;  %6424 = vmatpush1.msra.mxu0 %v10763_v36 }
 0x39d   : > { %6187 = vmatprep.mubr.f32.mxu1 %v11316_v52  ;;  %6274 = vmatprep.mubr.f32.mxu0 %v11316_v52  ;;  %v7392_v36 = vsub.f32 %v10673_v30, %v10862_v46  ;;  %v7915_v29 = vsub.f32 %v7777_v47, %v10917_v31 }
 0x39e   : > { %6503 = vmatprep.subr.mxu1 %v10723_v51  ;;  %6592 = vmatprep.subr.mxu0 %v6316_v11 }
 0x39f   : > { %6189 = vmatmul.mubr.f32.gmra.mxu1 %v10645_v4  ;;  %6280 = vmatmul.mubr.f32.gmra.mxu0 %v10708_v17  ;;  %v7393_v30 = vand.u32 4294901760, %v7392_v36 }
 0x3a0   : > { %6370 = vmatprep.mubr.f32.mxu1 %v11316_v52  ;;  %6457 = vmatprep.mubr.f32.mxu0 %v11316_v52 }
 0x3a3   : > { %6372 = vmatmul.mubr.f32.vlgmr.msra.gmra.mxu1 %v10639_v33  ;;  %6460 = vmatmul.mubr.f32.vlgmr.msra.gmra.mxu0 %v10643_v27 }
 0x3a4   : > { %6505 = vmatpush1.msra.mxu1 %v10740_v44  ;;  %6596 = vmatpush1.msra.mxu0 %v6322_v21  ;;  %v7399_v21 = vsub.f32 %v10727_v54, %v10876_v50 }
 0x3a5   : > { %6507 = vmatprep.subr.mxu1 %v10744_v20  ;;  %6600 = vmatprep.subr.mxu0 %v6328_v7  ;;  %v7394_v7 = vsub.f32 %v7392_v36, %v7393_v30 }
 0x3a6   : > { %6509 = vmatpush1.msra.mxu1 %v10748_v45  ;;  %6604 = vmatpush1.msra.mxu0 %v6334_v49  ;;  %v7400_v54 = vand.u32 4294901760, %v7399_v21  ;;  %v7779_v49 = vld [vmem:[%s11054_s9 + $0x8] sm:$0xff] }
 0x3a7   : > { %6377 = vmatprep.mubr.f32.mxu1 %v11316_v52  ;;  %6465 = vmatprep.mubr.f32.mxu0 %v11316_v52  ;;  %v7395_v5 = vand.u32 4294901760, %v7394_v7  ;;  %v7797_v61 = vsel %vm7792_vm5, %v7779_v49, 0 }
 0x3a8   : > { %6681 = vmatprep.subr.mxu1 %v10723_v51  ;;  %6764 = vmatprep.subr.mxu0 %v10812_v19  ;;  %v6857_v51 = vsub.f32 %v6855_v23, %v6856_v41  ;;  %v7401_v56 = vsub.f32 %v7399_v21, %v7400_v54  ;;  %v10913_v60 = vand.u32 4294901760, %v7797_v61 }
 0x3a9   : > { %6379 = vmatmul.mubr.f32.gmra.mxu1 %v10645_v4  ;;  %6468 = vmatmul.mubr.f32.gmra.mxu0 %v10663_v48 }
 0x3aa   : > { %6542 = vmatprep.mubr.f32.mxu1 %v11316_v52  ;;  %6637 = vmatprep.mubr.f32.mxu0 %v11316_v52  ;;  %v6858_v53 = vand.u32 4294901760, %v6857_v51  ;;  %v7402_v22 = vand.u32 4294901760, %v7401_v56  ;;  %v10925_v15 = vsub.f32 %v7797_v61, %v10913_v60 }
 0x3ad   : > { %6546 = vmatmul.mubr.f32.vlgmr.msra.gmra.mxu1 %v10658_v9  ;;  %6639 = vmatmul.mubr.f32.vlgmr.msra.gmra.mxu0 %v10639_v33 }
 0x3ae   : > { %6683 = vmatpush1.msra.mxu1 %v10740_v44  ;;  %6766 = vmatpush1.msra.mxu0 %v10823_v18  ;;  %v6869_v44 = vsub.f32 %v6867_v37, %v6868_v43 }
 0x3af   : > { %6685 = vmatprep.subr.mxu1 %v10744_v20  ;;  %6768 = vmatprep.subr.mxu0 %v10827_v28  ;;  %v6875_v20 = vsub.f32 %v6873_v12, %v6874_v10 }
 0x3b0   : > { %6687 = vmatpush1.msra.mxu1 %v10748_v45  ;;  %6770 = vmatpush1.msra.mxu0 %v10831_v3  ;;  %v6864_v45 = vand.u32 4294901760, %v6863_v32  ;;  %v6870_v11 = vand.u32 4294901760, %v6869_v44 }
 0x3b1   : > { %6551 = vmatprep.mubr.f32.mxu1 %v11316_v52  ;;  %6644 = vmatprep.mubr.f32.mxu0 %v11316_v52  ;;  %v6876_v6 = vand.u32 4294901760, %v6875_v20 }
 0x3b2   : > { %6859 = vmatprep.subr.mxu1 %v6858_v53  ;;  %6955 = vmatprep.subr.mxu0 %v6855_v23 }
 0x3b3   : > { %6555 = vmatmul.mubr.f32.gmra.mxu1 %v10678_v24  ;;  %6646 = vmatmul.mubr.f32.gmra.mxu0 %v10645_v4 }
 0x3b4   : > { %6720 = vmatprep.mubr.f32.mxu1 %v11316_v52  ;;  %6803 = vmatprep.mubr.f32.mxu0 %v11316_v52 }
 0x3b7   : > { %6722 = vmatmul.mubr.f32.vlgmr.msra.gmra.mxu1 %v10639_v33  ;;  %6809 = vmatmul.mubr.f32.vlgmr.msra.gmra.mxu0 %v10693_v8 }
 0x3b8   : > { %6865 = vmatpush1.msra.mxu1 %v6864_v45  ;;  %6958 = vmatpush1.msra.mxu0 %v6861_v42 }
 0x3b9   : > { %6871 = vmatprep.subr.mxu1 %v6870_v11  ;;  %6961 = vmatprep.subr.mxu0 %v6867_v37 }
 0x3ba   : > { %6877 = vmatpush1.msra.mxu1 %v6876_v6  ;;  %6964 = vmatpush1.msra.mxu0 %v6873_v12 }
 0x3bb   : > { %6727 = vmatprep.mubr.f32.mxu1 %v11316_v52  ;;  %6814 = vmatprep.mubr.f32.mxu0 %v11316_v52 }
 0x3bc   : > { %7043 = vmatprep.subr.mxu1 %v10812_v19  ;;  %7132 = vmatprep.subr.mxu0 %v6856_v41 }
 0x3bd   : > { %6729 = vmatmul.mubr.f32.gmra.mxu1 %v10645_v4  ;;  %6820 = vmatmul.mubr.f32.gmra.mxu0 %v10708_v17 }
 0x3be   : > { %6910 = vmatprep.mubr.f32.mxu1 %v11316_v52  ;;  %6997 = vmatprep.mubr.f32.mxu0 %v11316_v52 }
 0x3c1   : > { %6912 = vmatmul.mubr.f32.vlgmr.msra.gmra.mxu1 %v10639_v33  ;;  %7000 = vmatmul.mubr.f32.vlgmr.msra.gmra.mxu0 %v10643_v27 }
 0x3c2   : > { %7045 = vmatpush1.msra.mxu1 %v10823_v18  ;;  %7136 = vmatpush1.msra.mxu0 %v6862_v40 }
 0x3c3   : > { %7047 = vmatprep.subr.mxu1 %v10827_v28  ;;  %7140 = vmatprep.subr.mxu0 %v6868_v43 }
 0x3c4   : > { %7049 = vmatpush1.msra.mxu1 %v10831_v3  ;;  %7144 = vmatpush1.msra.mxu0 %v6874_v10 }
 0x3c5   : > { %6917 = vmatprep.mubr.f32.mxu1 %v11316_v52  ;;  %7005 = vmatprep.mubr.f32.mxu0 %v11316_v52 }
 0x3c6   : > { %7221 = vmatprep.subr.mxu1 %v10812_v19  ;;  %8527 = vmatprep.subr.mxu0 %v10862_v46 }
 0x3c7   : > { %6919 = vmatmul.mubr.f32.gmra.mxu1 %v10645_v4  ;;  %7008 = vmatmul.mubr.f32.gmra.mxu0 %v10663_v48 }
 0x3c8   : > { %7082 = vmatprep.mubr.f32.mxu1 %v11316_v52  ;;  %7177 = vmatprep.mubr.f32.mxu0 %v11316_v52 }
 0x3cb   : > { %7086 = vmatmul.mubr.f32.vlgmr.msra.gmra.mxu1 %v10658_v9  ;;  %7179 = vmatmul.mubr.f32.vlgmr.msra.gmra.mxu0 %v10639_v33 }
 0x3cc   : > { %7223 = vmatpush1.msra.mxu1 %v10823_v18  ;;  %8528 = vmatpush3.msra.mxu0 %v10862_v46 }
 0x3cd   : > { %7225 = vmatprep.subr.mxu1 %v10827_v28  ;;  %8529 = vmatprep.subr.mxu0 %v10876_v50 }
 0x3ce   : > { %7227 = vmatpush1.msra.mxu1 %v10831_v3  ;;  %8530 = vmatpush3.msra.mxu0 %v10876_v50 }
 0x3cf   : > { %7091 = vmatprep.mubr.f32.mxu1 %v11316_v52  ;;  %7184 = vmatprep.mubr.f32.mxu0 %v11316_v52 }
 0x3d0   : > { %8534 = vmatprep.subr.mxu1 %v7395_v5  ;;  %8541 = vmatprep.subr.mxu0 %v7392_v36 }
 0x3d1   : > { %7095 = vmatmul.mubr.f32.gmra.mxu1 %v10678_v24  ;;  %7186 = vmatmul.mubr.f32.gmra.mxu0 %v10645_v4 }
 0x3d2   : > { %7260 = vmatprep.mubr.f32.mxu1 %v11316_v52  ;;  %8531 = vmatprep.mubr.f32.mxu0 %v10693_v8  ;;  %v5632_v8 = vmul.f32 %v10666_v57, %v10620_v63  ;;  %v7879_v57 = vand.u32 4294901760, %v10925_v15 }
 0x3d4   : > { %v10936_v63 = vand.u32 4294901760, %v5632_v8 }
 0x3d5   : > { %7262 = vmatmul.mubr.f32.vlgmr.msra.gmra.mxu1 %v10639_v33  ;;  %8532 = vmatmul.mubr.f32.vlgmr.msra.gmra.mxu0 %v10708_v17  ;;  %v5631_v17 = vmul.f32 %v10668_v34, %v10622_v35  ;;  %v7916_v34 = vand.u32 4294901760, %v7915_v29 }
 0x3d6   : > { %8535 = vmatpush3.msra.mxu1 %v7395_v5  ;;  %8542 = vmatpush3.msra.mxu0 %v7392_v36 }
 0x3d7   : > { %8536 = vmatprep.subr.mxu1 %v7402_v22  ;;  %8543 = vmatprep.subr.mxu0 %v7399_v21  ;;  %v10941_v35 = vand.u32 4294901760, %v5631_v17  ;;  %v7917_v25 = vsub.f32 %v7915_v29, %v7916_v34 }
 0x3d8   : > { %8537 = vmatpush3.msra.mxu1 %v7402_v22  ;;  %8544 = vmatpush3.msra.mxu0 %v7399_v21 }
 0x3d9   : > { %7267 = vmatprep.mubr.f32.mxu1 %v11316_v52  ;;  %8545 = vmatprep.mubr.f32.mxu0 %v10643_v27  ;;  %v7870_v27 = vsub.f32 %v10920_v0, %v7869_v62  ;;  %v7922_v52 = vsub.f32 %v5632_v8, %v10936_v63  ;;  %v7929_v55 = vsub.f32 %v5631_v17, %v10941_v35  ;;  %v7918_v1 = vand.u32 4294901760, %v7917_v25 }
 0x3da   : > { %8548 = vmatprep.subr.mxu1 %v10862_v46  ;;  %8555 = vmatprep.subr.mxu0 %v7393_v30 }
 0x3db   : > { %7269 = vmatmul.mubr.f32.gmra.mxu1 %v10645_v4  ;;  %8546 = vmatmul.mubr.f32.vlgmr.msra.gmra.mxu0 %v10663_v48  ;;  %v7880_v48 = vsub.f32 %v10925_v15, %v7879_v57  ;;  %v7871_v2 = vand.u32 4294901760, %v7870_v27  ;;  %v7923_v39 = vand.u32 4294901760, %v7922_v52  ;;  %v7930_v16 = vand.u32 4294901760, %v7929_v55 }
 0x3dc   : > { %8556 = vmatpush3.msra.mxu0 %v7393_v30  ;;  %8538 = vmatprep.mubr.f32.mxu1 %v10639_v33 }
 0x3dd   : > { %8557 = vmatprep.subr.mxu0 %v7400_v54  ;;  %8559 = vmatprep.mubr.f32.mxu0 %v10639_v33  ;;  %v7881_v19 = vand.u32 4294901760, %v7880_v48  ;;  %v7924_v14 = vsub.f32 %v7922_v52, %v7923_v39 }
 0x3de   : > { %8558 = vmatpush3.msra.mxu0 %v7400_v54 }
 0x3df   : > { %8569 = vmatprep.subr.mxu0 %v10917_v31  ;;  %8539 = vmatmul.mubr.f32.vlgmr.msra.gmra.mxu1 %v10645_v4 }
 0x3e0   : > { %8549 = vmatpush3.msra.mxu1 %v10862_v46  ;;  %8560 = vmatmul.mubr.f32.vlgmr.msra.gmra.mxu0 %v10645_v4 }
 0x3e1   : > { %8570 = vmatpush3.msra.mxu0 %v10917_v31  ;;  %8550 = vmatprep.subr.mxu1 %v10876_v50 }
 0x3e2   : > { %8571 = vmatprep.subr.mxu0 %v10936_v63  ;;  %8551 = vmatpush3.msra.mxu1 %v10876_v50 }
 0x3e3   : > { %8572 = vmatpush3.msra.mxu0 %v10936_v63  ;;  %8552 = vmatprep.mubr.f32.mxu1 %v10658_v9  ;;  %v7931_v9 = vsub.f32 %v7929_v55, %v7930_v16 }
 0x3e4   : > { %8562 = vmatprep.subr.mxu1 %v10862_v46  ;;  %8573 = vmatprep.subr.mxu0 %v10941_v35 }
 0x3e5   : > { %8553 = vmatmul.mubr.f32.vlgmr.msra.gmra.mxu1 %v10678_v24  ;;  %8574 = vmatpush3.msra.mxu0 %v10941_v35  ;;  %v7925_v24 = vand.u32 4294901760, %v7924_v14  ;;  %v7932_v13 = vand.u32 4294901760, %v7931_v9 }
 0x3e6   : > { %8563 = vmatpush3.msra.mxu1 %v10862_v46  ;;  %8575 = vmatprep.mubr.f32.mxu0 %v7871_v2 }
 0x3e7   : > { %8564 = vmatprep.subr.mxu1 %v10876_v50  ;;  %8576 = vmatmul.mubr.f32.vlgmr.msra.gmra.mxu0 %v7881_v19 }
 0x3e8   : > { %8587 = vmatprep.subr.mxu0 %v7915_v29  ;;  %8565 = vmatpush3.msra.mxu1 %v10876_v50 }
 0x3e9   : > { %8588 = vmatpush3.msra.mxu0 %v7915_v29  ;;  %8566 = vmatprep.mubr.f32.mxu1 %v10639_v33 }
 0x3ea   : > { %8578 = vmatprep.subr.mxu1 %v7918_v1  ;;  %8589 = vmatprep.subr.mxu0 %v7922_v52 }
 0x3eb   : > { %8567 = vmatmul.mubr.f32.vlgmr.msra.gmra.mxu1 %v10645_v4  ;;  %8590 = vmatpush3.msra.mxu0 %v7922_v52 }
 0x3ec   : > { %8579 = vmatpush3.msra.mxu1 %v7918_v1  ;;  %8591 = vmatprep.subr.mxu0 %v7929_v55 }
 0x3ed   : > { %8580 = vmatprep.subr.mxu1 %v7925_v24  ;;  %8592 = vmatpush3.msra.mxu0 %v7929_v55 }
 0x3ee   : > { %8581 = vmatpush3.msra.mxu1 %v7925_v24  ;;  %8593 = vmatprep.mubr.f32.mxu0 %v10920_v0 }
 0x3ef   : > { %8582 = vmatprep.subr.mxu1 %v7932_v13  ;;  %8605 = vmatprep.subr.mxu0 %v7916_v34 }
 0x3f0   : > { %8583 = vmatpush3.msra.mxu1 %v7932_v13  ;;  %8584 = vmatprep.mubr.f32.mxu1 %v10911_v58 }
 0x3f1   : > { %8594 = vmatmul.mubr.f32.vlgmr.msra.gmra.mxu0 %v10925_v15  ;;  %8585 = vmatmul.mubr.f32.vlgmr.msra.gmra.mxu1 %v10913_v60 }
 0x3f2   : > { %8606 = vmatpush3.msra.mxu0 %v7916_v34  ;;  %8596 = vmatprep.subr.mxu1 %v10917_v31 }
 0x3f3   : > { %8607 = vmatprep.subr.mxu0 %v7923_v39  ;;  %8597 = vmatpush3.msra.mxu1 %v10917_v31 }
 0x3f4   : > { %8608 = vmatpush3.msra.mxu0 %v7923_v39  ;;  %8598 = vmatprep.subr.mxu1 %v10936_v63 }
 0x3f5   : > { %8609 = vmatprep.subr.mxu0 %v7930_v16  ;;  %8599 = vmatpush3.msra.mxu1 %v10936_v63 }
 0x3f6   : > { %8610 = vmatpush3.msra.mxu0 %v7930_v16  ;;  %8600 = vmatprep.subr.mxu1 %v10941_v35 }
 0x3f7   : > { %8601 = vmatpush3.msra.mxu1 %v10941_v35  ;;  %8602 = vmatprep.mubr.f32.mxu1 %v7869_v62 }
 0x3f8   : > { %8603 = vmatmul.mubr.f32.vlgmr.msra.gmra.mxu1 %v7879_v57  ;;  %8614 = vmatprep.subr.mxu1 %v10917_v31 }
 0x3f9   : > { %8611 = vmatprep.mubr.f32.mxu0 %v10911_v58  ;;  %8615 = vmatpush3.msra.mxu1 %v10917_v31 }
 0x3fa   : > { %8612 = vmatmul.mubr.f32.vlgmr.msra.gmra.mxu0 %v10913_v60  ;;  %8616 = vmatprep.subr.mxu1 %v10936_v63 }
 0x3fb   : > { %8617 = vmatpush3.msra.mxu1 %v10936_v63  ;;  %8620 = vmatprep.mubr.f32.mxu1 %v10911_v58 }
 0x3fc   : > { %8618 = vmatprep.subr.mxu1 %v10941_v35 }
 0x3fd   : > { %8619 = vmatpush3.msra.mxu1 %v10941_v35 }
 0x3fe   : > { %8621 = vmatmul.mubr.f32.vlgmr.msra.gmra.mxu1 %v10913_v60 }
 0x43d   : > { %v5730_v33 = vpop.f32.mrf.mxu0 }
 0x43f   : > { %v5732_v4 = vpop.f32.mrf.mxu0 }
 0x441   : > { %v5741_v59 = vpop.f32.mrf.mxu0 }
 0x443   : > { %v5743_v23 = vpop.f32.mrf.mxu0 }
 0x445   : > { %v5833_v18 = vpop.f32.mrf.mxu1  ;;  %v5921_v28 = vpop.f32.mrf.mxu0 }
 0x446   : > { %v5834_v40 = vadd.f32 %v5833_v18, %v5730_v33 }
 0x447   : > { %v5835_v3 = vpop.f32.mrf.mxu1  ;;  %v5923_v41 = vpop.f32.mrf.mxu0 }
 0x448   : > { %v5836_v10 = vadd.f32 %v5835_v3, %v5732_v4  ;;  %v5922_v20 = vadd.f32 %v5921_v28, %v5834_v40 }
 0x44a   : > { %v5924_v45 = vadd.f32 %v5923_v41, %v5836_v10 }
 0x44b   : > { %v5840_v42 = vpop.f32.mrf.mxu1  ;;  %v5929_v37 = vpop.f32.mrf.mxu0 }
 0x44c   : > { %v5841_v11 = vadd.f32 %v5840_v42, %v5741_v59 }
 0x44d   : > { %v5842_v12 = vpop.f32.mrf.mxu1  ;;  %v5931_v51 = vpop.f32.mrf.mxu0 }
 0x44e   : > { %v5843_v50 = vadd.f32 %v5842_v12, %v5743_v23  ;;  %v5930_v26 = vadd.f32 %v5929_v37, %v5841_v11 }
 0x44f   : > { %v6007_v43 = vpop.f32.mrf.mxu1  ;;  %v6100_v53 = vpop.f32.mrf.mxu0 }
 0x450   : > { %v6008_v6 = vadd.f32 %v6007_v43, %v5922_v20  ;;  %v5932_v38 = vadd.f32 %v5931_v51, %v5843_v50 }
 0x451   : > { %v6009_v32 = vpop.f32.mrf.mxu1  ;;  %v6102_v44 = vpop.f32.mrf.mxu0 }
 0x452   : > { %v6010_v30 = vadd.f32 %v6009_v32, %v5924_v45  ;;  %v6101_v54 = vadd.f32 %v6100_v53, %v6008_v6 }
 0x454   : > { %v6103_v61 = vadd.f32 %v6102_v44, %v6010_v30 }
 0x455   : > { %v6016_v46 = vpop.f32.mrf.mxu1  ;;  %v6107_v36 = vpop.f32.mrf.mxu0 }
 0x456   : > { %v6017_v56 = vadd.f32 %v6016_v46, %v5930_v26 }
 0x457   : > { %v6018_v21 = vpop.f32.mrf.mxu1  ;;  %v6109_v7 = vpop.f32.mrf.mxu0 }
 0x458   : > { %v6019_v22 = vadd.f32 %v6018_v21, %v5932_v38  ;;  %v6108_v0 = vadd.f32 %v6107_v36, %v6017_v56 }
 0x459   : > { %v6183_v49 = vpop.f32.mrf.mxu1  ;;  %v6270_v5 = vpop.f32.mrf.mxu0 }
 0x45a   : > { %v6184_v58 = vadd.f32 %v6183_v49, %v6101_v54  ;;  %v6110_v17 = vadd.f32 %v6109_v7, %v6019_v22 }
 0x45b   : > { %v6185_v47 = vpop.f32.mrf.mxu1  ;;  %v6272_v60 = vpop.f32.mrf.mxu0 }
 0x45c   : > { %8316 = vst [vmem:[%s10995_s29 + $0x8] sm:$0xff] %v6184_v58  ;;  %v6186_v31 = vadd.f32 %v6185_v47, %v6103_v61 }
 0x45e   : > { %8317 = vst [vmem:[%s10995_s29 + $0x10] sm:$0xff] %v6186_v31 }
 0x45f   : > { %v6190_v8 = vpop.f32.mrf.mxu1  ;;  %v6281_v15 = vpop.f32.mrf.mxu0 }
 0x460   : > { %v6191_v62 = vadd.f32 %v6190_v8, %v6108_v0 }
 0x461   : > { %v6192_v29 = vpop.f32.mrf.mxu1  ;;  %v6283_v63 = vpop.f32.mrf.mxu0 }
 0x462   : > { %8323 = vst [vmem:[%s10995_s29 + $0x48] sm:$0xff] %v6191_v62  ;;  %v6193_v57 = vadd.f32 %v6192_v29, %v6110_v17 }
 0x463   : > { %v6373_v35 = vpop.f32.mrf.mxu1  ;;  %v6461_v27 = vpop.f32.mrf.mxu0 }
 0x464   : > { %8324 = vst [vmem:[%s10995_s29 + $0x50] sm:$0xff] %v6193_v57  ;;  %v6374_v19 = vadd.f32 %v6373_v35, %v6270_v5 }
 0x465   : > { %v6375_v34 = vpop.f32.mrf.mxu1  ;;  %v6463_v48 = vpop.f32.mrf.mxu0 }
 0x466   : > { %v6376_v1 = vadd.f32 %v6375_v34, %v6272_v60  ;;  %v6462_v24 = vadd.f32 %v6461_v27, %v6374_v19 }
 0x468   : > { %v6464_v13 = vadd.f32 %v6463_v48, %v6376_v1 }
 0x469   : > { %v6380_v52 = vpop.f32.mrf.mxu1  ;;  %v6469_v55 = vpop.f32.mrf.mxu0 }
 0x46a   : > { %v6381_v33 = vadd.f32 %v6380_v52, %v6281_v15 }
 0x46b   : > { %v6382_v2 = vpop.f32.mrf.mxu1  ;;  %v6471_v25 = vpop.f32.mrf.mxu0 }
 0x46c   : > { %v6383_v18 = vadd.f32 %v6382_v2, %v6283_v63  ;;  %v6470_v42 = vadd.f32 %v6469_v55, %v6381_v33 }
 0x46d   : > { %v6547_v39 = vpop.f32.mrf.mxu1  ;;  %v6640_v16 = vpop.f32.mrf.mxu0 }
 0x46e   : > { %v6548_v4 = vadd.f32 %v6547_v39, %v6462_v24  ;;  %v6472_v40 = vadd.f32 %v6471_v25, %v6383_v18 }
 0x46f   : > { %v6549_v14 = vpop.f32.mrf.mxu1  ;;  %v6642_v9 = vpop.f32.mrf.mxu0 }
 0x470   : > { %v6550_v28 = vadd.f32 %v6549_v14, %v6464_v13  ;;  %v6641_v37 = vadd.f32 %v6640_v16, %v6548_v4 }
 0x472   : > { %v6643_v43 = vadd.f32 %v6642_v9, %v6550_v28 }
 0x473   : > { %v6556_v59 = vpop.f32.mrf.mxu1  ;;  %v6647_v23 = vpop.f32.mrf.mxu0 }
 0x474   : > { %v6557_v53 = vadd.f32 %v6556_v59, %v6470_v42 }
 0x475   : > { %v6558_v3 = vpop.f32.mrf.mxu1  ;;  %v6649_v41 = vpop.f32.mrf.mxu0 }
 0x476   : > { %v6559_v20 = vadd.f32 %v6558_v3, %v6472_v40  ;;  %v6648_v11 = vadd.f32 %v6647_v23, %v6557_v53 }
 0x477   : > { %v6723_v12 = vpop.f32.mrf.mxu1  ;;  %v6810_v51 = vpop.f32.mrf.mxu0 }
 0x478   : > { %v6724_v10 = vadd.f32 %v6723_v12, %v6641_v37  ;;  %v6650_v36 = vadd.f32 %v6649_v41, %v6559_v20 }
 0x479   : > { %v6725_v32 = vpop.f32.mrf.mxu1  ;;  %v6812_v44 = vpop.f32.mrf.mxu0 }
 0x47a   : > { %8318 = vst [vmem:[%s10995_s29 + $0x18] sm:$0xff] %v6724_v10  ;;  %v6726_v45 = vadd.f32 %v6725_v32, %v6643_v43 }
 0x47c   : > { %8319 = vst [vmem:[%s10995_s29 + $0x20] sm:$0xff] %v6726_v45 }
 0x47d   : > { %v6730_v6 = vpop.f32.mrf.mxu1  ;;  %v6821_v46 = vpop.f32.mrf.mxu0 }
 0x47e   : > { %v6731_v50 = vadd.f32 %v6730_v6, %v6648_v11 }
 0x47f   : > { %v6732_v30 = vpop.f32.mrf.mxu1  ;;  %v6823_v21 = vpop.f32.mrf.mxu0 }
 0x480   : > { %8325 = vst [vmem:[%s10995_s29 + $0x58] sm:$0xff] %v6731_v50  ;;  %v6733_v7 = vadd.f32 %v6732_v30, %v6650_v36 }
 0x481   : > { %v6913_v26 = vpop.f32.mrf.mxu1  ;;  %v7001_v54 = vpop.f32.mrf.mxu0 }
 0x482   : > { %8326 = vst [vmem:[%s10995_s29 + $0x60] sm:$0xff] %v6733_v7  ;;  %v6914_v47 = vadd.f32 %v6913_v26, %v6810_v51  ;;  %v7790_v7 = vpop.permute.xlu1 %7789 }
 0x483   : > { %v6915_v49 = vpop.f32.mrf.mxu1  ;;  %v7003_v5 = vpop.f32.mrf.mxu0 }
 0x484   : > { %v6916_v31 = vadd.f32 %v6915_v49, %v6812_v44  ;;  %v7002_v15 = vadd.f32 %v7001_v54, %v6914_v47 }
 0x486   : > { %v7004_v17 = vadd.f32 %v7003_v5, %v6916_v31  ;;  %v7785_v5 = vpop.permute.xlu0 %7784 }
 0x487   : > { %v6920_v38 = vpop.f32.mrf.mxu1  ;;  %v7009_v61 = vpop.f32.mrf.mxu0 }
 0x488   : > { %v6921_v62 = vadd.f32 %v6920_v38, %v6821_v46 }
 0x489   : > { %v6922_v56 = vpop.f32.mrf.mxu1  ;;  %v7011_v58 = vpop.f32.mrf.mxu0 }
 0x48a   : > { %v6923_v35 = vadd.f32 %v6922_v56, %v6823_v21  ;;  %v7010_v52 = vadd.f32 %v7009_v61, %v6921_v62 }
 0x48b   : > { %v7087_v60 = vpop.f32.mrf.mxu1  ;;  %v7180_v22 = vpop.f32.mrf.mxu0 }
 0x48c   : > { %v7088_v29 = vadd.f32 %v7087_v60, %v7002_v15  ;;  %v7012_v19 = vadd.f32 %v7011_v58, %v6923_v35 }
 0x48d   : > { %v7089_v0 = vpop.f32.mrf.mxu1  ;;  %v7182_v8 = vpop.f32.mrf.mxu0 }
 0x48e   : > { %v7090_v27 = vadd.f32 %v7089_v0, %v7004_v17  ;;  %v7181_v55 = vadd.f32 %v7180_v22, %v7088_v29 }
 0x490   : > { %v7183_v39 = vadd.f32 %v7182_v8, %v7090_v27 }
 0x491   : > { %v7096_v63 = vpop.f32.mrf.mxu1  ;;  %v7187_v57 = vpop.f32.mrf.mxu0 }
 0x492   : > { %v7097_v16 = vadd.f32 %v7096_v63, %v7010_v52 }
 0x493   : > { %v7098_v34 = vpop.f32.mrf.mxu1  ;;  %v7189_v48 = vpop.f32.mrf.mxu0 }
 0x494   : > { %v7099_v9 = vadd.f32 %v7098_v34, %v7012_v19  ;;  %v7188_v33 = vadd.f32 %v7187_v57, %v7097_v16  ;;  %v8360_v19 = vld [vmem:[%s10995_s29 + $0x20] sm:$0xff] (%p8784_p5) }
 0x495   : > { %v7263_v2 = vpop.f32.mrf.mxu1  ;;  %v8533_v25 = vpop.f32.mrf.mxu0  ;;  %8361 = vst [vmem:[%s8339_s14 + $0x20] sm:$0xff] (%p8784_p5), %v8360_v19 }
 0x496   : > { %v7264_v1 = vadd.f32 %v7263_v2, %v7181_v55  ;;  %v7190_v59 = vadd.f32 %v7189_v48, %v7099_v9  ;;  %v8354_v55 = vld [vmem:[%s10995_s29 + $0x8] sm:$0xff] (%p8784_p5)  ;;  %v8356_v2 = vld [vmem:[%s10995_s29 + $0x10] sm:$0xff] (%p8784_p5) }
 0x497   : > { %v7265_v14 = vpop.f32.mrf.mxu1  ;;  %v7348_v13 = vpop.f32.mrf.mxu0  ;;  %8355 = vst [vmem:[%s8339_s14 + $0x8] sm:$0xff] (%p8784_p5), %v8354_v55  ;;  %8357 = vst [vmem:[%s8339_s14 + $0x10] sm:$0xff] (%p8784_p5), %v8356_v2  ;;  %v8370_v9 = vld [vmem:[%s10995_s29 + $0x48] sm:$0xff] (%p8784_p5) }
 0x498   : > { %8320 = vst [vmem:[%s10995_s29 + $0x28] sm:$0xff] %v7264_v1  ;;  %v7266_v24 = vadd.f32 %v7265_v14, %v7183_v39  ;;  %8371 = vst [vmem:[%s8339_s14 + $0x108] sm:$0xff] (%p8784_p5), %v8370_v9 }
 0x49a   : > { %8321 = vst [vmem:[%s10995_s29 + $0x30] sm:$0xff] %v7266_v24  ;;  %v8372_v24 = vld [vmem:[%s10995_s29 + $0x50] sm:$0xff] (%p8784_p5) }
 0x49b   : > { %v7270_v4 = vpop.f32.mrf.mxu1  ;;  %v8547_v18 = vpop.f32.mrf.mxu0  ;;  %8373 = vst [vmem:[%s8339_s14 + $0x110] sm:$0xff] (%p8784_p5), %v8372_v24 }
 0x49c   : > { %v7271_v23 = vadd.f32 %v7270_v4, %v7188_v33  ;;  %v8376_v33 = vld [vmem:[%s10995_s29 + $0x60] sm:$0xff] (%p8784_p5) }
 0x49d   : > { %v7272_v28 = vpop.f32.mrf.mxu1  ;;  %v7521_v42 = vpop.f32.mrf.mxu0  ;;  %8377 = vst [vmem:[%s8339_s14 + $0x120] sm:$0xff] (%p8784_p5), %v8376_v33 }
 0x49e   : > { %8327 = vst [vmem:[%s10995_s29 + $0x68] sm:$0xff] %v7271_v23  ;;  %v7273_v3 = vadd.f32 %v7272_v28, %v7190_v59 }
 0x49f   : > { %v8540_v41 = vpop.f32.mrf.mxu1  ;;  %v8362_v39 = vld [vmem:[%s10995_s29 + $0x28] sm:$0xff] (%p8784_p5) }
 0x4a0   : > { %8328 = vst [vmem:[%s10995_s29 + $0x70] sm:$0xff] %v7273_v3  ;;  %v7446_v37 = vadd.f32 %v8540_v41, %v8533_v25  ;;  %v8561_v43 = vpop.f32.mrf.mxu0  ;;  %v8358_v25 = vld [vmem:[%s10995_s29 + $0x18] sm:$0xff] (%p8784_p5)  ;;  %8363 = vst [vmem:[%s8339_s14 + $0x28] sm:$0xff] (%p8784_p5), %v8362_v39 }
 0x4a1   : > { %v7439_v12 = vpop.f32.mrf.mxu1  ;;  %8359 = vst [vmem:[%s8339_s14 + $0x18] sm:$0xff] (%p8784_p5), %v8358_v25  ;;  %v8364_v16 = vld [vmem:[%s10995_s29 + $0x30] sm:$0xff] (%p8784_p5) }
 0x4a2   : > { %v7440_v51 = vadd.f32 %v7439_v12, %v7348_v13  ;;  %v7529_v40 = vadd.f32 %v8547_v18, %v7446_v37  ;;  %v7688_v20 = vpop.f32.mrf.mxu0  ;;  %8365 = vst [vmem:[%s8339_s14 + $0x30] sm:$0xff] (%p8784_p5), %v8364_v16  ;;  %v8374_v13 = vld [vmem:[%s10995_s29 + $0x58] sm:$0xff] (%p8784_p5) }
 0x4a3   : > { %8375 = vst [vmem:[%s8339_s14 + $0x118] sm:$0xff] (%p8784_p5), %v8374_v13 }
 0x4a4   : > { %v7522_v53 = vadd.f32 %v7521_v42, %v7440_v51 }
 0x4a5   : > { %v8554_v10 = vpop.f32.mrf.mxu1  ;;  %v8378_v4 = vld [vmem:[%s10995_s29 + $0x68] sm:$0xff] (%p8784_p5) }
 0x4a6   : > { %v7612_v32 = vadd.f32 %v8554_v10, %v7529_v40  ;;  %8379 = vst [vmem:[%s8339_s14 + $0x128] sm:$0xff] (%p8784_p5), %v8378_v4 }
 0x4a7   : > { %v7603_v44 = vpop.f32.mrf.mxu1  ;;  %v8577_v36 = vpop.f32.mrf.mxu0  ;;  %v8380_v59 = vld [vmem:[%s10995_s29 + $0x70] sm:$0xff] (%p8784_p5) }
 0x4a8   : > { %v7604_v45 = vadd.f32 %v7603_v44, %v7522_v53  ;;  %v7695_v11 = vadd.f32 %v8561_v43, %v7612_v32  ;;  %v7884_v54 = vadd.f32 %v8577_v36, %v7790_v7  ;;  %8381 = vst [vmem:[%s8339_s14 + $0x130] sm:$0xff] (%p8784_p5), %v8380_v59 }
 0x4a9   : > { %v7873_v26 = vpop.f32.mrf.mxu0 }
 0x4aa   : > { %v7689_v6 = vadd.f32 %v7688_v20, %v7604_v45  ;;  %v7874_v61 = vadd.f32 %v7873_v26, %v7785_v5 }
 0x4ab   : > { %v8568_v46 = vpop.f32.mrf.mxu1 }
 0x4ac   : > { %v7774_v50 = vadd.f32 %v8568_v46, %v7695_v11 }
 0x4ad   : > { %v7767_v30 = vpop.f32.mrf.mxu1 }
 0x4ae   : > { %8329 = vst [vmem:[%s10995_s29 + $0x78] sm:$0xff] %v7774_v50  ;;  %v7768_v21 = vadd.f32 %v7767_v30, %v7689_v6 }
 0x4b0   : > { %8322 = vst [vmem:[%s10995_s29 + $0x38] sm:$0xff] %v7768_v21 }
 0x4b1   : > { %v8586_v49 = vpop.f32.mrf.mxu1  ;;  %v8595_v38 = vpop.f32.mrf.mxu0 }
 0x4b2   : > { %v7976_v56 = vadd.f32 %v8586_v49, %v7884_v54 }
 0x4b3   : > { %v7969_v58 = vpop.f32.mrf.mxu1  ;;  %v8053_v60 = vpop.f32.mrf.mxu0 }
 0x4b4   : > { %v7970_v47 = vadd.f32 %v7969_v58, %v7874_v61  ;;  %v8061_v22 = vadd.f32 %v8595_v38, %v7976_v56 }
 0x4b5   : > { %v8382_v23 = vld [vmem:[%s10995_s29 + $0x78] sm:$0xff] (%p8784_p5) }
 0x4b6   : > { %v8054_v0 = vadd.f32 %v8053_v60, %v7970_v47  ;;  %8383 = vst [vmem:[%s8339_s14 + $0x138] sm:$0xff] (%p8784_p5), %v8382_v23 }
 0x4b7   : > { %v8366_v1 = vld [vmem:[%s10995_s29 + $0x38] sm:$0xff] (%p8784_p5) }
 0x4b8   : > { %v8604_v31 = vpop.f32.mrf.mxu1  ;;  %8367 = vst [vmem:[%s8339_s14 + $0x38] sm:$0xff] (%p8784_p5), %v8366_v1 }
 0x4b9   : > { %v8145_v8 = vadd.f32 %v8604_v31, %v8061_v22 }
 0x4ba   : > { %v8136_v15 = vpop.f32.mrf.mxu1  ;;  %v8613_v17 = vpop.f32.mrf.mxu0 }
 0x4bb   : > { %v8137_v62 = vadd.f32 %v8136_v15, %v8054_v0  ;;  %v8231_v63 = vadd.f32 %v8613_v17, %v8145_v8 }
 0x4bc   : > { %v8224_v29 = vpop.f32.mrf.mxu0 }
 0x4bd   : > { %v8225_v35 = vadd.f32 %v8224_v29, %v8137_v62 }
 0x4be   : > { %v8622_v57 = vpop.f32.mrf.mxu1 }
 0x4bf   : > { %v8311_v27 = vadd.f32 %v8622_v57, %v8231_v63  ;;  %8336 = sbr.rel (!%p8784_p5) target bundleno = 1228 (0x4cc), region = 91 }
 0x4c0   : > { %v8304_v34 = vpop.f32.mrf.mxu1 }
 0x4c1   : > { %8315 = vst [vmem:[%s10995_s29 + $0x40] sm:$0xff] %v8311_v27  ;;  %v8305_v48 = vadd.f32 %v8304_v34, %v8225_v35 }
 0x4c3   : > { %8314 = vst [vmem:[%s10995_s29] sm:$0xff] %v8305_v48 }
 0x4c8   : > { %v8368_v14 = vld [vmem:[%s10995_s29 + $0x40] sm:$0xff] }
 0x4c9   : > { %8369 = vst [vmem:[%s8339_s14 + $0x100] sm:$0xff] %v8368_v14 }
 0x4ca   : > { %v8352_v52 = vld [vmem:[%s10995_s29] sm:$0xff] }
 0x4cb   : > { %8353 = vst [vmem:[%s8339_s14] sm:$0xff] %v8352_v52 }
 0x4cc PF: > { %p18_p11 = scmp.ge.s32.totalorder %s8772_s21, 6   ;;  %s11317_s17 = smov %s8685_s18 }
 0x4cd   : > { %s11318_s18 = smov %s8782_s24  ;;  %s11319_s19 = smov %s8772_s21 }
 0x4ce   :  { %20 = sbr.rel (!%p18_p11) target bundleno = 2 (0x2), region = 148 }

</bundles_post_ra>
